<compile_context>
chip_gen: v7x
topology: tpu7x:2x2x1
jax: 0.10.0
libtpu: 0.0.40
codegen_flags: <defaults>
</compile_context>

<pallas_src>
import functools

import jax
import jax.numpy as jnp
from jax.experimental import pallas as pl
from jax.experimental.pallas import tpu as pltpu

EPS = 1e-5      # nn.BatchNorm2d default eps
SLOPE = 0.2     # nn.LeakyReLU(0.2)


def _leaky_relu(y):
    return jnp.where(y >= 0.0, y, SLOPE * y)


def _bn_lrelu(y, gamma, beta):
    # Training-mode BatchNorm2d: per-channel stats over all N*OH*OW rows,
    # biased variance, single pass (E[y^2] - mean^2, clamped at 0).
    inv_m = 1.0 / y.shape[0]
    mean = jnp.sum(y, axis=0, keepdims=True) * inv_m
    ex2 = jnp.sum(y * y, axis=0, keepdims=True) * inv_m
    var = jnp.maximum(ex2 - mean * mean, 0.0)
    yh = (y - mean) * jax.lax.rsqrt(var + EPS)
    return _leaky_relu(yh * gamma + beta)
    # TODO(synk): running_mean/running_var buffer updates are a training-time side
    # effect that does not affect the forward output; not reproduced.


def _disc_kernel(p1_ref, w1_ref, w2_ref, w3_ref, w4_ref,
                 g2_ref, b2_ref, g3_ref, b3_ref,
                 o_ref, a1_ref, x2_ref, a2_ref, x3_ref, *, n):
    f32 = jnp.float32
    bf16 = jnp.bfloat16

    # ---------------- Layer 1: Conv(1->64, k4, s2, p1) + LeakyReLU -------------
    # p1 rows are pixel-PAIR patches ordered (n, wgroup g, oh) with K = 2*16;
    # w1 is block-diagonal, so each output row is 128 lanes =
    # [pixel padded-w=2g (64ch) | pixel padded-w=2g+1 (64ch)].
    y1 = jnp.dot(p1_ref[...], w1_ref[...], preferred_element_type=f32)   # (n*144, 128)
    y1 = _leaky_relu(y1)

    # a1 layout (w-major, pair-packed, f32): (n, g 0..8, h 0..17, 128 lanes).
    # Only the h halo rows need explicit zeroing; the w halo halves (g0 lower /
    # g8 upper half) are exact zeros straight out of the block-diagonal matmul.
    zrow = jnp.zeros((n, 9, 1, 128), f32)
    a1_ref[:, :, pl.ds(0, 1), :] = zrow
    a1_ref[:, :, pl.ds(17, 1), :] = zrow
    a1_ref[:, :, pl.ds(1, 16), :] = y1.reshape(n, 9, 16, 128)

    # ---------------- Layer 2: Conv(64->128, k4, s2, p1) + BN + LeakyReLU ------
    # Build the lane-dense im2col slab (n*64, 1024) bf16 from 8 full-128-lane
    # pieces (one per (kh, kw-pair)), then a single K=1024 MXU matmul.
    for kh in range(4):
        for kw0 in (0, 2):
            piece = a1_ref[:, pl.ds(kw0 // 2, 8), pl.ds(kh, 8, stride=2), :]
            piece = piece.reshape(n * 64, 128).astype(bf16)   # rows (n, ow, oh)
            x2_ref[:, pl.ds((kh * 4 + kw0) * 64, 128)] = piece
    y2 = jnp.dot(x2_ref[...], w2_ref[...], preferred_element_type=f32)   # (n*64, 128)
    y2 = _bn_lrelu(y2, g2_ref[...], b2_ref[...])

    # a2 layout (w-major, padded, f32): (n, w 0..9, h 0..9, 128).  Only the
    # w=0 / h=0 halo strips are ever read (the far pad of a k3 s2 conv is unused).
    a2_ref[:, pl.ds(0, 1), :, :] = jnp.zeros((n, 1, 10, 128), f32)
    a2_ref[:, pl.ds(1, 8), pl.ds(0, 1), :] = jnp.zeros((n, 8, 1, 128), f32)
    a2_ref[:, pl.ds(1, 8), pl.ds(1, 8), :] = y2.reshape(n, 8, 8, 128)

    # ---------------- Layer 3: Conv(128->256, k3, s2, p1) + BN + LeakyReLU -----
    # 9 taps (already 128-ch = full lanes) written into the (n*16, 1152) slab,
    # then a single K=1152 MXU matmul.
    for kh in range(3):
        for kw in range(3):
            piece = a2_ref[:, pl.ds(kw, 4, stride=2), pl.ds(kh, 4, stride=2), :]
            piece = piece.reshape(n * 16, 128).astype(bf16)   # rows (n, ow, oh)
            x3_ref[:, pl.ds((kh * 3 + kw) * 128, 128)] = piece
    y3 = jnp.dot(x3_ref[...], w3_ref[...], preferred_element_type=f32)   # (n*16, 256)
    y3 = _bn_lrelu(y3, g3_ref[...], b3_ref[...])

    # ---------------- Layer 4: Conv(256->1, k4, s1, p0) + Sigmoid --------------
    # Degenerate (M=n, Cout=1) matmul stays OFF the MXU; vectorized over batch:
    # broadcast multiply (VPU) + lane reductions (XLU) + exact sigmoid (EUP),
    # then one unmasked lane-dense (n, 128) store.
    z = y3.reshape(n, 16, 256) * w4_ref[...][None]            # (n, 16, 256)
    s = jnp.sum(z, axis=2)                                    # (n, 16)
    r = jnp.sum(s, axis=1, keepdims=True)                     # (n, 1) logits
    sig = 1.0 / (1.0 + jnp.exp(-r))                           # exact sigmoid
    o_ref[...] = jnp.broadcast_to(sig, (n, 128))


def _vspec(shape):
    return pl.BlockSpec(tuple(shape), lambda i, nd=len(shape): (0,) * nd)


def discriminator_forward(p1, w1, w2, w3, w4, g2, b2, g3, b3, *, n):
    kernel = functools.partial(_disc_kernel, n=n)
    flops = 2 * n * (144 * 32 * 128 + 64 * 1024 * 128 + 16 * 1152 * 256 + 16 * 256)
    bytes_in = sum(int(a.size) * a.dtype.itemsize
                   for a in (p1, w1, w2, w3, w4, g2, b2, g3, b3))
    cost = pl.CostEstimate(flops=int(flops),
                           transcendentals=int(n + 384),
                           bytes_accessed=int(bytes_in + n * 128 * 4))
    out = pl.pallas_call(
        kernel,
        grid=(1,),
        out_shape=jax.ShapeDtypeStruct((n, 128), jnp.float32),
        in_specs=[_vspec(p1.shape), _vspec(w1.shape), _vspec(w2.shape),
                  _vspec(w3.shape), _vspec(w4.shape),
                  _vspec(g2.shape), _vspec(b2.shape),
                  _vspec(g3.shape), _vspec(b3.shape)],
        out_specs=_vspec((n, 128)),
        scratch_shapes=[
            pltpu.VMEM((n, 9, 18, 128), jnp.float32),    # pair-packed padded L1 act
            pltpu.VMEM((n * 64, 1024), jnp.bfloat16),    # L2 im2col slab
            pltpu.VMEM((n, 10, 10, 128), jnp.float32),   # padded L2 act
            pltpu.VMEM((n * 16, 1152), jnp.bfloat16),    # L3 im2col slab
        ],
        compiler_params=pltpu.CompilerParams(
            dimension_semantics=("arbitrary",),
            vmem_limit_bytes=32 * 1024 * 1024),
        cost_estimate=cost,
    )(p1, w1, w2, w3, w4, g2, b2, g3, b3)
    return out[:, 0]


# ---------------------------------------------------------------------------
# Glue: layer-1 pixel-pair im2col (input prep) and parameter layout (pure JAX).
# ---------------------------------------------------------------------------
def _build_l1_pair_patches(x_nhwc):
    """im2col for layer 1 in pixel-pair form: rows (n, wgroup, oh), K = 2*16."""
    n = x_nhwc.shape[0]
    xp = jnp.pad(x_nhwc, ((0, 0), (1, 1), (1, 1), (0, 0)))          # (n, 34, 34, 1)
    taps = []
    for kh in range(4):
        for kw in range(4):
            taps.append(xp[:, kh:kh + 32:2, kw:kw + 32:2, 0])       # (n, 16, 16)
    p = jnp.stack(taps, axis=-1)                                    # (n, oh, ow, 16)
    p = jnp.pad(p, ((0, 0), (0, 0), (1, 1), (0, 0)))                # padded w = ow+1
    p = jnp.transpose(p, (0, 2, 1, 3))                              # (n, w', oh, 16)
    p = p.reshape(n, 9, 2, 16, 16)                                  # (n, g, dw, oh, 16)
    p = jnp.transpose(p, (0, 1, 3, 2, 4))                           # (n, g, oh, dw, 16)
    return p.reshape(n * 144, 32)


class Discriminator:
    def __init__(self, key):
        k1, k2, k3, k4 = jax.random.split(key, 4)
        # Deterministic synthetic weights (DCGAN-style N(0, 0.02)), PyTorch layout.
        w1 = 0.02 * jax.random.normal(k1, (64, 1, 4, 4), jnp.float32)
        w2 = 0.02 * jax.random.normal(k2, (128, 64, 4, 4), jnp.float32)
        w3 = 0.02 * jax.random.normal(k3, (256, 128, 3, 3), jnp.float32)
        w4 = 0.02 * jax.random.normal(k4, (1, 256, 4, 4), jnp.float32)

        # Layer 1: block-diagonal pixel-pair weight, K = [pix0 patch | pix1 patch].
        w1f = jnp.transpose(w1, (2, 3, 1, 0)).reshape(16, 64)       # rows (kh, kw)
        w1_blk = jnp.zeros((32, 128), jnp.float32)
        w1_blk = w1_blk.at[0:16, 0:64].set(w1f).at[16:32, 64:128].set(w1f)
        self.w1 = w1_blk.astype(jnp.bfloat16)
        # Layers 2/3: flattened im2col weights, rows ordered (kh, kw, cin); bf16.
        self.w2 = jnp.transpose(w2, (2, 3, 1, 0)).reshape(1024, 128).astype(jnp.bfloat16)
        self.w3 = jnp.transpose(w3, (2, 3, 1, 0)).reshape(1152, 256).astype(jnp.bfloat16)
        # Layer 4 (VPU path): rows ordered (kw, kh) to match y3's (ow, oh) raster.
        self.w4 = jnp.transpose(w4, (3, 2, 1, 0)).reshape(16, 256)  # f32
        # BatchNorm affine params, PyTorch default init (gamma=1, beta=0).
        self.g2 = jnp.ones((1, 128), jnp.float32)
        self.b2 = jnp.zeros((1, 128), jnp.float32)
        self.g3 = jnp.ones((1, 256), jnp.float32)
        self.b3 = jnp.zeros((1, 256), jnp.float32)

    def __call__(self, x_nchw):
        n, c, h, w = x_nchw.shape
        assert (c, h, w) == (1, 32, 32), "expects 1x32x32 inputs (net ends at 1x1)"
        x = jnp.transpose(x_nchw, (0, 2, 3, 1)).astype(jnp.float32)     # NCHW -> NHWC
        p1 = _build_l1_pair_patches(x).astype(jnp.bfloat16)             # (n*144, 32)
        return discriminator_forward(p1, self.w1, self.w2, self.w3, self.w4,
                                     self.g2, self.b2, self.g3, self.b3, n=n)


if __name__ == "__main__":
    key = jax.random.PRNGKey(0)
    kx, kp = jax.random.split(key)
    # 32x32 single-channel images -> spatial path 32 -> 16 -> 8 -> 4 -> 1.
    x = jax.random.normal(kx, (2, 1, 32, 32), dtype=jnp.float32)
    disc = Discriminator(kp)
    out = jax.jit(disc.__call__)(x)
    jax.block_until_ready(out)
    assert out.shape == (2,), out.shape
    print("KERNEL_OK")
</pallas_src>

<mosaic_0001>
module attributes {stable_mosaic.version = 11 : i64} {
  func.func @_disc_kernel(%arg0: i32, %arg1: memref<288x32xbf16, #tpu.memory_space<vmem>>, %arg2: memref<32x128xbf16, #tpu.memory_space<vmem>>, %arg3: memref<1024x128xbf16, #tpu.memory_space<vmem>>, %arg4: memref<1152x256xbf16, #tpu.memory_space<vmem>>, %arg5: memref<16x256xf32, #tpu.memory_space<vmem>>, %arg6: memref<1x128xf32, #tpu.memory_space<vmem>>, %arg7: memref<1x128xf32, #tpu.memory_space<vmem>>, %arg8: memref<1x256xf32, #tpu.memory_space<vmem>>, %arg9: memref<1x256xf32, #tpu.memory_space<vmem>>, %arg10: memref<2x128xf32, #tpu.memory_space<vmem>>, %arg11: memref<2x9x18x128xf32, #tpu.memory_space<vmem>>, %arg12: memref<128x1024xbf16, #tpu.memory_space<vmem>>, %arg13: memref<2x10x10x128xf32, #tpu.memory_space<vmem>>, %arg14: memref<32x1152xbf16, #tpu.memory_space<vmem>>) attributes {dimension_semantics = [#tpu.dimension_semantics<arbitrary>], iteration_bounds = array<i64: 1>, scalar_prefetch = 0 : i64, scratch_operands = 4 : i64, tpu.core_type = #tpu.core_type<tc>, window_params = [{pipeline_mode = #tpu.pipeline_mode<synchronous>, transform_indices = @transform_0, window_bounds = array<i64: 288, 32>}, {pipeline_mode = #tpu.pipeline_mode<synchronous>, transform_indices = @transform_1, window_bounds = array<i64: 32, 128>}, {pipeline_mode = #tpu.pipeline_mode<synchronous>, transform_indices = @transform_2, window_bounds = array<i64: 1024, 128>}, {pipeline_mode = #tpu.pipeline_mode<synchronous>, transform_indices = @transform_3, window_bounds = array<i64: 1152, 256>}, {pipeline_mode = #tpu.pipeline_mode<synchronous>, transform_indices = @transform_4, window_bounds = array<i64: 16, 256>}, {pipeline_mode = #tpu.pipeline_mode<synchronous>, transform_indices = @transform_5, window_bounds = array<i64: 1, 128>}, {pipeline_mode = #tpu.pipeline_mode<synchronous>, transform_indices = @transform_6, window_bounds = array<i64: 1, 128>}, {pipeline_mode = #tpu.pipeline_mode<synchronous>, transform_indices = @transform_7, window_bounds = array<i64: 1, 256>}, {pipeline_mode = #tpu.pipeline_mode<synchronous>, transform_indices = @transform_8, window_bounds = array<i64: 1, 256>}, {pipeline_mode = #tpu.pipeline_mode<synchronous>, transform_indices = @transform_9, window_bounds = array<i64: 2, 128>}]} {
    %c0 = arith.constant 0 : index
    %c0_0 = arith.constant 0 : index
    %0 = vector.load %arg1[%c0, %c0_0] : memref<288x32xbf16, #tpu.memory_space<vmem>>, vector<288x32xbf16>
    %c0_1 = arith.constant 0 : index
    %c0_2 = arith.constant 0 : index
    %1 = vector.load %arg2[%c0_1, %c0_2] : memref<32x128xbf16, #tpu.memory_space<vmem>>, vector<32x128xbf16>
    %cst = arith.constant dense<0.000000e+00> : vector<288x128xf32>
    %2 = tpu.matmul %0, %1, %cst {dimension_numbers = #tpu.dot_dimension_numbers<[1], [0], [0], [1], [0, 0, 1, 1], [], []>} : vector<288x32xbf16>, vector<32x128xbf16>, vector<288x128xf32> -> vector<288x128xf32>
    %cst_3 = arith.constant 0.000000e+00 : f32
    %3 = vector.broadcast %cst_3 : f32 to vector<288x128xf32>
    %4 = arith.cmpf oge, %2, %3 : vector<288x128xf32>
    %cst_4 = arith.constant 2.000000e-01 : f32
    %5 = vector.broadcast %cst_4 : f32 to vector<288x128xf32>
    %6 = arith.mulf %5, %2 : vector<288x128xf32>
    %7 = arith.select %4, %2, %6 : vector<288x128xi1>, vector<288x128xf32>
    %cst_5 = arith.constant 0.000000e+00 : f32
    %8 = vector.broadcast %cst_5 : f32 to vector<2x9x1x128xf32>
    %c0_6 = arith.constant 0 : index
    %c0_7 = arith.constant 0 : index
    %c0_8 = arith.constant 0 : index
    %c0_9 = arith.constant 0 : index
    %9 = vector.load %arg11[%c0_6, %c0_7, %c0_8, %c0_9] : memref<2x9x18x128xf32, #tpu.memory_space<vmem>>, vector<2x9x1x128xf32>
    tpu.vector_store %arg11[%c0_6, %c0_7, %c0_8, %c0_9], %8 {strides = array<i32>} : memref<2x9x18x128xf32, #tpu.memory_space<vmem>>, vector<2x9x1x128xf32>,
    %c0_10 = arith.constant 0 : index
    %c0_11 = arith.constant 0 : index
    %c17 = arith.constant 17 : index
    %c0_12 = arith.constant 0 : index
    %10 = vector.load %arg11[%c0_10, %c0_11, %c17, %c0_12] : memref<2x9x18x128xf32, #tpu.memory_space<vmem>>, vector<2x9x1x128xf32>
    tpu.vector_store %arg11[%c0_10, %c0_11, %c17, %c0_12], %8 {strides = array<i32>} : memref<2x9x18x128xf32, #tpu.memory_space<vmem>>, vector<2x9x1x128xf32>,
    %11 = vector.shape_cast %7 : vector<288x128xf32> to vector<2x9x16x128xf32>
    %c0_13 = arith.constant 0 : index
    %c0_14 = arith.constant 0 : index
    %c1 = arith.constant 1 : index
    %c0_15 = arith.constant 0 : index
    %12 = vector.load %arg11[%c0_13, %c0_14, %c1, %c0_15] : memref<2x9x18x128xf32, #tpu.memory_space<vmem>>, vector<2x9x16x128xf32>
    tpu.vector_store %arg11[%c0_13, %c0_14, %c1, %c0_15], %11 {strides = array<i32>} : memref<2x9x18x128xf32, #tpu.memory_space<vmem>>, vector<2x9x16x128xf32>,
    %c0_16 = arith.constant 0 : index
    %c0_17 = arith.constant 0 : index
    %c0_18 = arith.constant 0 : index
    %c0_19 = arith.constant 0 : index
    %13 = tpu.strided_load %arg11[%c0_16, %c0_17, %c0_18, %c0_19] {strides = array<i32: 1, 1, 2, 1>} : memref<2x9x18x128xf32, #tpu.memory_space<vmem>>, vector<2x8x8x128xf32>
    %14 = vector.shape_cast %13 : vector<2x8x8x128xf32> to vector<128x128xf32>
    %15 = arith.truncf %14 : vector<128x128xf32> to vector<128x128xbf16>
    %c0_20 = arith.constant 0 : index
    %c0_21 = arith.constant 0 : index
    %16 = vector.load %arg12[%c0_20, %c0_21] : memref<128x1024xbf16, #tpu.memory_space<vmem>>, vector<128x128xbf16>
    tpu.vector_store %arg12[%c0_20, %c0_21], %15 {strides = array<i32>} : memref<128x1024xbf16, #tpu.memory_space<vmem>>, vector<128x128xbf16>,
    %c0_22 = arith.constant 0 : index
    %c1_23 = arith.constant 1 : index
    %c0_24 = arith.constant 0 : index
    %c0_25 = arith.constant 0 : index
    %17 = tpu.strided_load %arg11[%c0_22, %c1_23, %c0_24, %c0_25] {strides = array<i32: 1, 1, 2, 1>} : memref<2x9x18x128xf32, #tpu.memory_space<vmem>>, vector<2x8x8x128xf32>
    %18 = vector.shape_cast %17 : vector<2x8x8x128xf32> to vector<128x128xf32>
    %19 = arith.truncf %18 : vector<128x128xf32> to vector<128x128xbf16>
    %c0_26 = arith.constant 0 : index
    %c128 = arith.constant 128 : index
    %20 = vector.load %arg12[%c0_26, %c128] : memref<128x1024xbf16, #tpu.memory_space<vmem>>, vector<128x128xbf16>
    tpu.vector_store %arg12[%c0_26, %c128], %19 {strides = array<i32>} : memref<128x1024xbf16, #tpu.memory_space<vmem>>, vector<128x128xbf16>,
    %c0_27 = arith.constant 0 : index
    %c0_28 = arith.constant 0 : index
    %c1_29 = arith.constant 1 : index
    %c0_30 = arith.constant 0 : index
    %21 = tpu.strided_load %arg11[%c0_27, %c0_28, %c1_29, %c0_30] {strides = array<i32: 1, 1, 2, 1>} : memref<2x9x18x128xf32, #tpu.memory_space<vmem>>, vector<2x8x8x128xf32>
    %22 = vector.shape_cast %21 : vector<2x8x8x128xf32> to vector<128x128xf32>
    %23 = arith.truncf %22 : vector<128x128xf32> to vector<128x128xbf16>
    %c0_31 = arith.constant 0 : index
    %c256 = arith.constant 256 : index
    %24 = vector.load %arg12[%c0_31, %c256] : memref<128x1024xbf16, #tpu.memory_space<vmem>>, vector<128x128xbf16>
    tpu.vector_store %arg12[%c0_31, %c256], %23 {strides = array<i32>} : memref<128x1024xbf16, #tpu.memory_space<vmem>>, vector<128x128xbf16>,
    %c0_32 = arith.constant 0 : index
    %c1_33 = arith.constant 1 : index
    %c1_34 = arith.constant 1 : index
    %c0_35 = arith.constant 0 : index
    %25 = tpu.strided_load %arg11[%c0_32, %c1_33, %c1_34, %c0_35] {strides = array<i32: 1, 1, 2, 1>} : memref<2x9x18x128xf32, #tpu.memory_space<vmem>>, vector<2x8x8x128xf32>
    %26 = vector.shape_cast %25 : vector<2x8x8x128xf32> to vector<128x128xf32>
    %27 = arith.truncf %26 : vector<128x128xf32> to vector<128x128xbf16>
    %c0_36 = arith.constant 0 : index
    %c384 = arith.constant 384 : index
    %28 = vector.load %arg12[%c0_36, %c384] : memref<128x1024xbf16, #tpu.memory_space<vmem>>, vector<128x128xbf16>
    tpu.vector_store %arg12[%c0_36, %c384], %27 {strides = array<i32>} : memref<128x1024xbf16, #tpu.memory_space<vmem>>, vector<128x128xbf16>,
    %c0_37 = arith.constant 0 : index
    %c0_38 = arith.constant 0 : index
    %c2 = arith.constant 2 : index
    %c0_39 = arith.constant 0 : index
    %29 = tpu.strided_load %arg11[%c0_37, %c0_38, %c2, %c0_39] {strides = array<i32: 1, 1, 2, 1>} : memref<2x9x18x128xf32, #tpu.memory_space<vmem>>, vector<2x8x8x128xf32>
    %30 = vector.shape_cast %29 : vector<2x8x8x128xf32> to vector<128x128xf32>
    %31 = arith.truncf %30 : vector<128x128xf32> to vector<128x128xbf16>
    %c0_40 = arith.constant 0 : index
    %c512 = arith.constant 512 : index
    %32 = vector.load %arg12[%c0_40, %c512] : memref<128x1024xbf16, #tpu.memory_space<vmem>>, vector<128x128xbf16>
    tpu.vector_store %arg12[%c0_40, %c512], %31 {strides = array<i32>} : memref<128x1024xbf16, #tpu.memory_space<vmem>>, vector<128x128xbf16>,
    %c0_41 = arith.constant 0 : index
    %c1_42 = arith.constant 1 : index
    %c2_43 = arith.constant 2 : index
    %c0_44 = arith.constant 0 : index
    %33 = tpu.strided_load %arg11[%c0_41, %c1_42, %c2_43, %c0_44] {strides = array<i32: 1, 1, 2, 1>} : memref<2x9x18x128xf32, #tpu.memory_space<vmem>>, vector<2x8x8x128xf32>
    %34 = vector.shape_cast %33 : vector<2x8x8x128xf32> to vector<128x128xf32>
    %35 = arith.truncf %34 : vector<128x128xf32> to vector<128x128xbf16>
    %c0_45 = arith.constant 0 : index
    %c640 = arith.constant 640 : index
    %36 = vector.load %arg12[%c0_45, %c640] : memref<128x1024xbf16, #tpu.memory_space<vmem>>, vector<128x128xbf16>
    tpu.vector_store %arg12[%c0_45, %c640], %35 {strides = array<i32>} : memref<128x1024xbf16, #tpu.memory_space<vmem>>, vector<128x128xbf16>,
    %c0_46 = arith.constant 0 : index
    %c0_47 = arith.constant 0 : index
    %c3 = arith.constant 3 : index
    %c0_48 = arith.constant 0 : index
    %37 = tpu.strided_load %arg11[%c0_46, %c0_47, %c3, %c0_48] {strides = array<i32: 1, 1, 2, 1>} : memref<2x9x18x128xf32, #tpu.memory_space<vmem>>, vector<2x8x8x128xf32>
    %38 = vector.shape_cast %37 : vector<2x8x8x128xf32> to vector<128x128xf32>
    %39 = arith.truncf %38 : vector<128x128xf32> to vector<128x128xbf16>
    %c0_49 = arith.constant 0 : index
    %c768 = arith.constant 768 : index
    %40 = vector.load %arg12[%c0_49, %c768] : memref<128x1024xbf16, #tpu.memory_space<vmem>>, vector<128x128xbf16>
    tpu.vector_store %arg12[%c0_49, %c768], %39 {strides = array<i32>} : memref<128x1024xbf16, #tpu.memory_space<vmem>>, vector<128x128xbf16>,
    %c0_50 = arith.constant 0 : index
    %c1_51 = arith.constant 1 : index
    %c3_52 = arith.constant 3 : index
    %c0_53 = arith.constant 0 : index
    %41 = tpu.strided_load %arg11[%c0_50, %c1_51, %c3_52, %c0_53] {strides = array<i32: 1, 1, 2, 1>} : memref<2x9x18x128xf32, #tpu.memory_space<vmem>>, vector<2x8x8x128xf32>
    %42 = vector.shape_cast %41 : vector<2x8x8x128xf32> to vector<128x128xf32>
    %43 = arith.truncf %42 : vector<128x128xf32> to vector<128x128xbf16>
    %c0_54 = arith.constant 0 : index
    %c896 = arith.constant 896 : index
    %44 = vector.load %arg12[%c0_54, %c896] : memref<128x1024xbf16, #tpu.memory_space<vmem>>, vector<128x128xbf16>
    tpu.vector_store %arg12[%c0_54, %c896], %43 {strides = array<i32>} : memref<128x1024xbf16, #tpu.memory_space<vmem>>, vector<128x128xbf16>,
    %c0_55 = arith.constant 0 : index
    %c0_56 = arith.constant 0 : index
    %45 = vector.load %arg12[%c0_55, %c0_56] : memref<128x1024xbf16, #tpu.memory_space<vmem>>, vector<128x1024xbf16>
    %c0_57 = arith.constant 0 : index
    %c0_58 = arith.constant 0 : index
    %46 = vector.load %arg3[%c0_57, %c0_58] : memref<1024x128xbf16, #tpu.memory_space<vmem>>, vector<1024x128xbf16>
    %cst_59 = arith.constant dense<0.000000e+00> : vector<128x128xf32>
    %47 = tpu.matmul %45, %46, %cst_59 {dimension_numbers = #tpu.dot_dimension_numbers<[1], [0], [0], [1], [0, 0, 1, 1], [], []>} : vector<128x1024xbf16>, vector<1024x128xbf16>, vector<128x128xf32> -> vector<128x128xf32>
    %c0_60 = arith.constant 0 : index
    %c0_61 = arith.constant 0 : index
    %48 = vector.load %arg6[%c0_60, %c0_61] : memref<1x128xf32, #tpu.memory_space<vmem>>, vector<1x128xf32>
    %c0_62 = arith.constant 0 : index
    %c0_63 = arith.constant 0 : index
    %49 = vector.load %arg7[%c0_62, %c0_63] : memref<1x128xf32, #tpu.memory_space<vmem>>, vector<1x128xf32>
    %cst_64 = arith.constant dense<0.000000e+00> : vector<128xf32>
    %50 = vector.multi_reduction <add>, %47, %cst_64 [0] : vector<128x128xf32> to vector<128xf32>
    %51 = vector.shape_cast %50 : vector<128xf32> to vector<1x128xf32>
    %cst_65 = arith.constant 7.812500e-03 : f32
    %52 = vector.broadcast %cst_65 : f32 to vector<1x128xf32>
    %53 = arith.mulf %51, %52 : vector<1x128xf32>
    %54 = arith.mulf %47, %47 : vector<128x128xf32>
    %cst_66 = arith.constant dense<0.000000e+00> : vector<128xf32>
    %55 = vector.multi_reduction <add>, %54, %cst_66 [0] : vector<128x128xf32> to vector<128xf32>
    %56 = vector.shape_cast %55 : vector<128xf32> to vector<1x128xf32>
    %cst_67 = arith.constant 7.812500e-03 : f32
    %57 = vector.broadcast %cst_67 : f32 to vector<1x128xf32>
    %58 = arith.mulf %56, %57 : vector<1x128xf32>
    %59 = arith.mulf %53, %53 : vector<1x128xf32>
    %60 = arith.subf %58, %59 : vector<1x128xf32>
    %cst_68 = arith.constant 0.000000e+00 : f32
    %61 = vector.broadcast %cst_68 : f32 to vector<1x128xf32>
    %62 = arith.maximumf %60, %61 : vector<1x128xf32>
    %63 = vector.broadcast %53 : vector<1x128xf32> to vector<128x128xf32>
    %64 = arith.subf %47, %63 : vector<128x128xf32>
    %cst_69 = arith.constant 9.99999974E-6 : f32
    %65 = vector.broadcast %cst_69 : f32 to vector<1x128xf32>
    %66 = arith.addf %62, %65 : vector<1x128xf32>
    %67 = math.rsqrt %66 : vector<1x128xf32>
    %68 = vector.broadcast %67 : vector<1x128xf32> to vector<128x128xf32>
    %69 = arith.mulf %64, %68 : vector<128x128xf32>
    %70 = vector.broadcast %48 : vector<1x128xf32> to vector<128x128xf32>
    %71 = arith.mulf %69, %70 : vector<128x128xf32>
    %72 = vector.broadcast %49 : vector<1x128xf32> to vector<128x128xf32>
    %73 = arith.addf %71, %72 : vector<128x128xf32>
    %cst_70 = arith.constant 0.000000e+00 : f32
    %74 = vector.broadcast %cst_70 : f32 to vector<128x128xf32>
    %75 = arith.cmpf oge, %73, %74 : vector<128x128xf32>
    %cst_71 = arith.constant 2.000000e-01 : f32
    %76 = vector.broadcast %cst_71 : f32 to vector<128x128xf32>
    %77 = arith.mulf %76, %73 : vector<128x128xf32>
    %78 = arith.select %75, %73, %77 : vector<128x128xi1>, vector<128x128xf32>
    %cst_72 = arith.constant 0.000000e+00 : f32
    %79 = vector.broadcast %cst_72 : f32 to vector<2x1x10x128xf32>
    %c0_73 = arith.constant 0 : index
    %c0_74 = arith.constant 0 : index
    %c0_75 = arith.constant 0 : index
    %c0_76 = arith.constant 0 : index
    %80 = vector.load %arg13[%c0_73, %c0_74, %c0_75, %c0_76] : memref<2x10x10x128xf32, #tpu.memory_space<vmem>>, vector<2x1x10x128xf32>
    tpu.vector_store %arg13[%c0_73, %c0_74, %c0_75, %c0_76], %79 {strides = array<i32>} : memref<2x10x10x128xf32, #tpu.memory_space<vmem>>, vector<2x1x10x128xf32>,
    %cst_77 = arith.constant 0.000000e+00 : f32
    %81 = vector.broadcast %cst_77 : f32 to vector<2x8x1x128xf32>
    %c0_78 = arith.constant 0 : index
    %c1_79 = arith.constant 1 : index
    %c0_80 = arith.constant 0 : index
    %c0_81 = arith.constant 0 : index
    %82 = vector.load %arg13[%c0_78, %c1_79, %c0_80, %c0_81] : memref<2x10x10x128xf32, #tpu.memory_space<vmem>>, vector<2x8x1x128xf32>
    tpu.vector_store %arg13[%c0_78, %c1_79, %c0_80, %c0_81], %81 {strides = array<i32>} : memref<2x10x10x128xf32, #tpu.memory_space<vmem>>, vector<2x8x1x128xf32>,
    %83 = vector.shape_cast %78 : vector<128x128xf32> to vector<2x8x8x128xf32>
    %c0_82 = arith.constant 0 : index
    %c1_83 = arith.constant 1 : index
    %c1_84 = arith.constant 1 : index
    %c0_85 = arith.constant 0 : index
    %84 = vector.load %arg13[%c0_82, %c1_83, %c1_84, %c0_85] : memref<2x10x10x128xf32, #tpu.memory_space<vmem>>, vector<2x8x8x128xf32>
    tpu.vector_store %arg13[%c0_82, %c1_83, %c1_84, %c0_85], %83 {strides = array<i32>} : memref<2x10x10x128xf32, #tpu.memory_space<vmem>>, vector<2x8x8x128xf32>,
    %c0_86 = arith.constant 0 : index
    %c0_87 = arith.constant 0 : index
    %c0_88 = arith.constant 0 : index
    %c0_89 = arith.constant 0 : index
    %85 = tpu.strided_load %arg13[%c0_86, %c0_87, %c0_88, %c0_89] {strides = array<i32: 1, 2, 2, 1>} : memref<2x10x10x128xf32, #tpu.memory_space<vmem>>, vector<2x4x4x128xf32>
    %86 = vector.shape_cast %85 : vector<2x4x4x128xf32> to vector<32x128xf32>
    %87 = arith.truncf %86 : vector<32x128xf32> to vector<32x128xbf16>
    %c0_90 = arith.constant 0 : index
    %c0_91 = arith.constant 0 : index
    %88 = vector.load %arg14[%c0_90, %c0_91] : memref<32x1152xbf16, #tpu.memory_space<vmem>>, vector<32x128xbf16>
    tpu.vector_store %arg14[%c0_90, %c0_91], %87 {strides = array<i32>} : memref<32x1152xbf16, #tpu.memory_space<vmem>>, vector<32x128xbf16>,
    %c0_92 = arith.constant 0 : index
    %c1_93 = arith.constant 1 : index
    %c0_94 = arith.constant 0 : index
    %c0_95 = arith.constant 0 : index
    %89 = tpu.strided_load %arg13[%c0_92, %c1_93, %c0_94, %c0_95] {strides = array<i32: 1, 2, 2, 1>} : memref<2x10x10x128xf32, #tpu.memory_space<vmem>>, vector<2x4x4x128xf32>
    %90 = vector.shape_cast %89 : vector<2x4x4x128xf32> to vector<32x128xf32>
    %91 = arith.truncf %90 : vector<32x128xf32> to vector<32x128xbf16>
    %c0_96 = arith.constant 0 : index
    %c128_97 = arith.constant 128 : index
    %92 = vector.load %arg14[%c0_96, %c128_97] : memref<32x1152xbf16, #tpu.memory_space<vmem>>, vector<32x128xbf16>
    tpu.vector_store %arg14[%c0_96, %c128_97], %91 {strides = array<i32>} : memref<32x1152xbf16, #tpu.memory_space<vmem>>, vector<32x128xbf16>,
    %c0_98 = arith.constant 0 : index
    %c2_99 = arith.constant 2 : index
    %c0_100 = arith.constant 0 : index
    %c0_101 = arith.constant 0 : index
    %93 = tpu.strided_load %arg13[%c0_98, %c2_99, %c0_100, %c0_101] {strides = array<i32: 1, 2, 2, 1>} : memref<2x10x10x128xf32, #tpu.memory_space<vmem>>, vector<2x4x4x128xf32>
    %94 = vector.shape_cast %93 : vector<2x4x4x128xf32> to vector<32x128xf32>
    %95 = arith.truncf %94 : vector<32x128xf32> to vector<32x128xbf16>
    %c0_102 = arith.constant 0 : index
    %c256_103 = arith.constant 256 : index
    %96 = vector.load %arg14[%c0_102, %c256_103] : memref<32x1152xbf16, #tpu.memory_space<vmem>>, vector<32x128xbf16>
    tpu.vector_store %arg14[%c0_102, %c256_103], %95 {strides = array<i32>} : memref<32x1152xbf16, #tpu.memory_space<vmem>>, vector<32x128xbf16>,
    %c0_104 = arith.constant 0 : index
    %c0_105 = arith.constant 0 : index
    %c1_106 = arith.constant 1 : index
    %c0_107 = arith.constant 0 : index
    %97 = tpu.strided_load %arg13[%c0_104, %c0_105, %c1_106, %c0_107] {strides = array<i32: 1, 2, 2, 1>} : memref<2x10x10x128xf32, #tpu.memory_space<vmem>>, vector<2x4x4x128xf32>
    %98 = vector.shape_cast %97 : vector<2x4x4x128xf32> to vector<32x128xf32>
    %99 = arith.truncf %98 : vector<32x128xf32> to vector<32x128xbf16>
    %c0_108 = arith.constant 0 : index
    %c384_109 = arith.constant 384 : index
    %100 = vector.load %arg14[%c0_108, %c384_109] : memref<32x1152xbf16, #tpu.memory_space<vmem>>, vector<32x128xbf16>
    tpu.vector_store %arg14[%c0_108, %c384_109], %99 {strides = array<i32>} : memref<32x1152xbf16, #tpu.memory_space<vmem>>, vector<32x128xbf16>,
    %c0_110 = arith.constant 0 : index
    %c1_111 = arith.constant 1 : index
    %c1_112 = arith.constant 1 : index
    %c0_113 = arith.constant 0 : index
    %101 = tpu.strided_load %arg13[%c0_110, %c1_111, %c1_112, %c0_113] {strides = array<i32: 1, 2, 2, 1>} : memref<2x10x10x128xf32, #tpu.memory_space<vmem>>, vector<2x4x4x128xf32>
    %102 = vector.shape_cast %101 : vector<2x4x4x128xf32> to vector<32x128xf32>
    %103 = arith.truncf %102 : vector<32x128xf32> to vector<32x128xbf16>
    %c0_114 = arith.constant 0 : index
    %c512_115 = arith.constant 512 : index
    %104 = vector.load %arg14[%c0_114, %c512_115] : memref<32x1152xbf16, #tpu.memory_space<vmem>>, vector<32x128xbf16>
    tpu.vector_store %arg14[%c0_114, %c512_115], %103 {strides = array<i32>} : memref<32x1152xbf16, #tpu.memory_space<vmem>>, vector<32x128xbf16>,
    %c0_116 = arith.constant 0 : index
    %c2_117 = arith.constant 2 : index
    %c1_118 = arith.constant 1 : index
    %c0_119 = arith.constant 0 : index
    %105 = tpu.strided_load %arg13[%c0_116, %c2_117, %c1_118, %c0_119] {strides = array<i32: 1, 2, 2, 1>} : memref<2x10x10x128xf32, #tpu.memory_space<vmem>>, vector<2x4x4x128xf32>
    %106 = vector.shape_cast %105 : vector<2x4x4x128xf32> to vector<32x128xf32>
    %107 = arith.truncf %106 : vector<32x128xf32> to vector<32x128xbf16>
    %c0_120 = arith.constant 0 : index
    %c640_121 = arith.constant 640 : index
    %108 = vector.load %arg14[%c0_120, %c640_121] : memref<32x1152xbf16, #tpu.memory_space<vmem>>, vector<32x128xbf16>
    tpu.vector_store %arg14[%c0_120, %c640_121], %107 {strides = array<i32>} : memref<32x1152xbf16, #tpu.memory_space<vmem>>, vector<32x128xbf16>,
    %c0_122 = arith.constant 0 : index
    %c0_123 = arith.constant 0 : index
    %c2_124 = arith.constant 2 : index
    %c0_125 = arith.constant 0 : index
    %109 = tpu.strided_load %arg13[%c0_122, %c0_123, %c2_124, %c0_125] {strides = array<i32: 1, 2, 2, 1>} : memref<2x10x10x128xf32, #tpu.memory_space<vmem>>, vector<2x4x4x128xf32>
    %110 = vector.shape_cast %109 : vector<2x4x4x128xf32> to vector<32x128xf32>
    %111 = arith.truncf %110 : vector<32x128xf32> to vector<32x128xbf16>
    %c0_126 = arith.constant 0 : index
    %c768_127 = arith.constant 768 : index
    %112 = vector.load %arg14[%c0_126, %c768_127] : memref<32x1152xbf16, #tpu.memory_space<vmem>>, vector<32x128xbf16>
    tpu.vector_store %arg14[%c0_126, %c768_127], %111 {strides = array<i32>} : memref<32x1152xbf16, #tpu.memory_space<vmem>>, vector<32x128xbf16>,
    %c0_128 = arith.constant 0 : index
    %c1_129 = arith.constant 1 : index
    %c2_130 = arith.constant 2 : index
    %c0_131 = arith.constant 0 : index
    %113 = tpu.strided_load %arg13[%c0_128, %c1_129, %c2_130, %c0_131] {strides = array<i32: 1, 2, 2, 1>} : memref<2x10x10x128xf32, #tpu.memory_space<vmem>>, vector<2x4x4x128xf32>
    %114 = vector.shape_cast %113 : vector<2x4x4x128xf32> to vector<32x128xf32>
    %115 = arith.truncf %114 : vector<32x128xf32> to vector<32x128xbf16>
    %c0_132 = arith.constant 0 : index
    %c896_133 = arith.constant 896 : index
    %116 = vector.load %arg14[%c0_132, %c896_133] : memref<32x1152xbf16, #tpu.memory_space<vmem>>, vector<32x128xbf16>
    tpu.vector_store %arg14[%c0_132, %c896_133], %115 {strides = array<i32>} : memref<32x1152xbf16, #tpu.memory_space<vmem>>, vector<32x128xbf16>,
    %c0_134 = arith.constant 0 : index
    %c2_135 = arith.constant 2 : index
    %c2_136 = arith.constant 2 : index
    %c0_137 = arith.constant 0 : index
    %117 = tpu.strided_load %arg13[%c0_134, %c2_135, %c2_136, %c0_137] {strides = array<i32: 1, 2, 2, 1>} : memref<2x10x10x128xf32, #tpu.memory_space<vmem>>, vector<2x4x4x128xf32>
    %118 = vector.shape_cast %117 : vector<2x4x4x128xf32> to vector<32x128xf32>
    %119 = arith.truncf %118 : vector<32x128xf32> to vector<32x128xbf16>
    %c0_138 = arith.constant 0 : index
    %c1024 = arith.constant 1024 : index
    %120 = vector.load %arg14[%c0_138, %c1024] : memref<32x1152xbf16, #tpu.memory_space<vmem>>, vector<32x128xbf16>
    tpu.vector_store %arg14[%c0_138, %c1024], %119 {strides = array<i32>} : memref<32x1152xbf16, #tpu.memory_space<vmem>>, vector<32x128xbf16>,
    %c0_139 = arith.constant 0 : index
    %c0_140 = arith.constant 0 : index
    %121 = vector.load %arg14[%c0_139, %c0_140] : memref<32x1152xbf16, #tpu.memory_space<vmem>>, vector<32x1152xbf16>
    %c0_141 = arith.constant 0 : index
    %c0_142 = arith.constant 0 : index
    %122 = vector.load %arg4[%c0_141, %c0_142] : memref<1152x256xbf16, #tpu.memory_space<vmem>>, vector<1152x256xbf16>
    %cst_143 = arith.constant dense<0.000000e+00> : vector<32x256xf32>
    %123 = tpu.matmul %121, %122, %cst_143 {dimension_numbers = #tpu.dot_dimension_numbers<[1], [0], [0], [1], [0, 0, 1, 1], [], []>} : vector<32x1152xbf16>, vector<1152x256xbf16>, vector<32x256xf32> -> vector<32x256xf32>
    %c0_144 = arith.constant 0 : index
    %c0_145 = arith.constant 0 : index
    %124 = vector.load %arg8[%c0_144, %c0_145] : memref<1x256xf32, #tpu.memory_space<vmem>>, vector<1x256xf32>
    %c0_146 = arith.constant 0 : index
    %c0_147 = arith.constant 0 : index
    %125 = vector.load %arg9[%c0_146, %c0_147] : memref<1x256xf32, #tpu.memory_space<vmem>>, vector<1x256xf32>
    %cst_148 = arith.constant dense<0.000000e+00> : vector<256xf32>
    %126 = vector.multi_reduction <add>, %123, %cst_148 [0] : vector<32x256xf32> to vector<256xf32>
    %127 = vector.shape_cast %126 : vector<256xf32> to vector<1x256xf32>
    %cst_149 = arith.constant 3.125000e-02 : f32
    %128 = vector.broadcast %cst_149 : f32 to vector<1x256xf32>
    %129 = arith.mulf %127, %128 : vector<1x256xf32>
    %130 = arith.mulf %123, %123 : vector<32x256xf32>
    %cst_150 = arith.constant dense<0.000000e+00> : vector<256xf32>
    %131 = vector.multi_reduction <add>, %130, %cst_150 [0] : vector<32x256xf32> to vector<256xf32>
    %132 = vector.shape_cast %131 : vector<256xf32> to vector<1x256xf32>
    %cst_151 = arith.constant 3.125000e-02 : f32
    %133 = vector.broadcast %cst_151 : f32 to vector<1x256xf32>
    %134 = arith.mulf %132, %133 : vector<1x256xf32>
    %135 = arith.mulf %129, %129 : vector<1x256xf32>
    %136 = arith.subf %134, %135 : vector<1x256xf32>
    %cst_152 = arith.constant 0.000000e+00 : f32
    %137 = vector.broadcast %cst_152 : f32 to vector<1x256xf32>
    %138 = arith.maximumf %136, %137 : vector<1x256xf32>
    %139 = vector.broadcast %129 : vector<1x256xf32> to vector<32x256xf32>
    %140 = arith.subf %123, %139 : vector<32x256xf32>
    %cst_153 = arith.constant 9.99999974E-6 : f32
    %141 = vector.broadcast %cst_153 : f32 to vector<1x256xf32>
    %142 = arith.addf %138, %141 : vector<1x256xf32>
    %143 = math.rsqrt %142 : vector<1x256xf32>
    %144 = vector.broadcast %143 : vector<1x256xf32> to vector<32x256xf32>
    %145 = arith.mulf %140, %144 : vector<32x256xf32>
    %146 = vector.broadcast %124 : vector<1x256xf32> to vector<32x256xf32>
    %147 = arith.mulf %145, %146 : vector<32x256xf32>
    %148 = vector.broadcast %125 : vector<1x256xf32> to vector<32x256xf32>
    %149 = arith.addf %147, %148 : vector<32x256xf32>
    %cst_154 = arith.constant 0.000000e+00 : f32
    %150 = vector.broadcast %cst_154 : f32 to vector<32x256xf32>
    %151 = arith.cmpf oge, %149, %150 : vector<32x256xf32>
    %cst_155 = arith.constant 2.000000e-01 : f32
    %152 = vector.broadcast %cst_155 : f32 to vector<32x256xf32>
    %153 = arith.mulf %152, %149 : vector<32x256xf32>
    %154 = arith.select %151, %149, %153 : vector<32x256xi1>, vector<32x256xf32>
    %155 = vector.shape_cast %154 : vector<32x256xf32> to vector<2x16x256xf32>
    %c0_156 = arith.constant 0 : index
    %c0_157 = arith.constant 0 : index
    %156 = vector.load %arg5[%c0_156, %c0_157] : memref<16x256xf32, #tpu.memory_space<vmem>>, vector<16x256xf32>
    %157 = vector.shape_cast %156 : vector<16x256xf32> to vector<1x16x256xf32>
    %158 = vector.broadcast %157 : vector<1x16x256xf32> to vector<2x16x256xf32>
    %159 = arith.mulf %155, %158 : vector<2x16x256xf32>
    %cst_158 = arith.constant dense<0.000000e+00> : vector<2x16xf32>
    %160 = vector.multi_reduction <add>, %159, %cst_158 [2] : vector<2x16x256xf32> to vector<2x16xf32>
    %cst_159 = arith.constant dense<0.000000e+00> : vector<2xf32>
    %161 = vector.multi_reduction <add>, %160, %cst_159 [1] : vector<2x16xf32> to vector<2xf32>
    %162 = vector.shape_cast %161 : vector<2xf32> to vector<2x1xf32>
    %cst_160 = arith.constant 0.000000e+00 : f32
    %163 = vector.broadcast %cst_160 : f32 to vector<2x1xf32>
    %164 = arith.subf %163, %162 : vector<2x1xf32>
    %165 = math.exp %164 : vector<2x1xf32>
    %cst_161 = arith.constant 1.000000e+00 : f32
    %166 = vector.broadcast %cst_161 : f32 to vector<2x1xf32>
    %167 = arith.addf %166, %165 : vector<2x1xf32>
    %cst_162 = arith.constant 1.000000e+00 : f32
    %168 = vector.broadcast %cst_162 : f32 to vector<2x1xf32>
    %169 = arith.divf %168, %167 : vector<2x1xf32>
    %170 = vector.shape_cast %169 : vector<2x1xf32> to vector<2x1xf32>
    %171 = vector.broadcast %170 : vector<2x1xf32> to vector<2x128xf32>
    %c0_163 = arith.constant 0 : index
    %c0_164 = arith.constant 0 : index
    %172 = vector.load %arg10[%c0_163, %c0_164] : memref<2x128xf32, #tpu.memory_space<vmem>>, vector<2x128xf32>
    tpu.vector_store %arg10[%c0_163, %c0_164], %171 {strides = array<i32>} : memref<2x128xf32, #tpu.memory_space<vmem>>, vector<2x128xf32>,
    return
  }
  func.func @transform_0(%arg0: i32) -> (i32, i32) {
    %c0_i32 = arith.constant 0 : i32
    %c0_i32_0 = arith.constant 0 : i32
    %c0_i32_1 = arith.constant 0 : i32
    return %c0_i32, %c0_i32_0 : i32, i32
  }
  func.func @transform_1(%arg0: i32) -> (i32, i32) {
    %c0_i32 = arith.constant 0 : i32
    %c0_i32_0 = arith.constant 0 : i32
    %c0_i32_1 = arith.constant 0 : i32
    return %c0_i32, %c0_i32_0 : i32, i32
  }
  func.func @transform_2(%arg0: i32) -> (i32, i32) {
    %c0_i32 = arith.constant 0 : i32
    %c0_i32_0 = arith.constant 0 : i32
    %c0_i32_1 = arith.constant 0 : i32
    return %c0_i32, %c0_i32_0 : i32, i32
  }
  func.func @transform_3(%arg0: i32) -> (i32, i32) {
    %c0_i32 = arith.constant 0 : i32
    %c0_i32_0 = arith.constant 0 : i32
    %c0_i32_1 = arith.constant 0 : i32
    return %c0_i32, %c0_i32_0 : i32, i32
  }
  func.func @transform_4(%arg0: i32) -> (i32, i32) {
    %c0_i32 = arith.constant 0 : i32
    %c0_i32_0 = arith.constant 0 : i32
    %c0_i32_1 = arith.constant 0 : i32
    return %c0_i32, %c0_i32_0 : i32, i32
  }
  func.func @transform_5(%arg0: i32) -> (i32, i32) {
    %c0_i32 = arith.constant 0 : i32
    %c0_i32_0 = arith.constant 0 : i32
    %c0_i32_1 = arith.constant 0 : i32
    return %c0_i32, %c0_i32_0 : i32, i32
  }
  func.func @transform_6(%arg0: i32) -> (i32, i32) {
    %c0_i32 = arith.constant 0 : i32
    %c0_i32_0 = arith.constant 0 : i32
    %c0_i32_1 = arith.constant 0 : i32
    return %c0_i32, %c0_i32_0 : i32, i32
  }
  func.func @transform_7(%arg0: i32) -> (i32, i32) {
    %c0_i32 = arith.constant 0 : i32
    %c0_i32_0 = arith.constant 0 : i32
    %c0_i32_1 = arith.constant 0 : i32
    return %c0_i32, %c0_i32_0 : i32, i32
  }
  func.func @transform_8(%arg0: i32) -> (i32, i32) {
    %c0_i32 = arith.constant 0 : i32
    %c0_i32_0 = arith.constant 0 : i32
    %c0_i32_1 = arith.constant 0 : i32
    return %c0_i32, %c0_i32_0 : i32, i32
  }
  func.func @transform_9(%arg0: i32) -> (i32, i32) {
    %c0_i32 = arith.constant 0 : i32
    %c0_i32_0 = arith.constant 0 : i32
    %c0_i32_1 = arith.constant 0 : i32
    return %c0_i32, %c0_i32_0 : i32, i32
  }
}

</mosaic_0001>

<bundles_post_ra>
// kernel: a_call__.1
= control target key start
LH: loop header
LB: loop body
LE: loop exit
PB: predicated region body
PF: predicated region fallthrough
CT: control target
= control target key end

     0   :  { %vm175_vm0 = vcmask 261120   ;;  %v4854_v40 = vmov 0.0   ;;  %s6031_s1 = inlined_call_operand.vmem [shape: bf16[32,128], index: 1, kind: input, shape index: {}]   ;;  %s6032_s0 = inlined_call_operand.vmem [shape: bf16[288,32], index: 0, kind: input, shape index: {}]   ;;  %s6033_s2 = inlined_call_operand.vmem [shape: bf16[1024,128], index: 2, kind: input, shape index: {}]   ;;  %s6034_s3 = inlined_call_operand.vmem [shape: bf16[1152,256], index: 3, kind: input, shape index: {}]   ;;  %s6035_s5 = inlined_call_operand.vmem [shape: f32[1,128], index: 5, kind: input, shape index: {}]   ;;  %s6036_s6 = inlined_call_operand.vmem [shape: f32[1,128], index: 6, kind: input, shape index: {}]   ;;  %s6037_s7 = inlined_call_operand.vmem [shape: f32[1,256], index: 7, kind: input, shape index: {}]   ;;  %s6038_s8 = inlined_call_operand.vmem [shape: f32[1,256], index: 8, kind: input, shape index: {}]   ;;  %s6039_s4 = inlined_call_operand.vmem [shape: f32[16,256], index: 4, kind: input, shape index: {}]   ;;  %s6040_s9 = inlined_call_operand.vmem [shape: f32[2,128], index: 9, kind: output, shape index: {}]  }
   0x1   :  { %v4544_v0 = vld [vmem:[%s6031_s1] sm:$0xff]   ;;  %v4545_v1 = vld [vmem:[%s6031_s1 + $0x8] sm:$0xff]   ;;  %v4548_v4 = vld [vmem:[%s6032_s0 + $0x10] sm:$0xff]   ;;  %516 = vst [vmem:[#allocation2 + $0x18] sm:$0x1] %v4854_v40 }
   0x2   :  { %4470 = vmatprep.subr.bf16.mxu0 %v4544_v0  ;;  %v4546_v2 = vld [vmem:[%s6032_s0] sm:$0xff]   ;;  %v4547_v3 = vld [vmem:[%s6032_s0 + $0x8] sm:$0xff]   ;;  %v4549_v5 = vld [vmem:[%s6032_s0 + $0x18] sm:$0xff]   ;;  %517 = vst [vmem:[#allocation2 + $0x30] sm:$0x1] %v4854_v40 }
   0x3   :  { %4471 = vmatpush3.bf16.msra.mxu0 %v4544_v0  ;;  %4474 = vmatprep.mubr.msk.bf16.mxu0 %vm175_vm0, %v4546_v2  ;;  %v4550_v6 = vld [vmem:[%s6032_s0 + $0x20] sm:$0xff]   ;;  %v4551_v7 = vld [vmem:[%s6032_s0 + $0x28] sm:$0xff]   ;;  %v4552_v9 = vld [vmem:[%s6032_s0 + $0x30] sm:$0xff]   ;;  %515 = vst [vmem:[#allocation2] sm:$0x1] %v4854_v40 }
   0x4   :  { %4472 = vmatprep.subr.bf16.mxu0 %v4545_v1  ;;  %v4564_v8 = vld [vmem:[%s6033_s2 + $0x40] sm:$0xff]   ;;  %v4566_v11 = vld [vmem:[%s6033_s2 + $0x48] sm:$0xff]   ;;  %v4568_v13 = vld [vmem:[%s6033_s2 + $0x50] sm:$0xff]   ;;  %518 = vst [vmem:[#allocation2 + $0x48] sm:$0x1] %v4854_v40 }
   0x5   :  { %v4565_v10 = vld [vmem:[%s6033_s2] sm:$0xff]   ;;  %v4567_v12 = vld [vmem:[%s6033_s2 + $0x8] sm:$0xff]   ;;  %v4569_v14 = vld [vmem:[%s6033_s2 + $0x10] sm:$0xff]   ;;  %519 = vst [vmem:[#allocation2 + $0x60] sm:$0x1] %v4854_v40 }
   0x6   :  { %v4553_v15 = vld [vmem:[%s6032_s0 + $0x38] sm:$0xff]   ;;  %v4554_v17 = vld [vmem:[%s6032_s0 + $0x40] sm:$0xff]   ;;  %v4577_v23 = vld [vmem:[%s6033_s2 + $0x148] sm:$0xff]   ;;  %520 = vst [vmem:[#allocation2 + $0x78] sm:$0x1] %v4854_v40 }
   0x7   :  { %4473 = vmatpush3.bf16.msra.mxu0 %v4545_v1  ;;  %v4570_v16 = vld [vmem:[%s6033_s2 + $0x58] sm:$0xff]   ;;  %v4574_v19 = vld [vmem:[%s6033_s2 + $0x140] sm:$0xff]   ;;  %v4576_v24 = vld [vmem:[%s6033_s2 + $0x68] sm:$0xff]   ;;  %521 = vst [vmem:[#allocation2 + $0x90] sm:$0x1] %v4854_v40 }
   0x8   :  { %4214 = vmatprep.subr.bf16.mxu0 %v4564_v8  ;;  %v4571_v18 = vld [vmem:[%s6033_s2 + $0x18] sm:$0xff]   ;;  %v4575_v20 = vld [vmem:[%s6033_s2 + $0x100] sm:$0xff]   ;;  %4342 = vmatprep.subr.bf16.mxu1 %v4574_v19  ;;  %v4579_v25 = vld [vmem:[%s6033_s2 + $0x108] sm:$0xff]   ;;  %522 = vst [vmem:[#allocation2 + $0xa8] sm:$0x1] %v4854_v40 }
   0x9   :  { %v4572_v21 = vld [vmem:[%s6033_s2 + $0x60] sm:$0xff]   ;;  %4343 = vmatpush3.bf16.msra.mxu1 %v4575_v20  ;;  %v4555_v26 = vld [vmem:[%s6032_s0 + $0x48] sm:$0xff]   ;;  %v4556_v27 = vld [vmem:[%s6032_s0 + $0x50] sm:$0xff]   ;;  %523 = vst [vmem:[#allocation2 + $0xc0] sm:$0x1] %v4854_v40 }
   0xa   :  { %4475 = vmatmul.mubr.msk.bf16.vlgmr.msra.gmra.mrb[0].mxu0 %vm175_vm0, %v4547_v3  ;;  %v4573_v22 = vld [vmem:[%s6033_s2 + $0x20] sm:$0xff]   ;;  %4344 = vmatprep.subr.bf16.mxu1 %v4577_v23  ;;  %v4578_v28 = vld [vmem:[%s6033_s2 + $0x28] sm:$0xff]   ;;  %v4557_v29 = vld [vmem:[%s6032_s0 + $0x58] sm:$0xff]   ;;  %524 = vst [vmem:[#allocation2 + $0xd8] sm:$0x1] %v4854_v40 }
   0xb   :  { %4478 = vmatprep.mubr.msk.bf16.mxu0 %vm175_vm0, %v4548_v4  ;;  %4215 = vmatpush3.bf16.msra.mxu0 %v4565_v10  ;;  %v4558_v30 = vld [vmem:[%s6032_s0 + $0x60] sm:$0xff]   ;;  %v4559_v31 = vld [vmem:[%s6032_s0 + $0x68] sm:$0xff]   ;;  %v4560_v32 = vld [vmem:[%s6032_s0 + $0x70] sm:$0xff]   ;;  %525 = vst [vmem:[#allocation2 + $0xf0] sm:$0x1] %v4854_v40 }
   0xc   :  { %4216 = vmatprep.subr.bf16.mxu0 %v4566_v11  ;;  %v4561_v33 = vld [vmem:[%s6032_s0 + $0x78] sm:$0xff]   ;;  %v4562_v34 = vld [vmem:[%s6032_s0 + $0x80] sm:$0xff]   ;;  %v4563_v35 = vld [vmem:[%s6032_s0 + $0x88] sm:$0xff]   ;;  %526 = vst [vmem:[#allocation2 + $0x108] sm:$0x1] %v4854_v40 }
   0xd   :  { %4345 = vmatpush3.bf16.msra.mxu1 %v4579_v25  ;;  %v4580_v36 = vld [vmem:[%s6033_s2 + $0x150] sm:$0xff]   ;;  %v4582_v38 = vld [vmem:[%s6033_s2 + $0x158] sm:$0xff]   ;;  %527 = vst [vmem:[#allocation2 + $0x120] sm:$0x1] %v4854_v40  ;;  %528 = vst [vmem:[#allocation2 + $0x138] sm:$0x1] %v4854_v40 }
   0xe   :  { %v4581_v37 = vld [vmem:[%s6033_s2 + $0x110] sm:$0xff]   ;;  %4346 = vmatprep.subr.bf16.mxu1 %v4580_v36  ;;  %v4584_v39 = vld [vmem:[%s6033_s2 + $0x118] sm:$0xff]   ;;  %529 = vst [vmem:[#allocation2 + $0x150] sm:$0x1] %v4854_v40  ;;  %530 = vst [vmem:[#allocation2 + $0x168] sm:$0x1] %v4854_v40 }
   0xf   :  { %4217 = vmatpush3.bf16.msra.mxu0 %v4567_v12  ;;  %531 = vst [vmem:[#allocation2 + $0x180] sm:$0x1] %v4854_v40  ;;  %532 = vst [vmem:[#allocation2 + $0x198] sm:$0x1] %v4854_v40  ;;  %v4583_v41 = vld [vmem:[%s6033_s2 + $0x70] sm:$0xff]   ;;  %v4586_v42 = vld [vmem:[%s6033_s2 + $0x160] sm:$0xff]  }
  0x10   :  { %4218 = vmatprep.subr.bf16.mxu0 %v4568_v13  ;;  %533 = vst [vmem:[#allocation2 + $0x11] sm:$0x1] %v4854_v40  ;;  %534 = vst [vmem:[#allocation2 + $0x29] sm:$0x1] %v4854_v40  ;;  %v4587_v43 = vld [vmem:[%s6033_s2 + $0x120] sm:$0xff]   ;;  %v4585_v44 = vld [vmem:[%s6033_s2 + $0x30] sm:$0xff]  }
  0x11   :  { %4347 = vmatpush3.bf16.msra.mxu1 %v4581_v37  ;;  %535 = vst [vmem:[#allocation2 + $0x41] sm:$0x1] %v4854_v40  ;;  %536 = vst [vmem:[#allocation2 + $0x59] sm:$0x1] %v4854_v40  ;;  %v4588_v45 = vld [vmem:[%s6033_s2 + $0x168] sm:$0xff]   ;;  %v4592_v47 = vld [vmem:[%s6033_s2 + $0x170] sm:$0xff]  }
  0x12   :  { %4479 = vmatmul.mubr.msk.bf16.gmra.mrb[4].mxu0 %vm175_vm0, %v4549_v5  ;;  %4348 = vmatprep.subr.bf16.mxu1 %v4582_v38  ;;  %537 = vst [vmem:[#allocation2 + $0x71] sm:$0x1] %v4854_v40  ;;  %538 = vst [vmem:[#allocation2 + $0x89] sm:$0x1] %v4854_v40  ;;  %v4589_v46 = vld [vmem:[%s6033_s2 + $0x128] sm:$0xff]   ;;  %v4593_v48 = vld [vmem:[%s6033_s2 + $0x130] sm:$0xff]  }
  0x13   :  { %4482 = vmatprep.mubr.msk.bf16.mxu0 %vm175_vm0, %v4550_v6  ;;  %4219 = vmatpush3.bf16.msra.mxu0 %v4569_v14  ;;  %539 = vst [vmem:[#allocation2 + $0xa1] sm:$0x1] %v4854_v40  ;;  %540 = vst [vmem:[#allocation2 + $0xb9] sm:$0x1] %v4854_v40  ;;  %v4590_v49 = vld [vmem:[%s6033_s2 + $0x78] sm:$0xff]   ;;  %v4596_v53 = vld [vmem:[%s6033_s2 + $0xc0] sm:$0xff]  }
  0x14   :  { %4220 = vmatprep.subr.bf16.mxu0 %v4570_v16  ;;  %541 = vst [vmem:[#allocation2 + $0xd1] sm:$0x1] %v4854_v40  ;;  %542 = vst [vmem:[#allocation2 + $0xe9] sm:$0x1] %v4854_v40  ;;  %v4594_v50 = vld [vmem:[%s6033_s2 + $0x178] sm:$0xff]   ;;  %v4597_v36 = vld [vmem:[%s6033_s2 + $0x80] sm:$0xff]  }
  0x15   :  { %543 = vst [vmem:[#allocation2 + $0x101] sm:$0x1] %v4854_v40  ;;  %544 = vst [vmem:[#allocation2 + $0x119] sm:$0x1] %v4854_v40  ;;  %4349 = vmatpush3.bf16.msra.mxu1 %v4584_v39  ;;  %v4591_v51 = vld [vmem:[%s6033_s2 + $0x38] sm:$0xff]  }
  0x16   :  { %545 = vst [vmem:[#allocation2 + $0x131] sm:$0x1] %v4854_v40  ;;  %546 = vst [vmem:[#allocation2 + $0x149] sm:$0x1] %v4854_v40  ;;  %4350 = vmatprep.subr.bf16.mxu1 %v4586_v42  ;;  %v4595_v52 = vld [vmem:[%s6033_s2 + $0x138] sm:$0xff]  }
  0x17   :  { %4221 = vmatpush3.bf16.msra.mxu0 %v4571_v18  ;;  %547 = vst [vmem:[#allocation2 + $0x161] sm:$0x1] %v4854_v40  ;;  %548 = vst [vmem:[#allocation2 + $0x179] sm:$0x1] %v4854_v40 }
  0x18   :  { %4222 = vmatprep.subr.bf16.mxu0 %v4572_v21  ;;  %549 = vst [vmem:[#allocation2 + $0x191] sm:$0x1] %v4854_v40  ;;  %550 = vst [vmem:[#allocation2 + $0x1a9] sm:$0x1] %v4854_v40 }
  0x19   :  { %2125 = vst [vmem:[#allocation4] sm:$0xff] %v4854_v40  ;;  %2126 = vst [vmem:[#allocation4 + $0x8] sm:$0x3] %v4854_v40  ;;  %4351 = vmatpush3.bf16.msra.mxu1 %v4587_v43 }
  0x1a   :  { %4483 = vmatmul.mubr.msk.bf16.gmra.mrb[8].mxu0 %vm175_vm0, %v4551_v7  ;;  %2127 = vst [vmem:[#allocation4 + $0xa0] sm:$0xff] %v4854_v40  ;;  %2128 = vst [vmem:[#allocation4 + $0xa8] sm:$0x3] %v4854_v40  ;;  %4352 = vmatprep.subr.bf16.mxu1 %v4588_v45 }
  0x1b   :  { %4486 = vmatprep.mubr.msk.bf16.mxu0 %vm175_vm0, %v4552_v9  ;;  %4223 = vmatpush3.bf16.msra.mxu0 %v4573_v22  ;;  %2130 = vst [vmem:[#allocation4 + $0x10] sm:$0x1] %v4854_v40  ;;  %2131 = vst [vmem:[#allocation4 + $0x20] sm:$0x1] %v4854_v40 }
  0x1c   :  { %4224 = vmatprep.subr.bf16.mxu0 %v4576_v24  ;;  %2132 = vst [vmem:[#allocation4 + $0x30] sm:$0x1] %v4854_v40  ;;  %2133 = vst [vmem:[#allocation4 + $0x40] sm:$0x1] %v4854_v40 }
  0x1d   :  { %2134 = vst [vmem:[#allocation4 + $0x50] sm:$0x1] %v4854_v40  ;;  %2135 = vst [vmem:[#allocation4 + $0x60] sm:$0x1] %v4854_v40  ;;  %4353 = vmatpush3.bf16.msra.mxu1 %v4589_v46 }
  0x1e   :  { %2136 = vst [vmem:[#allocation4 + $0x70] sm:$0x1] %v4854_v40  ;;  %2137 = vst [vmem:[#allocation4 + $0x80] sm:$0x1] %v4854_v40  ;;  %4354 = vmatprep.subr.bf16.mxu1 %v4592_v47 }
  0x1f   :  { %4225 = vmatpush3.bf16.msra.mxu0 %v4578_v28  ;;  %2138 = vst [vmem:[#allocation4 + $0xb0] sm:$0x1] %v4854_v40  ;;  %2139 = vst [vmem:[#allocation4 + $0xc0] sm:$0x1] %v4854_v40 }
  0x20   :  { %2140 = vst [vmem:[#allocation4 + $0xd0] sm:$0x1] %v4854_v40  ;;  %2141 = vst [vmem:[#allocation4 + $0xe0] sm:$0x1] %v4854_v40  ;;  %4226 = vmatprep.subr.bf16.mxu0 %v4583_v41 }
  0x21   :  { %2142 = vst [vmem:[#allocation4 + $0xf0] sm:$0x1] %v4854_v40  ;;  %2143 = vst [vmem:[#allocation4 + $0x100] sm:$0x1] %v4854_v40  ;;  %4355 = vmatpush3.bf16.msra.mxu1 %v4593_v48  ;;  %v4599_v48 = vld [vmem:[%s6033_s2 + $0x88] sm:$0xff]  }
  0x22   :  { %4487 = vmatmul.mubr.msk.bf16.gmra.mrb[12].mxu0 %vm175_vm0, %v4553_v15  ;;  %2144 = vst [vmem:[#allocation4 + $0x110] sm:$0x1] %v4854_v40  ;;  %2145 = vst [vmem:[#allocation4 + $0x120] sm:$0x1] %v4854_v40  ;;  %4356 = vmatprep.subr.bf16.mxu1 %v4594_v50  ;;  %v4598_v40 = vld [vmem:[%s6033_s2 + $0xc8] sm:$0xff]  }
  0x23   :  { %4490 = vmatprep.mubr.msk.bf16.mxu0 %vm175_vm0, %v4554_v17  ;;  %4227 = vmatpush3.bf16.msra.mxu0 %v4585_v44 }
  0x24   :  { %4228 = vmatprep.subr.bf16.mxu0 %v4590_v49 }
  0x25   :  { %4357 = vmatpush3.bf16.msra.mxu1 %v4595_v52 }
  0x27   :  { %4229 = vmatpush3.bf16.msra.mxu0 %v4591_v51 }
  0x28   :  { %4278 = vmatprep.subr.bf16.mxu0 %v4596_v53  ;;  %v4600_v53 = vld [vmem:[%s6033_s2 + $0xd0] sm:$0xff]  }
  0x2a   :  { %4491 = vmatmul.mubr.msk.bf16.gmra.mrb[16].mxu0 %vm175_vm0, %v4555_v26 }
  0x2b   :  { %4494 = vmatprep.mubr.msk.bf16.mxu0 %vm175_vm0, %v4556_v27 }
  0x32   :  { %4495 = vmatmul.mubr.msk.bf16.gmra.mrb[20].mxu0 %vm175_vm0, %v4557_v29 }
  0x33   :  { %4498 = vmatprep.mubr.msk.bf16.mxu0 %vm175_vm0, %v4558_v30 }
  0x3a   :  { %4499 = vmatmul.mubr.msk.bf16.gmra.mrb[24].mxu0 %vm175_vm0, %v4559_v31 }
  0x3b   :  { %4502 = vmatprep.mubr.msk.bf16.mxu0 %vm175_vm0, %v4560_v32 }
  0x42   :  { %4503 = vmatmul.mubr.msk.bf16.gmra.mrb[28].mxu0 %vm175_vm0, %v4561_v33 }
  0x43   :  { %4506 = vmatprep.mubr.msk.bf16.mxu0 %vm175_vm0, %v4562_v34 }
  0x4a   :  { %4507 = vmatmul.mubr.msk.bf16.gmra.mrb[32].mxu0 %vm175_vm0, %v4563_v35 }
  0xdd   :  { %v4476_v54 = vpop.f32.mrb[0].mxu0 }
  0xde   :  { %vm409_vm1 = vcmp.ge.f32.partialorder %v4476_v54, 0.0  ;;  %v445_v55 = vmul.f32 0.2, %v4476_v54  ;;  %v264_v56 = vpop.f32.mrb[1].mxu0 }
  0xdf   :  { %vm407_vm2 = vcmp.ge.f32.partialorder %v264_v56, 0.0  ;;  %v443_v57 = vmul.f32 0.2, %v264_v56  ;;  %v4477_v58 = vpop.f32.mrb[2].mxu0 }
  0xe0   :  { %v481_v59 = vsel %vm409_vm1, %v4476_v54, %v445_v55  ;;  %vm410_vm3 = vcmp.ge.f32.partialorder %v4477_v58, 0.0  ;;  %v446_v60 = vmul.f32 0.2, %v4477_v58  ;;  %v267_v61 = vpop.f32.mrb[3].mxu0 }
  0xe1   :  { %553 = vst [vmem:[#allocation2 + $0x19] sm:$0xff] %v481_v59  ;;  %v479_v62 = vsel %vm407_vm2, %v264_v56, %v443_v57  ;;  %vm408_vm4 = vcmp.ge.f32.partialorder %v267_v61, 0.0  ;;  %v444_v63 = vmul.f32 0.2, %v267_v61 }
  0xe2   :  { %551 = vst [vmem:[#allocation2 + $0x1] sm:$0xff] %v479_v62  ;;  %v482_v0 = vsel %vm410_vm3, %v4477_v58, %v446_v60 }
  0xe3   :  { %554 = vst [vmem:[#allocation2 + $0x21] sm:$0xff] %v482_v0  ;;  %v480_v1 = vsel %vm408_vm4, %v267_v61, %v444_v63  ;;  %v4601_v0 = vld [vmem:[%s6033_s2 + $0x90] sm:$0xff]  }
  0xe4   :  { %552 = vst [vmem:[#allocation2 + $0x9] sm:$0xff] %v480_v1 }
  0xe5   :  { %v4480_v2 = vpop.f32.mrb[4].mxu0 }
  0xe6   :  { %vm413_vm5 = vcmp.ge.f32.partialorder %v4480_v2, 0.0  ;;  %v449_v3 = vmul.f32 0.2, %v4480_v2  ;;  %v280_v4 = vpop.f32.mrb[5].mxu0 }
  0xe7   :  { %vm411_vm6 = vcmp.ge.f32.partialorder %v280_v4, 0.0  ;;  %v447_v5 = vmul.f32 0.2, %v280_v4  ;;  %v4481_v6 = vpop.f32.mrb[6].mxu0 }
  0xe8   :  { %v485_v7 = vsel %vm413_vm5, %v4480_v2, %v449_v3  ;;  %vm414_vm7 = vcmp.ge.f32.partialorder %v4481_v6, 0.0  ;;  %v450_v8 = vmul.f32 0.2, %v4481_v6  ;;  %v283_v9 = vpop.f32.mrb[7].mxu0 }
  0xe9   :  { %557 = vst [vmem:[#allocation2 + $0x49] sm:$0xff] %v485_v7  ;;  %v483_v10 = vsel %vm411_vm6, %v280_v4, %v447_v5  ;;  %vm412_vm8 = vcmp.ge.f32.partialorder %v283_v9, 0.0  ;;  %v448_v11 = vmul.f32 0.2, %v283_v9  ;;  %v4602_v4 = vld [vmem:[%s6033_s2 + $0xd8] sm:$0xff]  }
  0xea   :  { %555 = vst [vmem:[#allocation2 + $0x31] sm:$0xff] %v483_v10  ;;  %v486_v12 = vsel %vm414_vm7, %v4481_v6, %v450_v8  ;;  %v635_v24 = vld [vmem:[#allocation2 + $0x18] ss:$2 sm:$0xff] }
  0xeb   :  { %558 = vst [vmem:[#allocation2 + $0x51] sm:$0xff] %v486_v12  ;;  %v484_v13 = vsel %vm412_vm8, %v283_v9, %v448_v11  ;;  %v589_v25 = vld [vmem:[#allocation2 + $0x18] ss:$2 sm:$0xff] }
  0xec   :  { %556 = vst [vmem:[#allocation2 + $0x39] sm:$0xff] %v484_v13  ;;  %v587_v27 = vld [vmem:[#allocation2] ss:$2 sm:$0xff]  ;;  %v4603_v12 = vld [vmem:[%s6033_s2 + $0x98] sm:$0xff]  }
  0xed   :  { %v4484_v14 = vpop.f32.mrb[8].mxu0  ;;  %v779_v28 = vld [vmem:[#allocation2 + $0x2] ss:$2 sm:$0xff]  ;;  %v618_v38 = vpack.c.bf16 %v589_v25, %v587_v27 }
  0xee   :  { %vm417_vm9 = vcmp.ge.f32.partialorder %v4484_v14, 0.0  ;;  %v453_v15 = vmul.f32 0.2, %v4484_v14  ;;  %v296_v16 = vpop.f32.mrb[9].mxu0  ;;  %v781_v29 = vld [vmem:[#allocation2 + $0x1a] ss:$2 sm:$0xff] }
  0xef   :  { %vm415_vm10 = vcmp.ge.f32.partialorder %v296_v16, 0.0  ;;  %v451_v17 = vmul.f32 0.2, %v296_v16  ;;  %v4485_v18 = vpop.f32.mrb[10].mxu0  ;;  %v827_v32 = vld [vmem:[#allocation2 + $0x1a] ss:$2 sm:$0xff]  ;;  %v810_v39 = vpack.c.bf16 %v781_v29, %v779_v28 }
  0xf0   :  { %v489_v19 = vsel %vm417_vm9, %v4484_v14, %v453_v15  ;;  %vm418_vm11 = vcmp.ge.f32.partialorder %v4485_v18, 0.0  ;;  %v454_v20 = vmul.f32 0.2, %v4485_v18  ;;  %v299_v21 = vpop.f32.mrb[11].mxu0  ;;  %v4605_v28 = vld [vmem:[%s6033_s2 + $0xa0] sm:$0xff]  }
  0xf1   :  { %561 = vst [vmem:[#allocation2 + $0x79] sm:$0xff] %v489_v19  ;;  %v487_v22 = vsel %vm415_vm10, %v296_v16, %v451_v17  ;;  %vm416_vm12 = vcmp.ge.f32.partialorder %v299_v21, 0.0  ;;  %v452_v23 = vmul.f32 0.2, %v299_v21  ;;  %v4604_v17 = vld [vmem:[%s6033_s2 + $0xe0] sm:$0xff]  }
  0xf2   :  { %559 = vst [vmem:[#allocation2 + $0x61] sm:$0xff] %v487_v22  ;;  %v490_v26 = vsel %vm418_vm11, %v4485_v18, %v454_v20  ;;  %v639_v51 = vld [vmem:[#allocation2 + $0x48] ss:$2 sm:$0xff] }
  0xf3   :  { %562 = vst [vmem:[#allocation2 + $0x81] sm:$0xff] %v490_v26  ;;  %v488_v30 = vsel %vm416_vm12, %v299_v21, %v452_v23  ;;  %v637_v31 = vld [vmem:[#allocation2 + $0x30] ss:$2 sm:$0xff] }
  0xf4   :  { %v829_v33 = vld [vmem:[#allocation2 + $0x32] ss:$2 sm:$0xff]  ;;  %560 = vst [vmem:[#allocation2 + $0x69] sm:$0xff] %v488_v30  ;;  %v666_v34 = vpack.c.bf16 %v637_v31, %v635_v24 }
  0xf5   :  { %v858_v35 = vpack.c.bf16 %v829_v33, %v827_v32  ;;  %v4488_v37 = vpop.f32.mrb[12].mxu0  ;;  %v593_v52 = vld [vmem:[#allocation2 + $0x48] ss:$2 sm:$0xff] }
  0xf6   :  { %vm421_vm13 = vcmp.ge.f32.partialorder %v4488_v37, 0.0  ;;  %v457_v41 = vmul.f32 0.2, %v4488_v37  ;;  %v312_v42 = vpop.f32.mrb[13].mxu0  ;;  %1578 = vmatprep.mubr.bf16.mxu0 %v666_v34  ;;  %v591_v55 = vld [vmem:[#allocation2 + $0x30] ss:$2 sm:$0xff] }
  0xf7   :  { %1772 = vmatprep.mubr.bf16.mxu1 %v858_v35  ;;  %vm419_vm14 = vcmp.ge.f32.partialorder %v312_v42, 0.0  ;;  %v455_v43 = vmul.f32 0.2, %v312_v42  ;;  %v4489_v44 = vpop.f32.mrb[14].mxu0  ;;  %1579 = vmatmul.mubr.bf16.vlgmr.msra.gmra.mrb[36].mxu0 %v618_v38  ;;  %v783_v56 = vld [vmem:[#allocation2 + $0x32] ss:$2 sm:$0xff]  ;;  %v619_v2 = vpack.c.bf16 %v593_v52, %v591_v55 }
  0xf8   :  { %1773 = vmatmul.mubr.bf16.vlgmr.msra.gmra.mrb[0].mxu1 %v810_v39  ;;  %v493_v45 = vsel %vm421_vm13, %v4488_v37, %v457_v41  ;;  %vm422_vm15 = vcmp.ge.f32.partialorder %v4489_v44, 0.0  ;;  %v458_v46 = vmul.f32 0.2, %v4489_v44  ;;  %4279 = vmatpush3.bf16.msra.mxu0 %v4597_v36  ;;  %v315_v47 = vpop.f32.mrb[15].mxu0  ;;  %v785_v57 = vld [vmem:[#allocation2 + $0x4a] ss:$2 sm:$0xff] }
  0xf9   :  { %565 = vst [vmem:[#allocation2 + $0xa9] sm:$0xff] %v493_v45  ;;  %v491_v49 = vsel %vm419_vm14, %v312_v42, %v455_v43  ;;  %vm420_vm0 = vcmp.ge.f32.partialorder %v315_v47, 0.0  ;;  %v456_v50 = vmul.f32 0.2, %v315_v47  ;;  %4280 = vmatprep.subr.bf16.mxu0 %v4598_v40  ;;  %v831_v60 = vld [vmem:[#allocation2 + $0x4a] ss:$2 sm:$0xff]  ;;  %v811_v3 = vpack.c.bf16 %v785_v57, %v783_v56 }
  0xfa   :  { %563 = vst [vmem:[#allocation2 + $0x91] sm:$0xff] %v491_v49  ;;  %v494_v54 = vsel %vm422_vm15, %v4489_v44, %v458_v46  ;;  %v643_v15 = vld [vmem:[#allocation2 + $0x78] ss:$2 sm:$0xff]  ;;  %v4606_v32 = vld [vmem:[%s6033_s2 + $0xe8] sm:$0xff]   ;;  %v4608_v45 = vld [vmem:[%s6033_s2 + $0xf0] sm:$0xff]  }
  0xfb   :  { %566 = vst [vmem:[#allocation2 + $0xb1] sm:$0xff] %v494_v54  ;;  %v492_v58 = vsel %vm420_vm0, %v315_v47, %v456_v50  ;;  %v641_v59 = vld [vmem:[#allocation2 + $0x60] ss:$2 sm:$0xff]  ;;  %v4609_v56 = vld [vmem:[%s6033_s2 + $0xb0] sm:$0xff]  }
  0xfc   :  { %v833_v61 = vld [vmem:[#allocation2 + $0x62] ss:$2 sm:$0xff]  ;;  %564 = vst [vmem:[#allocation2 + $0x99] sm:$0xff] %v492_v58  ;;  %v667_v62 = vpack.c.bf16 %v641_v59, %v639_v51  ;;  %4281 = vmatpush3.bf16.msra.mxu0 %v4599_v48 }
  0xfd   :  { %v859_v63 = vpack.c.bf16 %v833_v61, %v831_v60  ;;  %v4492_v1 = vpop.f32.mrb[16].mxu0  ;;  %4282 = vmatprep.subr.bf16.mxu0 %v4600_v53  ;;  %v597_v16 = vld [vmem:[#allocation2 + $0x78] ss:$2 sm:$0xff]  ;;  %v4607_v40 = vld [vmem:[%s6033_s2 + $0xa8] sm:$0xff]  }
  0xfe   :  { %vm425_vm1 = vcmp.ge.f32.partialorder %v4492_v1, 0.0  ;;  %v461_v5 = vmul.f32 0.2, %v4492_v1  ;;  %v328_v6 = vpop.f32.mrb[17].mxu0  ;;  %1586 = vmatprep.mubr.bf16.mxu0 %v667_v62  ;;  %v595_v19 = vld [vmem:[#allocation2 + $0x60] ss:$2 sm:$0xff] }
  0xff   :  { %1780 = vmatprep.mubr.bf16.mxu1 %v859_v63  ;;  %vm423_vm2 = vcmp.ge.f32.partialorder %v328_v6, 0.0  ;;  %v459_v7 = vmul.f32 0.2, %v328_v6  ;;  %v4493_v8 = vpop.f32.mrb[18].mxu0  ;;  %1587 = vmatmul.mubr.bf16.gmra.mrb[40].mxu0 %v619_v2  ;;  %v787_v20 = vld [vmem:[#allocation2 + $0x62] ss:$2 sm:$0xff]  ;;  %v620_v30 = vpack.c.bf16 %v597_v16, %v595_v19 }
 0x100   :  { %1781 = vmatmul.mubr.bf16.gmra.mrb[4].mxu1 %v811_v3  ;;  %v497_v9 = vsel %vm425_vm1, %v4492_v1, %v461_v5  ;;  %vm426_vm3 = vcmp.ge.f32.partialorder %v4493_v8, 0.0  ;;  %v462_v10 = vmul.f32 0.2, %v4493_v8  ;;  %v331_v11 = vpop.f32.mrb[19].mxu0  ;;  %4283 = vmatpush3.bf16.msra.mxu0 %v4601_v0  ;;  %v789_v21 = vld [vmem:[#allocation2 + $0x7a] ss:$2 sm:$0xff] }
 0x101   :  { %569 = vst [vmem:[#allocation2 + $0xd9] sm:$0xff] %v497_v9  ;;  %v495_v13 = vsel %vm423_vm2, %v328_v6, %v459_v7  ;;  %vm424_vm4 = vcmp.ge.f32.partialorder %v331_v11, 0.0  ;;  %v460_v14 = vmul.f32 0.2, %v331_v11  ;;  %4284 = vmatprep.subr.bf16.mxu0 %v4602_v4  ;;  %v835_v24 = vld [vmem:[#allocation2 + $0x7a] ss:$2 sm:$0xff]  ;;  %v812_v31 = vpack.c.bf16 %v789_v21, %v787_v20 }
 0x102   :  { %567 = vst [vmem:[#allocation2 + $0xc1] sm:$0xff] %v495_v13  ;;  %v498_v18 = vsel %vm426_vm3, %v4493_v8, %v462_v10  ;;  %v647_v43 = vld [vmem:[#allocation2 + $0xa8] ss:$2 sm:$0xff]  ;;  %v4610_v60 = vld [vmem:[%s6033_s2 + $0xf8] sm:$0xff]   ;;  %v4612_v7 = vld [vmem:[%s6033_s2 + $0x1c0] sm:$0xff]  }
 0x103   :  { %570 = vst [vmem:[#allocation2 + $0xe1] sm:$0xff] %v498_v18  ;;  %v496_v22 = vsel %vm424_vm4, %v331_v11, %v460_v14  ;;  %v645_v23 = vld [vmem:[#allocation2 + $0x90] ss:$2 sm:$0xff] }
 0x104   :  { %v837_v25 = vld [vmem:[#allocation2 + $0x92] ss:$2 sm:$0xff]  ;;  %568 = vst [vmem:[#allocation2 + $0xc9] sm:$0xff] %v496_v22  ;;  %v668_v26 = vpack.c.bf16 %v645_v23, %v643_v15  ;;  %4285 = vmatpush3.bf16.msra.mxu0 %v4603_v12 }
 0x105   :  { %v860_v27 = vpack.c.bf16 %v837_v25, %v835_v24  ;;  %v4496_v29 = vpop.f32.mrb[20].mxu0  ;;  %4286 = vmatprep.subr.bf16.mxu0 %v4604_v17  ;;  %v601_v44 = vld [vmem:[#allocation2 + $0xa8] ss:$2 sm:$0xff]  ;;  %v4611_v4 = vld [vmem:[%s6033_s2 + $0xb8] sm:$0xff]  }
 0x106   :  { %vm429_vm5 = vcmp.ge.f32.partialorder %v4496_v29, 0.0  ;;  %v465_v33 = vmul.f32 0.2, %v4496_v29  ;;  %v344_v34 = vpop.f32.mrb[21].mxu0  ;;  %1594 = vmatprep.mubr.bf16.mxu0 %v668_v26  ;;  %v599_v47 = vld [vmem:[#allocation2 + $0x90] ss:$2 sm:$0xff] }
 0x107   :  { %1788 = vmatprep.mubr.bf16.mxu1 %v860_v27  ;;  %vm427_vm6 = vcmp.ge.f32.partialorder %v344_v34, 0.0  ;;  %v463_v35 = vmul.f32 0.2, %v344_v34  ;;  %v4497_v36 = vpop.f32.mrb[22].mxu0  ;;  %1595 = vmatmul.mubr.bf16.gmra.mrb[44].mxu0 %v620_v30  ;;  %v791_v48 = vld [vmem:[#allocation2 + $0x92] ss:$2 sm:$0xff]  ;;  %v621_v58 = vpack.c.bf16 %v601_v44, %v599_v47 }
 0x108   :  { %1789 = vmatmul.mubr.bf16.gmra.mrb[8].mxu1 %v812_v31  ;;  %v501_v37 = vsel %vm429_vm5, %v4496_v29, %v465_v33  ;;  %vm430_vm7 = vcmp.ge.f32.partialorder %v4497_v36, 0.0  ;;  %v466_v38 = vmul.f32 0.2, %v4497_v36  ;;  %v347_v39 = vpop.f32.mrb[23].mxu0  ;;  %4287 = vmatpush3.bf16.msra.mxu0 %v4605_v28  ;;  %v793_v49 = vld [vmem:[#allocation2 + $0xaa] ss:$2 sm:$0xff] }
 0x109   :  { %573 = vst [vmem:[#allocation2 + $0x109] sm:$0xff] %v501_v37  ;;  %v499_v41 = vsel %vm427_vm6, %v344_v34, %v463_v35  ;;  %vm428_vm8 = vcmp.ge.f32.partialorder %v347_v39, 0.0  ;;  %v464_v42 = vmul.f32 0.2, %v347_v39  ;;  %4288 = vmatprep.subr.bf16.mxu0 %v4606_v32  ;;  %v839_v52 = vld [vmem:[#allocation2 + $0xaa] ss:$2 sm:$0xff]  ;;  %v813_v59 = vpack.c.bf16 %v793_v49, %v791_v48 }
 0x10a   :  { %571 = vst [vmem:[#allocation2 + $0xf1] sm:$0xff] %v499_v41  ;;  %v502_v46 = vsel %vm430_vm7, %v4497_v36, %v466_v38  ;;  %v603_v11 = vld [vmem:[#allocation2 + $0xd8] ss:$2 sm:$0xff] }
 0x10b   :  { %574 = vst [vmem:[#allocation2 + $0x111] sm:$0xff] %v502_v46  ;;  %v500_v50 = vsel %vm428_vm8, %v347_v39, %v464_v42  ;;  %v649_v51 = vld [vmem:[#allocation2 + $0xc0] ss:$2 sm:$0xff] }
 0x10c   :  { %v841_v53 = vld [vmem:[#allocation2 + $0xc2] ss:$2 sm:$0xff]  ;;  %572 = vst [vmem:[#allocation2 + $0xf9] sm:$0xff] %v500_v50  ;;  %v669_v54 = vpack.c.bf16 %v649_v51, %v647_v43  ;;  %4289 = vmatpush3.bf16.msra.mxu0 %v4607_v40 }
 0x10d   :  { %v861_v55 = vpack.c.bf16 %v841_v53, %v839_v52  ;;  %v4500_v57 = vpop.f32.mrb[24].mxu0  ;;  %4290 = vmatprep.subr.bf16.mxu0 %v4608_v45  ;;  %v795_v19 = vld [vmem:[#allocation2 + $0xda] ss:$2 sm:$0xff] }
 0x10e   :  { %vm433_vm9 = vcmp.ge.f32.partialorder %v4500_v57, 0.0  ;;  %v469_v61 = vmul.f32 0.2, %v4500_v57  ;;  %v360_v62 = vpop.f32.mrb[25].mxu0  ;;  %1602 = vmatprep.mubr.bf16.mxu0 %v669_v54 }
 0x10f   :  { %1796 = vmatprep.mubr.bf16.mxu1 %v861_v55  ;;  %vm431_vm10 = vcmp.ge.f32.partialorder %v360_v62, 0.0  ;;  %v467_v63 = vmul.f32 0.2, %v360_v62  ;;  %v4501_v0 = vpop.f32.mrb[26].mxu0  ;;  %1603 = vmatmul.mubr.bf16.gmra.mrb[48].mxu0 %v621_v58 }
 0x110   :  { %1797 = vmatmul.mubr.bf16.gmra.mrb[12].mxu1 %v813_v59  ;;  %v505_v1 = vsel %vm433_vm9, %v4500_v57, %v469_v61  ;;  %vm434_vm11 = vcmp.ge.f32.partialorder %v4501_v0, 0.0  ;;  %v470_v2 = vmul.f32 0.2, %v4501_v0  ;;  %v363_v3 = vpop.f32.mrb[27].mxu0  ;;  %4291 = vmatpush3.bf16.msra.mxu0 %v4609_v56 }
 0x111   :  { %577 = vst [vmem:[#allocation2 + $0x139] sm:$0xff] %v505_v1  ;;  %v503_v5 = vsel %vm431_vm10, %v360_v62, %v467_v63  ;;  %vm432_vm12 = vcmp.ge.f32.partialorder %v363_v3, 0.0  ;;  %v468_v6 = vmul.f32 0.2, %v363_v3  ;;  %4292 = vmatprep.subr.bf16.mxu0 %v4610_v60 }
 0x112   :  { %575 = vst [vmem:[#allocation2 + $0x121] sm:$0xff] %v503_v5  ;;  %v506_v8 = vsel %vm434_vm11, %v4501_v0, %v470_v2  ;;  %v653_v9 = vld [vmem:[#allocation2 + $0x108] ss:$2 sm:$0xff] }
 0x113   :  { %v845_v10 = vld [vmem:[#allocation2 + $0x10a] ss:$2 sm:$0xff]  ;;  %578 = vst [vmem:[#allocation2 + $0x141] sm:$0xff] %v506_v8  ;;  %v504_v12 = vsel %vm432_vm12, %v363_v3, %v468_v6  ;;  %v733_v6 = vld [vmem:[#allocation2 + $0x31] ss:$2 sm:$0xff] }
 0x114   :  { %v651_v13 = vld [vmem:[#allocation2 + $0xf0] ss:$2 sm:$0xff]  ;;  %576 = vst [vmem:[#allocation2 + $0x129] sm:$0xff] %v504_v12  ;;  %4293 = vmatpush3.bf16.msra.mxu0 %v4611_v4 }
 0x115   :  { %v843_v14 = vld [vmem:[#allocation2 + $0xf2] ss:$2 sm:$0xff]  ;;  %v670_v16 = vpack.c.bf16 %v653_v9, %v651_v13  ;;  %v4504_v21 = vpop.f32.mrb[28].mxu0  ;;  %4406 = vmatprep.subr.bf16.mxu0 %v4612_v7 }
 0x116   :  { %v605_v15 = vld [vmem:[#allocation2 + $0xf0] ss:$2 sm:$0xff]  ;;  %v862_v17 = vpack.c.bf16 %v845_v10, %v843_v14  ;;  %vm437_vm13 = vcmp.ge.f32.partialorder %v4504_v21, 0.0  ;;  %v473_v23 = vmul.f32 0.2, %v4504_v21  ;;  %v376_v24 = vpop.f32.mrb[29].mxu0 }
 0x117   :  { %v622_v18 = vpack.c.bf16 %v605_v15, %v603_v11  ;;  %v797_v20 = vld [vmem:[#allocation2 + $0xf2] ss:$2 sm:$0xff]  ;;  %1610 = vmatprep.mubr.bf16.mxu0 %v670_v16  ;;  %vm435_vm14 = vcmp.ge.f32.partialorder %v376_v24, 0.0  ;;  %v471_v25 = vmul.f32 0.2, %v376_v24  ;;  %v4505_v26 = vpop.f32.mrb[30].mxu0 }
 0x118   :  { %v814_v22 = vpack.c.bf16 %v797_v20, %v795_v19  ;;  %1804 = vmatprep.mubr.bf16.mxu1 %v862_v17  ;;  %v509_v27 = vsel %vm437_vm13, %v4504_v21, %v473_v23  ;;  %vm438_vm15 = vcmp.ge.f32.partialorder %v4505_v26, 0.0  ;;  %v474_v28 = vmul.f32 0.2, %v4505_v26  ;;  %v379_v29 = vpop.f32.mrb[31].mxu0  ;;  %v607_v35 = vld [vmem:[#allocation2 + $0x108] ss:$2 sm:$0xff] }
 0x119   :  { %1611 = vmatmul.mubr.bf16.gmra.mrb[52].mxu0 %v622_v18  ;;  %581 = vst [vmem:[#allocation2 + $0x169] sm:$0xff] %v509_v27  ;;  %v507_v30 = vsel %vm435_vm14, %v376_v24, %v471_v25  ;;  %vm436_vm0 = vcmp.ge.f32.partialorder %v379_v29, 0.0  ;;  %v472_v31 = vmul.f32 0.2, %v379_v29  ;;  %v799_v43 = vld [vmem:[#allocation2 + $0x10a] ss:$2 sm:$0xff] }
 0x11a   :  { %1805 = vmatmul.mubr.bf16.gmra.mrb[16].mxu1 %v814_v22  ;;  %579 = vst [vmem:[#allocation2 + $0x151] sm:$0xff] %v507_v30  ;;  %v510_v32 = vsel %vm438_vm15, %v4505_v26, %v474_v28  ;;  %v657_v33 = vld [vmem:[#allocation2 + $0x138] ss:$2 sm:$0xff]  ;;  %v731_v19 = vld [vmem:[#allocation2 + $0x19] ss:$2 sm:$0xff]  ;;  %v4614_v27 = vld [vmem:[%s6033_s2 + $0x1c8] sm:$0xff]  }
 0x11b   :  { %v849_v34 = vld [vmem:[#allocation2 + $0x13a] ss:$2 sm:$0xff]  ;;  %582 = vst [vmem:[#allocation2 + $0x171] sm:$0xff] %v510_v32  ;;  %v508_v36 = vsel %vm436_vm0, %v379_v29, %v472_v31  ;;  %v762_v20 = vpack.c.bf16 %v733_v6, %v731_v19  ;;  %v683_v21 = vld [vmem:[#allocation2 + $0x1] ss:$2 sm:$0xff]  ;;  %v4616_v30 = vld [vmem:[%s6033_s2 + $0x1d0] sm:$0xff]  }
 0x11c   :  { %v655_v37 = vld [vmem:[#allocation2 + $0x120] ss:$2 sm:$0xff]  ;;  %580 = vst [vmem:[#allocation2 + $0x159] sm:$0xff] %v508_v36  ;;  %v685_v22 = vld [vmem:[#allocation2 + $0x19] ss:$2 sm:$0xff] }
 0x11d   :  { %v847_v38 = vld [vmem:[#allocation2 + $0x122] ss:$2 sm:$0xff]  ;;  %v671_v40 = vpack.c.bf16 %v657_v33, %v655_v37  ;;  %v4508_v45 = vpop.f32.mrb[32].mxu0  ;;  %v737_v23 = vld [vmem:[#allocation2 + $0x61] ss:$2 sm:$0xff]  ;;  %v714_v25 = vpack.c.bf16 %v685_v22, %v683_v21  ;;  %v4618_v37 = vld [vmem:[%s6033_s2 + $0x1d8] sm:$0xff]  }
 0x11e   :  { %v609_v39 = vld [vmem:[#allocation2 + $0x120] ss:$2 sm:$0xff]  ;;  %v863_v41 = vpack.c.bf16 %v849_v34, %v847_v38  ;;  %vm441_vm1 = vcmp.ge.f32.partialorder %v4508_v45, 0.0  ;;  %v477_v47 = vmul.f32 0.2, %v4508_v45  ;;  %v392_v48 = vpop.f32.mrb[33].mxu0 }
 0x11f   :  { %v623_v42 = vpack.c.bf16 %v609_v39, %v607_v35  ;;  %v801_v44 = vld [vmem:[#allocation2 + $0x122] ss:$2 sm:$0xff]  ;;  %1618 = vmatprep.mubr.bf16.mxu0 %v671_v40  ;;  %vm439_vm2 = vcmp.ge.f32.partialorder %v392_v48, 0.0  ;;  %v475_v49 = vmul.f32 0.2, %v392_v48  ;;  %v4509_v50 = vpop.f32.mrb[34].mxu0 }
 0x120   :  { %v815_v46 = vpack.c.bf16 %v801_v44, %v799_v43  ;;  %1812 = vmatprep.mubr.bf16.mxu1 %v863_v41  ;;  %v513_v51 = vsel %vm441_vm1, %v4508_v45, %v477_v47  ;;  %vm442_vm3 = vcmp.ge.f32.partialorder %v4509_v50, 0.0  ;;  %v478_v52 = vmul.f32 0.2, %v4509_v50  ;;  %v395_v53 = vpop.f32.mrb[35].mxu0  ;;  %v611_v59 = vld [vmem:[#allocation2 + $0x138] ss:$2 sm:$0xff] }
 0x121   :  { %1619 = vmatmul.mubr.bf16.gmra.mrb[56].mxu0 %v623_v42  ;;  %585 = vst [vmem:[#allocation2 + $0x199] sm:$0xff] %v513_v51  ;;  %v511_v54 = vsel %vm439_vm2, %v392_v48, %v475_v49  ;;  %vm440_vm4 = vcmp.ge.f32.partialorder %v395_v53, 0.0  ;;  %v476_v55 = vmul.f32 0.2, %v395_v53  ;;  %v803_v3 = vld [vmem:[#allocation2 + $0x13a] ss:$2 sm:$0xff] }
 0x122   :  { %1813 = vmatmul.mubr.bf16.gmra.mrb[20].mxu1 %v815_v46  ;;  %583 = vst [vmem:[#allocation2 + $0x181] sm:$0xff] %v511_v54  ;;  %v514_v56 = vsel %vm442_vm3, %v4509_v50, %v478_v52  ;;  %v661_v57 = vld [vmem:[#allocation2 + $0x168] ss:$2 sm:$0xff]  ;;  %v4613_v24 = vld [vmem:[%s6033_s2 + $0x180] sm:$0xff]   ;;  %v735_v26 = vld [vmem:[#allocation2 + $0x49] ss:$2 sm:$0xff] }
 0x123   :  { %v853_v58 = vld [vmem:[#allocation2 + $0x16a] ss:$2 sm:$0xff]  ;;  %586 = vst [vmem:[#allocation2 + $0x1a1] sm:$0xff] %v514_v56  ;;  %v512_v60 = vsel %vm440_vm4, %v395_v53, %v476_v55  ;;  %v763_v28 = vpack.c.bf16 %v737_v23, %v735_v26  ;;  %v687_v31 = vld [vmem:[#allocation2 + $0x31] ss:$2 sm:$0xff]  ;;  %v4620_v40 = vld [vmem:[%s6033_s2 + $0x1e0] sm:$0xff]  }
 0x124   :  { %v659_v61 = vld [vmem:[#allocation2 + $0x150] ss:$2 sm:$0xff]  ;;  %584 = vst [vmem:[#allocation2 + $0x189] sm:$0xff] %v512_v60  ;;  %v4615_v29 = vld [vmem:[%s6033_s2 + $0x188] sm:$0xff]   ;;  %v741_v33 = vld [vmem:[#allocation2 + $0x91] ss:$2 sm:$0xff] }
 0x125   :  { %v851_v62 = vld [vmem:[#allocation2 + $0x152] ss:$2 sm:$0xff]  ;;  %v672_v0 = vpack.c.bf16 %v661_v57, %v659_v61  ;;  %v689_v32 = vld [vmem:[#allocation2 + $0x49] ss:$2 sm:$0xff]  ;;  %v739_v36 = vld [vmem:[#allocation2 + $0x79] ss:$2 sm:$0xff] }
 0x126   :  { %v613_v63 = vld [vmem:[#allocation2 + $0x150] ss:$2 sm:$0xff]  ;;  %v864_v1 = vpack.c.bf16 %v853_v58, %v851_v62  ;;  %v715_v35 = vpack.c.bf16 %v689_v32, %v687_v31  ;;  %v764_v38 = vpack.c.bf16 %v741_v33, %v739_v36  ;;  %v691_v41 = vld [vmem:[#allocation2 + $0x61] ss:$2 sm:$0xff]  ;;  %v695_v51 = vld [vmem:[#allocation2 + $0x91] ss:$2 sm:$0xff] }
 0x127   :  { %v624_v2 = vpack.c.bf16 %v613_v63, %v611_v59  ;;  %v805_v4 = vld [vmem:[#allocation2 + $0x152] ss:$2 sm:$0xff]  ;;  %1626 = vmatprep.mubr.bf16.mxu0 %v672_v0  ;;  %v693_v42 = vld [vmem:[#allocation2 + $0x79] ss:$2 sm:$0xff]  ;;  %v743_v46 = vld [vmem:[#allocation2 + $0xa9] ss:$2 sm:$0xff] }
 0x128   :  { %v816_v5 = vpack.c.bf16 %v805_v4, %v803_v3  ;;  %1820 = vmatprep.mubr.bf16.mxu1 %v864_v1  ;;  %v615_v9 = vld [vmem:[#allocation2 + $0x168] ss:$2 sm:$0xff]  ;;  %v4619_v39 = vld [vmem:[%s6033_s2 + $0x198] sm:$0xff]   ;;  %v745_v43 = vld [vmem:[#allocation2 + $0xc1] ss:$2 sm:$0xff]  ;;  %v716_v45 = vpack.c.bf16 %v693_v42, %v691_v41 }
 0x129   :  { %1627 = vmatmul.mubr.bf16.gmra.mrb[60].mxu0 %v624_v2  ;;  %v807_v16 = vld [vmem:[#allocation2 + $0x16a] ss:$2 sm:$0xff]  ;;  %v4621_v44 = vld [vmem:[%s6033_s2 + $0x1a0] sm:$0xff]   ;;  %v765_v48 = vpack.c.bf16 %v745_v43, %v743_v46  ;;  %v697_v52 = vld [vmem:[#allocation2 + $0xa9] ss:$2 sm:$0xff] }
 0x12a   :  { %1821 = vmatmul.mubr.bf16.gmra.mrb[24].mxu1 %v816_v5  ;;  %v665_v7 = vld [vmem:[#allocation2 + $0x198] ss:$2 sm:$0xff]  ;;  %v4617_v34 = vld [vmem:[%s6033_s2 + $0x190] sm:$0xff]   ;;  %v4622_v47 = vld [vmem:[%s6033_s2 + $0x1e8] sm:$0xff]   ;;  %v717_v56 = vpack.c.bf16 %v697_v52, %v695_v51 }
 0x12b   :  { %v857_v8 = vld [vmem:[#allocation2 + $0x19a] ss:$2 sm:$0xff]  ;;  %v4624_v50 = vld [vmem:[%s6033_s2 + $0x1f0] sm:$0xff]   ;;  %v751_v61 = vld [vmem:[#allocation2 + $0x121] ss:$2 sm:$0xff] }
 0x12c   :  { %v663_v10 = vld [vmem:[#allocation2 + $0x180] ss:$2 sm:$0xff]  ;;  %v747_v53 = vld [vmem:[#allocation2 + $0xf1] ss:$2 sm:$0xff]  ;;  %v705_v2 = vld [vmem:[#allocation2 + $0x121] ss:$2 sm:$0xff] }
 0x12d   :  { %v855_v11 = vld [vmem:[#allocation2 + $0x182] ss:$2 sm:$0xff]  ;;  %v673_v13 = vpack.c.bf16 %v665_v7, %v663_v10  ;;  %v749_v54 = vld [vmem:[#allocation2 + $0x109] ss:$2 sm:$0xff]  ;;  %v4626_v57 = vld [vmem:[%s6033_s2 + $0x1f8] sm:$0xff]  }
 0x12e   :  { %v617_v12 = vld [vmem:[#allocation2 + $0x180] ss:$2 sm:$0xff]  ;;  %v865_v14 = vpack.c.bf16 %v857_v8, %v855_v11  ;;  %v4625_v55 = vld [vmem:[%s6033_s2 + $0x1b0] sm:$0xff]   ;;  %v766_v58 = vpack.c.bf16 %v749_v54, %v747_v53  ;;  %v4627_v59 = vld [vmem:[%s6033_s2 + $0x1b8] sm:$0xff]  }
 0x12f   :  { %v625_v15 = vpack.c.bf16 %v617_v12, %v615_v9  ;;  %v809_v17 = vld [vmem:[#allocation2 + $0x182] ss:$2 sm:$0xff]  ;;  %1634 = vmatprep.mubr.bf16.mxu0 %v673_v13  ;;  %v701_v60 = vld [vmem:[#allocation2 + $0xf1] ss:$2 sm:$0xff]  ;;  %v759_v9 = vld [vmem:[#allocation2 + $0x181] ss:$2 sm:$0xff] }
 0x130   :  { %v817_v18 = vpack.c.bf16 %v809_v17, %v807_v16  ;;  %1828 = vmatprep.mubr.bf16.mxu1 %v865_v14  ;;  %v4623_v49 = vld [vmem:[%s6033_s2 + $0x1a8] sm:$0xff]   ;;  %v753_v62 = vld [vmem:[#allocation2 + $0x139] ss:$2 sm:$0xff] }
 0x131   :  { %1635 = vmatmul.mubr.bf16.gmra.mrb[64].mxu0 %v625_v15  ;;  %v699_v63 = vld [vmem:[#allocation2 + $0xd9] ss:$2 sm:$0xff]  ;;  %v767_v1 = vpack.c.bf16 %v753_v62, %v751_v61  ;;  %v757_v4 = vld [vmem:[#allocation2 + $0x169] ss:$2 sm:$0xff] }
 0x132   :  { %1829 = vmatmul.mubr.bf16.gmra.mrb[28].mxu1 %v817_v18  ;;  %1675 = vmatprep.mubr.bf16.mxu0 %v762_v20  ;;  %v718_v0 = vpack.c.bf16 %v701_v60, %v699_v63  ;;  %v755_v3 = vld [vmem:[#allocation2 + $0x151] ss:$2 sm:$0xff]  ;;  %v713_v14 = vld [vmem:[#allocation2 + $0x181] ss:$2 sm:$0xff] }
 0x133   :  { %v703_v5 = vld [vmem:[#allocation2 + $0x109] ss:$2 sm:$0xff]  ;;  %v768_v7 = vpack.c.bf16 %v757_v4, %v755_v3  ;;  %v761_v10 = vld [vmem:[#allocation2 + $0x199] ss:$2 sm:$0xff] }
 0x134   :  { %v719_v6 = vpack.c.bf16 %v705_v2, %v703_v5  ;;  %v709_v8 = vld [vmem:[#allocation2 + $0x151] ss:$2 sm:$0xff]  ;;  %v769_v13 = vpack.c.bf16 %v761_v10, %v759_v9 }
 0x135   :  { %v707_v11 = vld [vmem:[#allocation2 + $0x139] ss:$2 sm:$0xff]  ;;  %v711_v16 = vld [vmem:[#allocation2 + $0x169] ss:$2 sm:$0xff] }
 0x136   :  { %v720_v12 = vpack.c.bf16 %v709_v8, %v707_v11  ;;  %v925_v15 = vld [vmem:[#allocation2 + $0x33] ss:$2 sm:$0xff]  ;;  %v721_v17 = vpack.c.bf16 %v713_v14, %v711_v16  ;;  %v875_v20 = vld [vmem:[#allocation2 + $0x3] ss:$2 sm:$0xff] }
 0x137   :  { %v923_v18 = vld [vmem:[#allocation2 + $0x1b] ss:$2 sm:$0xff]  ;;  %v935_v36 = vld [vmem:[#allocation2 + $0xab] ss:$2 sm:$0xff] }
 0x138   :  { %v954_v19 = vpack.c.bf16 %v925_v15, %v923_v18  ;;  %v877_v21 = vld [vmem:[#allocation2 + $0x1b] ss:$2 sm:$0xff]  ;;  %v941_v41 = vld [vmem:[#allocation2 + $0x10b] ss:$2 sm:$0xff] }
 0x139   :  { %1676 = vmatmul.mubr.bf16.vlgmr.msra.gmra.mrb[68].mxu0 %v714_v25  ;;  %v929_v22 = vld [vmem:[#allocation2 + $0x63] ss:$2 sm:$0xff]  ;;  %v906_v23 = vpack.c.bf16 %v877_v21, %v875_v20  ;;  %v879_v26 = vld [vmem:[#allocation2 + $0x33] ss:$2 sm:$0xff] }
 0x13a   :  { %4407 = vmatpush3.bf16.msra.mxu0 %v4613_v24  ;;  %1683 = vmatprep.mubr.bf16.mxu0 %v763_v28  ;;  %v927_v24 = vld [vmem:[#allocation2 + $0x4b] ss:$2 sm:$0xff]  ;;  %v885_v33 = vld [vmem:[#allocation2 + $0x7b] ss:$2 sm:$0xff] }
 0x13b   :  { %4408 = vmatprep.subr.bf16.mxu0 %v4614_v27  ;;  %v955_v25 = vpack.c.bf16 %v929_v22, %v927_v24  ;;  %v881_v27 = vld [vmem:[#allocation2 + $0x4b] ss:$2 sm:$0xff]  ;;  %v945_v46 = vld [vmem:[#allocation2 + $0x13b] ss:$2 sm:$0xff] }
 0x13c   :  { %v933_v28 = vld [vmem:[#allocation2 + $0x93] ss:$2 sm:$0xff]  ;;  %v883_v32 = vld [vmem:[#allocation2 + $0x63] ss:$2 sm:$0xff] }
 0x13d   :  { %v947_v51 = vld [vmem:[#allocation2 + $0x153] ss:$2 sm:$0xff]  ;;  %v905_v62 = vld [vmem:[#allocation2 + $0x183] ss:$2 sm:$0xff] }
 0x13e   :  { %4409 = vmatpush3.bf16.msra.mxu0 %v4615_v29  ;;  %v907_v29 = vpack.c.bf16 %v881_v27, %v879_v26  ;;  %v949_v52 = vld [vmem:[#allocation2 + $0x16b] ss:$2 sm:$0xff] }
 0x13f   :  { %4410 = vmatprep.subr.bf16.mxu0 %v4616_v30  ;;  %v931_v30 = vld [vmem:[#allocation2 + $0x7b] ss:$2 sm:$0xff]  ;;  %v895_v53 = vld [vmem:[#allocation2 + $0x10b] ss:$2 sm:$0xff] }
 0x140   :  { %v956_v31 = vpack.c.bf16 %v933_v28, %v931_v30  ;;  %v903_v63 = vld [vmem:[#allocation2 + $0x16b] ss:$2 sm:$0xff] }
 0x141   :  { %1684 = vmatmul.mubr.bf16.gmra.mrb[72].mxu0 %v715_v35  ;;  %v908_v35 = vpack.c.bf16 %v885_v33, %v883_v32 }
 0x142   :  { %1691 = vmatprep.mubr.bf16.mxu0 %v764_v38  ;;  %4411 = vmatpush3.bf16.msra.mxu0 %v4617_v34  ;;  %v937_v34 = vld [vmem:[#allocation2 + $0xc3] ss:$2 sm:$0xff]  ;;  %v887_v38 = vld [vmem:[#allocation2 + $0x93] ss:$2 sm:$0xff] }
 0x143   :  { %4412 = vmatprep.subr.bf16.mxu0 %v4618_v37  ;;  %v957_v37 = vpack.c.bf16 %v937_v34, %v935_v36 }
 0x146   :  { %4413 = vmatpush3.bf16.msra.mxu0 %v4619_v39  ;;  %v889_v39 = vld [vmem:[#allocation2 + $0xab] ss:$2 sm:$0xff] }
 0x147   :  { %4414 = vmatprep.subr.bf16.mxu0 %v4620_v40  ;;  %v939_v40 = vld [vmem:[#allocation2 + $0xf3] ss:$2 sm:$0xff]  ;;  %v909_v42 = vpack.c.bf16 %v889_v39, %v887_v38 }
 0x148   :  { %v958_v43 = vpack.c.bf16 %v941_v41, %v939_v40 }
 0x149   :  { %1692 = vmatmul.mubr.bf16.gmra.mrb[76].mxu0 %v716_v45  ;;  %v943_v45 = vld [vmem:[#allocation2 + $0x123] ss:$2 sm:$0xff] }
 0x14a   :  { %1699 = vmatprep.mubr.bf16.mxu0 %v765_v48  ;;  %4415 = vmatpush3.bf16.msra.mxu0 %v4621_v44  ;;  %v893_v44 = vld [vmem:[#allocation2 + $0xf3] ss:$2 sm:$0xff] }
 0x14b   :  { %4416 = vmatprep.subr.bf16.mxu0 %v4622_v47  ;;  %v891_v47 = vld [vmem:[#allocation2 + $0xdb] ss:$2 sm:$0xff] }
 0x14c   :  { %v910_v48 = vpack.c.bf16 %v893_v44, %v891_v47 }
 0x14e   :  { %4417 = vmatpush3.bf16.msra.mxu0 %v4623_v49  ;;  %v959_v49 = vpack.c.bf16 %v945_v46, %v943_v45 }
 0x14f   :  { %4418 = vmatprep.subr.bf16.mxu0 %v4624_v50  ;;  %v897_v50 = vld [vmem:[#allocation2 + $0x123] ss:$2 sm:$0xff] }
 0x150   :  { %v911_v54 = vpack.c.bf16 %v897_v50, %v895_v53 }
 0x151   :  { %1700 = vmatmul.mubr.bf16.gmra.mrb[80].mxu0 %v717_v56  ;;  %v901_v56 = vld [vmem:[#allocation2 + $0x153] ss:$2 sm:$0xff] }
 0x152   :  { %1707 = vmatprep.mubr.bf16.mxu0 %v766_v58  ;;  %4419 = vmatpush3.bf16.msra.mxu0 %v4625_v55  ;;  %v960_v55 = vpack.c.bf16 %v949_v52, %v947_v51  ;;  %v953_v58 = vld [vmem:[#allocation2 + $0x19b] ss:$2 sm:$0xff] }
 0x153   :  { %4420 = vmatprep.subr.bf16.mxu0 %v4626_v57  ;;  %v951_v57 = vld [vmem:[#allocation2 + $0x183] ss:$2 sm:$0xff] }
 0x154   :  { %v961_v61 = vpack.c.bf16 %v953_v58, %v951_v57 }
 0x156   :  { %4421 = vmatpush3.bf16.msra.mxu0 %v4627_v59  ;;  %v899_v59 = vld [vmem:[#allocation2 + $0x13b] ss:$2 sm:$0xff] }
 0x157   :  { %v912_v60 = vpack.c.bf16 %v901_v56, %v899_v59 }
 0x159   :  { %1708 = vmatmul.mubr.bf16.gmra.mrb[84].mxu0 %v718_v0  ;;  %v913_v0 = vpack.c.bf16 %v905_v62, %v903_v63 }
 0x15a   :  { %1715 = vmatprep.mubr.bf16.mxu0 %v767_v1 }
 0x161   :  { %1716 = vmatmul.mubr.bf16.gmra.mrb[88].mxu0 %v719_v6 }
 0x162   :  { %1723 = vmatprep.mubr.bf16.mxu0 %v768_v7 }
 0x169   :  { %1724 = vmatmul.mubr.bf16.gmra.mrb[92].mxu0 %v720_v12 }
 0x16a   :  { %1731 = vmatprep.mubr.bf16.mxu0 %v769_v13 }
 0x171   :  { %1732 = vmatmul.mubr.bf16.gmra.mrb[96].mxu0 %v721_v17 }
 0x172   :  { %1869 = vmatprep.mubr.bf16.mxu0 %v954_v19 }
 0x179   :  { %1870 = vmatmul.mubr.bf16.vlgmr.msra.gmra.mrb[100].mxu0 %v906_v23 }
 0x17a   :  { %1877 = vmatprep.mubr.bf16.mxu0 %v955_v25 }
 0x181   :  { %1878 = vmatmul.mubr.bf16.gmra.mrb[104].mxu0 %v907_v29 }
 0x182   :  { %1885 = vmatprep.mubr.bf16.mxu0 %v956_v31 }
 0x189   :  { %1886 = vmatmul.mubr.bf16.gmra.mrb[108].mxu0 %v908_v35 }
 0x18a   :  { %1893 = vmatprep.mubr.bf16.mxu0 %v957_v37 }
 0x191   :  { %1894 = vmatmul.mubr.bf16.gmra.mrb[112].mxu0 %v909_v42 }
 0x192   :  { %1901 = vmatprep.mubr.bf16.mxu0 %v958_v43 }
 0x199   :  { %1902 = vmatmul.mubr.bf16.gmra.mrb[116].mxu0 %v910_v48 }
 0x19a   :  { %1909 = vmatprep.mubr.bf16.mxu0 %v959_v49 }
 0x1a1   :  { %1910 = vmatmul.mubr.bf16.gmra.mrb[120].mxu0 %v911_v54 }
 0x1a2   :  { %1917 = vmatprep.mubr.bf16.mxu0 %v960_v55 }
 0x1a9   :  { %1918 = vmatmul.mubr.bf16.gmra.mrb[124].mxu0 %v912_v60 }
 0x1aa   :  { %1925 = vmatprep.mubr.bf16.mxu0 %v961_v61 }
 0x1b1   :  { %1926 = vmatmul.mubr.bf16.gmra.mrb[128].mxu0 %v913_v0 }
 0x1ca   :  { %v4230_v1 = vpop.f32.mrb[36].mxu0 }
 0x1cb   :  { %v4358_v2 = vpop.f32.mrb[0].mxu1  ;;  %v4231_v3 = vpop.f32.mrb[37].mxu0 }
 0x1cc   :  { %v4359_v4 = vpop.f32.mrb[1].mxu1  ;;  %v5176_v5 = vadd.f32 %v4231_v3, %v4230_v1  ;;  %v4233_v7 = vpop.f32.mrb[38].mxu0 }
 0x1cd   :  { %v5178_v6 = vadd.f32 %v4359_v4, %v4358_v2  ;;  %v4361_v8 = vpop.f32.mrb[2].mxu1  ;;  %v4234_v9 = vpop.f32.mrb[39].mxu0 }
 0x1ce   :  { %v4362_v10 = vpop.f32.mrb[3].mxu1  ;;  %v5180_v11 = vadd.f32 %v4234_v9, %v4233_v7 }
 0x1cf   :  { %v5182_v12 = vadd.f32 %v4362_v10, %v4361_v8 }
 0x1d2   :  { %v4236_v13 = vpop.f32.mrb[40].mxu0 }
 0x1d3   :  { %v4364_v14 = vpop.f32.mrb[4].mxu1  ;;  %v4237_v15 = vpop.f32.mrb[41].mxu0 }
 0x1d4   :  { %v4365_v16 = vpop.f32.mrb[5].mxu1  ;;  %v5184_v17 = vadd.f32 %v4237_v15, %v4236_v13  ;;  %v4239_v19 = vpop.f32.mrb[42].mxu0 }
 0x1d5   :  { %v5186_v18 = vadd.f32 %v4365_v16, %v4364_v14  ;;  %v4367_v20 = vpop.f32.mrb[6].mxu1  ;;  %v4240_v21 = vpop.f32.mrb[43].mxu0 }
 0x1d6   :  { %v4368_v22 = vpop.f32.mrb[7].mxu1  ;;  %v5188_v23 = vadd.f32 %v4240_v21, %v4239_v19 }
 0x1d7   :  { %v5190_v24 = vadd.f32 %v4368_v22, %v4367_v20 }
 0x1da   :  { %v4242_v25 = vpop.f32.mrb[44].mxu0 }
 0x1db   :  { %v4370_v26 = vpop.f32.mrb[8].mxu1  ;;  %v4243_v27 = vpop.f32.mrb[45].mxu0 }
 0x1dc   :  { %v4371_v28 = vpop.f32.mrb[9].mxu1  ;;  %v5192_v29 = vadd.f32 %v4243_v27, %v4242_v25  ;;  %v4245_v31 = vpop.f32.mrb[46].mxu0 }
 0x1dd   :  { %v5194_v30 = vadd.f32 %v4371_v28, %v4370_v26  ;;  %v4373_v32 = vpop.f32.mrb[10].mxu1  ;;  %v4246_v33 = vpop.f32.mrb[47].mxu0 }
 0x1de   :  { %v4374_v34 = vpop.f32.mrb[11].mxu1  ;;  %v5196_v35 = vadd.f32 %v4246_v33, %v4245_v31 }
 0x1df   :  { %v5198_v36 = vadd.f32 %v4374_v34, %v4373_v32 }
 0x1e2   :  { %v4248_v37 = vpop.f32.mrb[48].mxu0 }
 0x1e3   :  { %v4376_v38 = vpop.f32.mrb[12].mxu1  ;;  %v4249_v39 = vpop.f32.mrb[49].mxu0 }
 0x1e4   :  { %v4377_v40 = vpop.f32.mrb[13].mxu1  ;;  %v5200_v41 = vadd.f32 %v4249_v39, %v4248_v37  ;;  %v4251_v43 = vpop.f32.mrb[50].mxu0 }
 0x1e5   :  { %v5202_v42 = vadd.f32 %v4377_v40, %v4376_v38  ;;  %v4379_v44 = vpop.f32.mrb[14].mxu1  ;;  %v4252_v45 = vpop.f32.mrb[51].mxu0 }
 0x1e6   :  { %v4380_v46 = vpop.f32.mrb[15].mxu1  ;;  %v5204_v47 = vadd.f32 %v4252_v45, %v4251_v43  ;;  %v4628_v45 = vld [vmem:[%s6034_s3 + $0x100] ss:$8 sps:$4 sm:$0xff]  }
 0x1e7   :  { %v5206_v48 = vadd.f32 %v4380_v46, %v4379_v44 }
 0x1ec   :  { %v4254_v49 = vpop.f32.mrb[52].mxu0 }
 0x1ed   :  { %v4382_v50 = vpop.f32.mrb[16].mxu1  ;;  %v4255_v51 = vpop.f32.mrb[53].mxu0 }
 0x1ee   :  { %v4383_v52 = vpop.f32.mrb[17].mxu1  ;;  %v5208_v53 = vadd.f32 %v4255_v51, %v4254_v49  ;;  %v4257_v55 = vpop.f32.mrb[54].mxu0 }
 0x1ef   :  { %v5210_v54 = vadd.f32 %v4383_v52, %v4382_v50  ;;  %v4385_v56 = vpop.f32.mrb[18].mxu1  ;;  %v4258_v57 = vpop.f32.mrb[55].mxu0  ;;  %v4630_v50 = vld [vmem:[%s6034_s3 + $0x104] ss:$8 sps:$4 sm:$0xff]   ;;  %v4631_v52 = vld [vmem:[%s6034_s3] ss:$8 sps:$4 sm:$0xff]  }
 0x1f0   :  { %v4386_v58 = vpop.f32.mrb[19].mxu1  ;;  %v5212_v59 = vadd.f32 %v4258_v57, %v4257_v55  ;;  %3419 = vmatprep.subr.bf16.mxu1 %v4630_v50  ;;  %v4633_v55 = vld [vmem:[%s6034_s3 + $0x4] ss:$8 sps:$4 sm:$0xff]  }
 0x1f1   :  { %v5214_v60 = vadd.f32 %v4386_v58, %v4385_v56  ;;  %3420 = vmatpush1.bf16.msra.mxu1 %v4628_v45  ;;  %3366 = vmatprep.subr.bf16.mxu0 %v4633_v55  ;;  %v4649_v45 = vld [vmem:[%s6034_s3 + $0x30] ss:$8 sps:$4 sm:$0xff]  }
 0x1f2   :  { %3367 = vmatpush1.bf16.msra.mxu0 %v4631_v52  ;;  %v4654_v52 = vld [vmem:[%s6034_s3 + $0x144] ss:$8 sps:$4 sm:$0xff]  }
 0x1f4   :  { %v4260_v61 = vpop.f32.mrb[56].mxu0 }
 0x1f5   :  { %v4388_v62 = vpop.f32.mrb[20].mxu1  ;;  %v4261_v63 = vpop.f32.mrb[57].mxu0 }
 0x1f6   :  { %v4389_v0 = vpop.f32.mrb[21].mxu1  ;;  %v5216_v1 = vadd.f32 %v4261_v63, %v4260_v61  ;;  %v4263_v3 = vpop.f32.mrb[58].mxu0 }
 0x1f7   :  { %v5218_v2 = vadd.f32 %v4389_v0, %v4388_v62  ;;  %v4391_v4 = vpop.f32.mrb[22].mxu1  ;;  %v4264_v7 = vpop.f32.mrb[59].mxu0 }
 0x1f8   :  { %v4392_v8 = vpop.f32.mrb[23].mxu1  ;;  %v5220_v9 = vadd.f32 %v4264_v7, %v4263_v3 }
 0x1f9   :  { %v5222_v10 = vadd.f32 %v4392_v8, %v4391_v4 }
 0x1fc   :  { %v4266_v13 = vpop.f32.mrb[60].mxu0 }
 0x1fd   :  { %v4394_v14 = vpop.f32.mrb[24].mxu1  ;;  %v4267_v15 = vpop.f32.mrb[61].mxu0 }
 0x1fe   :  { %v4395_v16 = vpop.f32.mrb[25].mxu1  ;;  %v5224_v19 = vadd.f32 %v4267_v15, %v4266_v13  ;;  %v4269_v21 = vpop.f32.mrb[62].mxu0  ;;  %v4636_v13 = vld [vmem:[%s6034_s3 + $0x114] ss:$8 sps:$4 sm:$0xff]  }
 0x1ff   :  { %v5226_v20 = vadd.f32 %v4395_v16, %v4394_v14  ;;  %v4397_v22 = vpop.f32.mrb[26].mxu1  ;;  %v4270_v25 = vpop.f32.mrb[63].mxu0  ;;  %3421 = vmatprep.subr.bf16.mxu1 %v4636_v13  ;;  %v4661_v13 = vld [vmem:[%s6034_s3 + $0x50] ss:$8 sps:$4 sm:$0xff]  }
 0x200   :  { %v4398_v26 = vpop.f32.mrb[27].mxu1  ;;  %v5228_v27 = vadd.f32 %v4270_v25, %v4269_v21 }
 0x201   :  { %v5230_v28 = vadd.f32 %v4398_v26, %v4397_v22  ;;  %v4642_v22 = vld [vmem:[%s6034_s3 + $0x124] ss:$8 sps:$4 sm:$0xff]  }
 0x204   :  { %v4272_v31 = vpop.f32.mrb[64].mxu0 }
 0x205   :  { %v4400_v32 = vpop.f32.mrb[28].mxu1  ;;  %v4273_v33 = vpop.f32.mrb[65].mxu0 }
 0x206   :  { %v4401_v34 = vpop.f32.mrb[29].mxu1  ;;  %v5232_v37 = vadd.f32 %v4273_v33, %v4272_v31  ;;  %v4275_v39 = vpop.f32.mrb[66].mxu0  ;;  %v4640_v31 = vld [vmem:[%s6034_s3 + $0x120] ss:$8 sps:$4 sm:$0xff]  }
 0x207   :  { %v5234_v38 = vadd.f32 %v4401_v34, %v4400_v32  ;;  %v4403_v40 = vpop.f32.mrb[30].mxu1  ;;  %v4276_v43 = vpop.f32.mrb[67].mxu0  ;;  %v4643_v32 = vld [vmem:[%s6034_s3 + $0x20] ss:$8 sps:$4 sm:$0xff]  }
 0x208   :  { %v4404_v44 = vpop.f32.mrb[31].mxu1  ;;  %v5239_v46 = vadd.f32 %v4276_v43, %v4275_v39  ;;  %v4646_v43 = vld [vmem:[%s6034_s3 + $0x130] ss:$8 sps:$4 sm:$0xff]  }
 0x209   :  { %v5241_v49 = vadd.f32 %v4404_v44, %v4403_v40  ;;  %v4651_v44 = vld [vmem:[%s6034_s3 + $0x34] ss:$8 sps:$4 sm:$0xff]  }
 0x20c   :  { %v4294_v51 = vpop.f32.mrb[68].mxu0 }
 0x20d   :  { %v4295_v56 = vpop.f32.mrb[69].mxu0 }
 0x20e   :  { %v4296_v57 = vadd.f32 %v4295_v56, %v4294_v51  ;;  %v4297_v58 = vpop.f32.mrb[70].mxu0 }
 0x20f   :  { %v4298_v61 = vpop.f32.mrb[71].mxu0 }
 0x210   :  { %v1678_v62 = vadd.f32 %v4296_v57, %v5176_v5  ;;  %v4299_v63 = vadd.f32 %v4298_v61, %v4297_v58  ;;  %v4634_v5 = vld [vmem:[%s6034_s3 + $0x110] ss:$8 sps:$4 sm:$0xff]   ;;  %v4652_v57 = vld [vmem:[%s6034_s3 + $0x140] ss:$8 sps:$4 sm:$0xff]  }
 0x211   :  { %3422 = vmatpush1.bf16.msra.mxu1 %v4634_v5  ;;  %v4655_v58 = vld [vmem:[%s6034_s3 + $0x40] ss:$8 sps:$4 sm:$0xff]   ;;  %v4666_v5 = vld [vmem:[%s6034_s3 + $0x164] ss:$8 sps:$4 sm:$0xff]  }
 0x212   :  { %v1681_v0 = vadd.f32 %v4299_v63, %v5180_v11  ;;  %v5255_v3 = vadd.f32 %v5178_v6, %v1678_v62  ;;  %v4639_v6 = vld [vmem:[%s6034_s3 + $0x14] ss:$8 sps:$4 sm:$0xff]   ;;  %3423 = vmatprep.subr.bf16.mxu1 %v4642_v22 }
 0x213   :  { %3368 = vmatprep.subr.bf16.mxu0 %v4639_v6 }
 0x214   :  { %v4300_v4 = vpop.f32.mrb[72].mxu0  ;;  %v5258_v7 = vadd.f32 %v5182_v12, %v1681_v0  ;;  %v4637_v12 = vld [vmem:[%s6034_s3 + $0x10] ss:$8 sps:$4 sm:$0xff]  }
 0x215   :  { %v4301_v8 = vpop.f32.mrb[73].mxu0  ;;  %3369 = vmatpush1.bf16.msra.mxu0 %v4637_v12  ;;  %3424 = vmatpush1.bf16.msra.mxu1 %v4640_v31  ;;  %v4664_v12 = vld [vmem:[%s6034_s3 + $0x160] ss:$8 sps:$4 sm:$0xff]  }
 0x216   :  { %v4302_v14 = vadd.f32 %v4301_v8, %v4300_v4  ;;  %v4303_v15 = vpop.f32.mrb[74].mxu0  ;;  %v4658_v4 = vld [vmem:[%s6034_s3 + $0x150] ss:$8 sps:$4 sm:$0xff]   ;;  %v4663_v8 = vld [vmem:[%s6034_s3 + $0x54] ss:$8 sps:$4 sm:$0xff]  }
 0x217   :  { %v4304_v11 = vpop.f32.mrb[75].mxu0 }
 0x218   :  { %v1686_v16 = vadd.f32 %v4302_v14, %v5184_v17  ;;  %v4305_v21 = vadd.f32 %v4304_v11, %v4303_v15  ;;  %v4645_v17 = vld [vmem:[%s6034_s3 + $0x24] ss:$8 sps:$4 sm:$0xff]  }
 0x219   :  { %3370 = vmatprep.subr.bf16.mxu0 %v4645_v17  ;;  %v4670_v17 = vld [vmem:[%s6034_s3 + $0x170] ss:$8 sps:$4 sm:$0xff]  }
 0x21a   :  { %v1689_v25 = vadd.f32 %v4305_v21, %v5188_v23  ;;  %v5278_v26 = vadd.f32 %v5186_v18, %v1686_v16  ;;  %3371 = vmatpush1.bf16.msra.mxu0 %v4643_v32  ;;  %v4648_v23 = vld [vmem:[%s6034_s3 + $0x134] ss:$8 sps:$4 sm:$0xff]   ;;  %v4667_v16 = vld [vmem:[%s6034_s3 + $0x60] ss:$8 sps:$4 sm:$0xff]  }
 0x21b   :  { %3425 = vmatprep.subr.bf16.mxu1 %v4648_v23  ;;  %3372 = vmatprep.subr.bf16.mxu0 %v4651_v44  ;;  %v4675_v32 = vld [vmem:[%s6034_s3 + $0x74] ss:$8 sps:$4 sm:$0xff]   ;;  %v4676_v44 = vld [vmem:[%s6034_s3 + $0x180] ss:$8 sps:$4 sm:$0xff]  }
 0x21c   :  { %v4306_v33 = vpop.f32.mrb[76].mxu0  ;;  %v5290_v34 = vadd.f32 %v5190_v24, %v1689_v25  ;;  %3426 = vmatpush1.bf16.msra.mxu1 %v4646_v43 }
 0x21d   :  { %v4307_v18 = vpop.f32.mrb[77].mxu0  ;;  %3427 = vmatprep.subr.bf16.mxu1 %v4654_v52 }
 0x21e   :  { %v4308_v39 = vadd.f32 %v4307_v18, %v4306_v33  ;;  %v4309_v40 = vpop.f32.mrb[78].mxu0  ;;  %3373 = vmatpush1.bf16.msra.mxu0 %v4649_v45  ;;  %v4673_v33 = vld [vmem:[%s6034_s3 + $0x70] ss:$8 sps:$4 sm:$0xff]  }
 0x21f   :  { %v4310_v24 = vpop.f32.mrb[79].mxu0 }
 0x220   :  { %v1694_v50 = vadd.f32 %v4308_v39, %v5192_v29  ;;  %v4311_v51 = vadd.f32 %v4310_v24, %v4309_v40  ;;  %v4657_v29 = vld [vmem:[%s6034_s3 + $0x44] ss:$8 sps:$4 sm:$0xff]   ;;  %3428 = vmatpush1.bf16.msra.mxu1 %v4652_v57  ;;  %v4679_v24 = vld [vmem:[%s6034_s3 + $0x80] ss:$8 sps:$4 sm:$0xff]   ;;  %v4687_v57 = vld [vmem:[%s6034_s3 + $0x94] ss:$8 sps:$4 sm:$0xff]  }
 0x221   :  { %3374 = vmatprep.subr.bf16.mxu0 %v4657_v29  ;;  %v4678_v39 = vld [vmem:[%s6034_s3 + $0x184] ss:$8 sps:$4 sm:$0xff]   ;;  %v4685_v29 = vld [vmem:[%s6034_s3 + $0x90] ss:$8 sps:$4 sm:$0xff]  }
 0x222   :  { %v1697_v55 = vadd.f32 %v4311_v51, %v5196_v35  ;;  %v5310_v56 = vadd.f32 %v5194_v30, %v1694_v50  ;;  %3375 = vmatpush1.bf16.msra.mxu0 %v4655_v58  ;;  %v4660_v35 = vld [vmem:[%s6034_s3 + $0x154] ss:$8 sps:$4 sm:$0xff]  }
 0x223   :  { %3429 = vmatprep.subr.bf16.mxu1 %v4660_v35  ;;  %3376 = vmatprep.subr.bf16.mxu0 %v4663_v8  ;;  %v4690_v35 = vld [vmem:[%s6034_s3 + $0x1a4] ss:$8 sps:$4 sm:$0xff]  }
 0x224   :  { %v4312_v61 = vpop.f32.mrb[80].mxu0  ;;  %v5322_v62 = vadd.f32 %v5198_v36, %v1697_v55  ;;  %3430 = vmatpush1.bf16.msra.mxu1 %v4658_v4  ;;  %v4682_v55 = vld [vmem:[%s6034_s3 + $0x190] ss:$8 sps:$4 sm:$0xff]  }
 0x225   :  { %v4313_v30 = vpop.f32.mrb[81].mxu0  ;;  %3431 = vmatprep.subr.bf16.mxu1 %v4666_v5 }
 0x226   :  { %v4314_v63 = vadd.f32 %v4313_v30, %v4312_v61  ;;  %v4315_v0 = vpop.f32.mrb[82].mxu0  ;;  %3377 = vmatpush1.bf16.msra.mxu0 %v4661_v13  ;;  %v4688_v30 = vld [vmem:[%s6034_s3 + $0x1a0] ss:$8 sps:$4 sm:$0xff]  }
 0x227   :  { %v4316_v36 = vpop.f32.mrb[83].mxu0 }
 0x228   :  { %v1702_v14 = vadd.f32 %v4314_v63, %v5200_v41  ;;  %v4317_v15 = vadd.f32 %v4316_v36, %v4315_v0  ;;  %v4669_v41 = vld [vmem:[%s6034_s3 + $0x64] ss:$8 sps:$4 sm:$0xff]   ;;  %3432 = vmatpush1.bf16.msra.mxu1 %v4664_v12  ;;  %v4691_v63 = vld [vmem:[%s6034_s3 + $0xa0] ss:$8 sps:$4 sm:$0xff]   ;;  %v4696_v0 = vld [vmem:[%s6034_s3 + $0x1b4] ss:$8 sps:$4 sm:$0xff]  }
 0x229   :  { %3378 = vmatprep.subr.bf16.mxu0 %v4669_v41  ;;  %v4699_v36 = vld [vmem:[%s6034_s3 + $0xb4] ss:$8 sps:$4 sm:$0xff]  }
 0x22a   :  { %v1705_v6 = vadd.f32 %v4317_v15, %v5204_v47  ;;  %v5342_v11 = vadd.f32 %v5202_v42, %v1702_v14  ;;  %3379 = vmatpush1.bf16.msra.mxu0 %v4667_v16  ;;  %v4672_v47 = vld [vmem:[%s6034_s3 + $0x174] ss:$8 sps:$4 sm:$0xff]   ;;  %v4694_v15 = vld [vmem:[%s6034_s3 + $0x1b0] ss:$8 sps:$4 sm:$0xff]  }
 0x22b   :  { %3433 = vmatprep.subr.bf16.mxu1 %v4672_v47  ;;  %3380 = vmatprep.subr.bf16.mxu0 %v4675_v32  ;;  %v4703_v47 = vld [vmem:[%s6034_s3 + $0xc0] ss:$8 sps:$4 sm:$0xff]   ;;  %v4706_v32 = vld [vmem:[%s6034_s3 + $0x1d0] ss:$8 sps:$4 sm:$0xff]  }
 0x22c   :  { %v4318_v21 = vpop.f32.mrb[84].mxu0  ;;  %v5354_v22 = vadd.f32 %v5206_v48, %v1705_v6  ;;  %3434 = vmatpush1.bf16.msra.mxu1 %v4670_v17 }
 0x22d   :  { %v4319_v42 = vpop.f32.mrb[85].mxu0  ;;  %3435 = vmatprep.subr.bf16.mxu1 %v4678_v39 }
 0x22e   :  { %v4320_v25 = vadd.f32 %v4319_v42, %v4318_v21  ;;  %v4321_v31 = vpop.f32.mrb[86].mxu0  ;;  %3381 = vmatpush1.bf16.msra.mxu0 %v4673_v33  ;;  %v4700_v42 = vld [vmem:[%s6034_s3 + $0x1c0] ss:$8 sps:$4 sm:$0xff]   ;;  %v4714_v33 = vld [vmem:[%s6034_s3 + $0x1e4] ss:$8 sps:$4 sm:$0xff]  }
 0x22f   :  { %v4322_v48 = vpop.f32.mrb[87].mxu0 }
 0x230   :  { %v1710_v18 = vadd.f32 %v4320_v25, %v5208_v53  ;;  %v4323_v23 = vadd.f32 %v4322_v48, %v4321_v31  ;;  %v4681_v53 = vld [vmem:[%s6034_s3 + $0x84] ss:$8 sps:$4 sm:$0xff]   ;;  %3436 = vmatpush1.bf16.msra.mxu1 %v4676_v44  ;;  %v4708_v25 = vld [vmem:[%s6034_s3 + $0x1d4] ss:$8 sps:$4 sm:$0xff]   ;;  %v4709_v48 = vld [vmem:[%s6034_s3 + $0xd0] ss:$8 sps:$4 sm:$0xff]  }
 0x231   :  { %3382 = vmatprep.subr.bf16.mxu0 %v4681_v53  ;;  %v4717_v44 = vld [vmem:[%s6034_s3 + $0xe4] ss:$8 sps:$4 sm:$0xff]  }
 0x232   :  { %v1713_v40 = vadd.f32 %v4323_v23, %v5212_v59  ;;  %v5374_v43 = vadd.f32 %v5210_v54, %v1710_v18  ;;  %3383 = vmatpush1.bf16.msra.mxu0 %v4679_v24  ;;  %v4684_v59 = vld [vmem:[%s6034_s3 + $0x194] ss:$8 sps:$4 sm:$0xff]  }
 0x233   :  { %3437 = vmatprep.subr.bf16.mxu1 %v4684_v59  ;;  %3384 = vmatprep.subr.bf16.mxu0 %v4687_v57 }
 0x234   :  { %v4324_v45 = vpop.f32.mrb[88].mxu0  ;;  %v5386_v50 = vadd.f32 %v5214_v60, %v1713_v40  ;;  %3438 = vmatpush1.bf16.msra.mxu1 %v4682_v55  ;;  %v4712_v40 = vld [vmem:[%s6034_s3 + $0x1e0] ss:$8 sps:$4 sm:$0xff]   ;;  %v4721_v55 = vld [vmem:[%s6034_s3 + $0xf0] ss:$8 sps:$4 sm:$0xff]  }
 0x235   :  { %v4325_v54 = vpop.f32.mrb[89].mxu0  ;;  %3439 = vmatprep.subr.bf16.mxu1 %v4690_v35 }
 0x236   :  { %v4326_v51 = vadd.f32 %v4325_v54, %v4324_v45  ;;  %v4327_v52 = vpop.f32.mrb[90].mxu0  ;;  %3385 = vmatpush1.bf16.msra.mxu0 %v4685_v29  ;;  %v4715_v45 = vld [vmem:[%s6034_s3 + $0xe0] ss:$8 sps:$4 sm:$0xff]   ;;  %v4720_v54 = vld [vmem:[%s6034_s3 + $0x1f4] ss:$8 sps:$4 sm:$0xff]  }
 0x237   :  { %v4328_v60 = vpop.f32.mrb[91].mxu0 }
 0x238   :  { %v1718_v58 = vadd.f32 %v4326_v51, %v5216_v1  ;;  %v4329_v61 = vadd.f32 %v4328_v60, %v4327_v52  ;;  %v4693_v1 = vld [vmem:[%s6034_s3 + $0xa4] ss:$8 sps:$4 sm:$0xff]   ;;  %3440 = vmatpush1.bf16.msra.mxu1 %v4688_v30  ;;  %v4723_v52 = vld [vmem:[%s6034_s3 + $0xf4] ss:$8 sps:$4 sm:$0xff]  }
 0x239   :  { %3386 = vmatprep.subr.bf16.mxu0 %v4693_v1  ;;  %3441 = vmatprep.subr.bf16.mxu1 %v4696_v0 }
 0x23a   :  { %v1721_v4 = vadd.f32 %v4329_v61, %v5220_v9  ;;  %v5418_v8 = vadd.f32 %v5218_v2, %v1718_v58  ;;  %3387 = vmatpush1.bf16.msra.mxu0 %v4691_v63  ;;  %v4697_v2 = vld [vmem:[%s6034_s3 + $0xb0] ss:$8 sps:$4 sm:$0xff]   ;;  %v4702_v9 = vld [vmem:[%s6034_s3 + $0x1c4] ss:$8 sps:$4 sm:$0xff]  }
 0x23b   :  { %3388 = vmatprep.subr.bf16.mxu0 %v4699_v36 }
 0x23c   :  { %v4330_v13 = vpop.f32.mrb[92].mxu0  ;;  %v5424_v14 = vadd.f32 %v5222_v10, %v1721_v4  ;;  %v4705_v10 = vld [vmem:[%s6034_s3 + $0xc4] ss:$8 sps:$4 sm:$0xff]   ;;  %3442 = vmatpush1.bf16.msra.mxu1 %v4694_v15 }
 0x23d   :  { %v4331_v5 = vpop.f32.mrb[93].mxu0  ;;  %3443 = vmatprep.subr.bf16.mxu1 %v4702_v9 }
 0x23e   :  { %v4332_v6 = vadd.f32 %v4331_v5, %v4330_v13  ;;  %v4333_v12 = vpop.f32.mrb[94].mxu0  ;;  %3389 = vmatpush1.bf16.msra.mxu0 %v4697_v2 }
 0x23f   :  { %v4334_v41 = vpop.f32.mrb[95].mxu0  ;;  %3390 = vmatprep.subr.bf16.mxu0 %v4705_v10 }
 0x240   :  { %v1726_v16 = vadd.f32 %v4332_v6, %v5224_v19  ;;  %v4335_v21 = vadd.f32 %v4334_v41, %v4333_v12  ;;  %v4711_v19 = vld [vmem:[%s6034_s3 + $0xd4] ss:$8 sps:$4 sm:$0xff]   ;;  %3444 = vmatpush1.bf16.msra.mxu1 %v4700_v42 }
 0x241   :  { %3445 = vmatprep.subr.bf16.mxu1 %v4708_v25 }
 0x242   :  { %v1729_v31 = vadd.f32 %v4335_v21, %v5228_v27  ;;  %v5453_v17 = vadd.f32 %v5226_v20, %v1726_v16  ;;  %3391 = vmatpush1.bf16.msra.mxu0 %v4703_v47 }
 0x243   :  { %3392 = vmatprep.subr.bf16.mxu0 %v4711_v19 }
 0x244   :  { %v4336_v18 = vpop.f32.mrb[96].mxu0  ;;  %v5465_v23 = vadd.f32 %v5230_v28, %v1729_v31  ;;  %3446 = vmatpush1.bf16.msra.mxu1 %v4706_v32 }
 0x245   :  { %v4337_v20 = vpop.f32.mrb[97].mxu0  ;;  %3447 = vmatprep.subr.bf16.mxu1 %v4714_v33 }
 0x246   :  { %v4338_v27 = vadd.f32 %v4337_v20, %v4336_v18  ;;  %v4339_v39 = vpop.f32.mrb[98].mxu0  ;;  %3393 = vmatpush1.bf16.msra.mxu0 %v4709_v48 }
 0x247   :  { %v4340_v53 = vpop.f32.mrb[99].mxu0  ;;  %3394 = vmatprep.subr.bf16.mxu0 %v4717_v44 }
 0x248   :  { %v1734_v24 = vadd.f32 %v4338_v27, %v5232_v37  ;;  %v4341_v28 = vadd.f32 %v4340_v53, %v4339_v39  ;;  %v4718_v37 = vld [vmem:[%s6034_s3 + $0x1f0] ss:$8 sps:$4 sm:$0xff]   ;;  %3448 = vmatpush1.bf16.msra.mxu1 %v4712_v40 }
 0x249   :  { %3449 = vmatprep.subr.bf16.mxu1 %v4720_v54 }
 0x24a   :  { %v1737_v59 = vadd.f32 %v4341_v28, %v5239_v46  ;;  %v5482_v51 = vadd.f32 %v5234_v38, %v1734_v24  ;;  %v4726_v46 = vld [vmem:[%s6034_s3 + $0x204] ss:$8 sps:$4 sm:$0xff]   ;;  %3395 = vmatpush1.bf16.msra.mxu0 %v4715_v45 }
 0x24b   :  { %3396 = vmatprep.subr.bf16.mxu0 %v4723_v52 }
 0x24c   :  { %v4422_v57 = vpop.f32.mrb[100].mxu0  ;;  %v5497_v38 = vadd.f32 %v5241_v49, %v1737_v59  ;;  %3450 = vmatpush1.bf16.msra.mxu1 %v4718_v37 }
 0x24d   :  { %v4423_v60 = vpop.f32.mrb[101].mxu0  ;;  %3472 = vmatprep.subr.bf16.mxu1 %v4726_v46 }
 0x24e   :  { %v4424_v29 = vadd.f32 %v4423_v60, %v4422_v57  ;;  %v4425_v58 = vpop.f32.mrb[102].mxu0  ;;  %3397 = vmatpush1.bf16.msra.mxu0 %v4721_v55 }
 0x24f   :  { %v4426_v61 = vpop.f32.mrb[103].mxu0 }
 0x250   :  { %v5500_v30 = vadd.f32 %v4424_v29, %v5255_v3  ;;  %v4427_v35 = vadd.f32 %v4426_v61, %v4425_v58 }
 0x252   :  { %v5503_v63 = vadd.f32 %v4427_v35, %v5258_v7  ;;  %v1958_v15 = vmul.f32 %v5500_v30, %v5500_v30 }
 0x254   :  { %v4428_v49 = vpop.f32.mrb[104].mxu0  ;;  %v1959_v0 = vmul.f32 %v5503_v63, %v5503_v63  ;;  %v1936_v3 = vadd.f32 %v5503_v63, %v5500_v30 }
 0x255   :  { %v4429_v1 = vpop.f32.mrb[105].mxu0 }
 0x256   :  { %v4430_v4 = vadd.f32 %v4429_v1, %v4428_v49  ;;  %v4431_v36 = vpop.f32.mrb[106].mxu0  ;;  %v1974_v7 = vadd.f32 %v1959_v0, %v1958_v15 }
 0x257   :  { %v4432_v13 = vpop.f32.mrb[107].mxu0 }
 0x258   :  { %v5512_v5 = vadd.f32 %v4430_v4, %v5278_v26  ;;  %v4433_v2 = vadd.f32 %v4432_v13, %v4431_v36 }
 0x25a   :  { %v1937_v9 = vadd.f32 %v1936_v3, %v5512_v5  ;;  %v1960_v6 = vmul.f32 %v5512_v5, %v5512_v5  ;;  %v5518_v12 = vadd.f32 %v4433_v2, %v5290_v34 }
 0x25c   :  { %v1975_v10 = vadd.f32 %v1974_v7, %v1960_v6  ;;  %v1938_v41 = vadd.f32 %v1937_v9, %v5518_v12  ;;  %v1961_v16 = vmul.f32 %v5518_v12, %v5518_v12  ;;  %v4434_v21 = vpop.f32.mrb[108].mxu0 }
 0x25d   :  { %v4435_v42 = vpop.f32.mrb[109].mxu0 }
 0x25e   :  { %v1976_v26 = vadd.f32 %v1975_v10, %v1961_v16  ;;  %v4436_v47 = vadd.f32 %v4435_v42, %v4434_v21  ;;  %v4437_v25 = vpop.f32.mrb[110].mxu0 }
 0x25f   :  { %v4438_v19 = vpop.f32.mrb[111].mxu0 }
 0x260   :  { %v5524_v31 = vadd.f32 %v4436_v47, %v5310_v56  ;;  %v4439_v32 = vadd.f32 %v4438_v19, %v4437_v25 }
 0x262   :  { %v1939_v48 = vadd.f32 %v1938_v41, %v5524_v31  ;;  %v1962_v34 = vmul.f32 %v5524_v31, %v5524_v31  ;;  %v5530_v33 = vadd.f32 %v4439_v32, %v5322_v62 }
 0x264   :  { %v1977_v18 = vadd.f32 %v1976_v26, %v1962_v34  ;;  %v1940_v20 = vadd.f32 %v1939_v48, %v5530_v33  ;;  %v1963_v27 = vmul.f32 %v5530_v33, %v5530_v33  ;;  %v4440_v39 = vpop.f32.mrb[112].mxu0 }
 0x265   :  { %v4441_v40 = vpop.f32.mrb[113].mxu0 }
 0x266   :  { %v1978_v44 = vadd.f32 %v1977_v18, %v1963_v27  ;;  %v4442_v56 = vadd.f32 %v4441_v40, %v4440_v39  ;;  %v4443_v53 = vpop.f32.mrb[114].mxu0 }
 0x267   :  { %v4444_v24 = vpop.f32.mrb[115].mxu0 }
 0x268   :  { %v5536_v28 = vadd.f32 %v4442_v56, %v5342_v11  ;;  %v4445_v45 = vadd.f32 %v4444_v24, %v4443_v53 }
 0x26a   :  { %v1941_v54 = vadd.f32 %v1940_v20, %v5536_v28  ;;  %v1964_v62 = vmul.f32 %v5536_v28, %v5536_v28  ;;  %v5542_v59 = vadd.f32 %v4445_v45, %v5354_v22 }
 0x26c   :  { %v1979_v37 = vadd.f32 %v1978_v44, %v1964_v62  ;;  %v1942_v52 = vadd.f32 %v1941_v54, %v5542_v59  ;;  %v1965_v55 = vmul.f32 %v5542_v59, %v5542_v59  ;;  %v4446_v46 = vpop.f32.mrb[116].mxu0 }
 0x26d   :  { %v4447_v57 = vpop.f32.mrb[117].mxu0 }
 0x26e   :  { %v1980_v60 = vadd.f32 %v1979_v37, %v1965_v55  ;;  %v4448_v11 = vadd.f32 %v4447_v57, %v4446_v46  ;;  %v4449_v29 = vpop.f32.mrb[118].mxu0 }
 0x26f   :  { %v4450_v58 = vpop.f32.mrb[119].mxu0 }
 0x270   :  { %v5548_v61 = vadd.f32 %v4448_v11, %v5374_v43  ;;  %v4451_v35 = vadd.f32 %v4450_v58, %v4449_v29 }
 0x272   :  { %v1943_v49 = vadd.f32 %v1942_v52, %v5548_v61  ;;  %v1966_v22 = vmul.f32 %v5548_v61, %v5548_v61  ;;  %v5554_v1 = vadd.f32 %v4451_v35, %v5386_v50 }
 0x274   :  { %v1981_v0 = vadd.f32 %v1980_v60, %v1966_v22  ;;  %v1944_v4 = vadd.f32 %v1943_v49, %v5554_v1  ;;  %v1967_v36 = vmul.f32 %v5554_v1, %v5554_v1  ;;  %v4452_v13 = vpop.f32.mrb[120].mxu0 }
 0x275   :  { %v4453_v15 = vpop.f32.mrb[121].mxu0 }
 0x276   :  { %v1982_v3 = vadd.f32 %v1981_v0, %v1967_v36  ;;  %v4454_v43 = vadd.f32 %v4453_v15, %v4452_v13  ;;  %v4455_v2 = vpop.f32.mrb[122].mxu0 }
 0x277   :  { %v4456_v7 = vpop.f32.mrb[123].mxu0 }
 0x278   :  { %v5560_v9 = vadd.f32 %v4454_v43, %v5418_v8  ;;  %v4457_v6 = vadd.f32 %v4456_v7, %v4455_v2 }
 0x27a   :  { %v1945_v10 = vadd.f32 %v1944_v4, %v5560_v9  ;;  %v1968_v50 = vmul.f32 %v5560_v9, %v5560_v9  ;;  %v5566_v41 = vadd.f32 %v4457_v6, %v5424_v14 }
 0x27c   :  { %v1983_v16 = vadd.f32 %v1982_v3, %v1968_v50  ;;  %v1946_v21 = vadd.f32 %v1945_v10, %v5566_v41  ;;  %v1969_v42 = vmul.f32 %v5566_v41, %v5566_v41  ;;  %v4458_v26 = vpop.f32.mrb[124].mxu0 }
 0x27d   :  { %v4459_v47 = vpop.f32.mrb[125].mxu0 }
 0x27e   :  { %v1984_v25 = vadd.f32 %v1983_v16, %v1969_v42  ;;  %v4460_v8 = vadd.f32 %v4459_v47, %v4458_v26  ;;  %v4461_v19 = vpop.f32.mrb[126].mxu0 }
 0x27f   :  { %v4462_v32 = vpop.f32.mrb[127].mxu0 }
 0x280   :  { %v5572_v48 = vadd.f32 %v4460_v8, %v5453_v17  ;;  %v4463_v34 = vadd.f32 %v4462_v32, %v4461_v19  ;;  %v5628_v32 = vld [vmem:[%s6035_s5] ss:$0 sm:$0xff] }
 0x282   :  { %v1947_v18 = vadd.f32 %v1946_v21, %v5572_v48  ;;  %v1970_v14 = vmul.f32 %v5572_v48, %v5572_v48  ;;  %v5578_v20 = vadd.f32 %v4463_v34, %v5465_v23 }
 0x284   :  { %v1985_v27 = vadd.f32 %v1984_v25, %v1970_v14  ;;  %v1948_v39 = vadd.f32 %v1947_v18, %v5578_v20  ;;  %v1971_v40 = vmul.f32 %v5578_v20, %v5578_v20  ;;  %v4464_v44 = vpop.f32.mrb[128].mxu0 }
 0x285   :  { %v4465_v56 = vpop.f32.mrb[129].mxu0 }
 0x286   :  { %v1986_v53 = vadd.f32 %v1985_v27, %v1971_v40  ;;  %v4466_v17 = vadd.f32 %v4465_v56, %v4464_v44  ;;  %v4467_v24 = vpop.f32.mrb[130].mxu0  ;;  %v5639_v40 = vld [vmem:[%s6036_s6] ss:$0 sm:$0xff] }
 0x287   :  { %v4468_v45 = vpop.f32.mrb[131].mxu0 }
 0x288   :  { %v5584_v54 = vadd.f32 %v4466_v17, %v5482_v51  ;;  %v4469_v62 = vadd.f32 %v4468_v45, %v4467_v24 }
 0x28a   :  { %v1949_v37 = vadd.f32 %v1948_v39, %v5584_v54  ;;  %v1972_v23 = vmul.f32 %v5584_v54, %v5584_v54  ;;  %v1931_v52 = vadd.f32 %v4469_v62, %v5497_v38 }
 0x28c   :  { %v1987_v55 = vadd.f32 %v1986_v53, %v1972_v23  ;;  %v1950_v46 = vadd.f32 %v1949_v37, %v1931_v52  ;;  %v1973_v57 = vmul.f32 %v1931_v52, %v1931_v52 }
 0x28e   :  { %v1951_v60 = vrot.slane %v1950_v46, 4  ;;  %v1988_v11 = vadd.f32 %v1987_v55, %v1973_v57 }
 0x290   :  { %v1952_v29 = vadd.f32 %v1951_v60, %v1950_v46  ;;  %v1989_v58 = vrot.slane %v1988_v11, 4 }
 0x292   :  { %v1953_v35 = vrot.slane %v1952_v29, 2  ;;  %v1990_v49 = vadd.f32 %v1989_v58, %v1988_v11 }
 0x294   :  { %v1954_v22 = vadd.f32 %v1953_v35, %v1952_v29  ;;  %v1991_v51 = vrot.slane %v1990_v49, 2 }
 0x296   :  { %v1955_v0 = vrot.slane %v1954_v22, 1  ;;  %v1992_v4 = vadd.f32 %v1991_v51, %v1990_v49 }
 0x298   :  { %v1956_v36 = vadd.f32 %v1955_v0, %v1954_v22  ;;  %v1993_v13 = vrot.slane %v1992_v4, 1 }
 0x29a   :  { %v5590_v15 = vmul.f32 0.0078125, %v1956_v36  ;;  %v1994_v3 = vadd.f32 %v1993_v13, %v1992_v4 }
 0x29c   :  { %v1995_v43 = vmul.f32 0.0078125, %v1994_v3  ;;  %v1996_v38 = vmul.f32 %v5590_v15, %v5590_v15  ;;  %v2014_v2 = vsub.f32 %v1931_v52, %v5590_v15  ;;  %v1999_v7 = vsub.f32 %v5500_v30, %v5590_v15 }
 0x29d   :  { %v2001_v6 = vsub.f32 %v5512_v5, %v5590_v15  ;;  %v2003_v10 = vsub.f32 %v5524_v31, %v5590_v15  ;;  %v2005_v50 = vsub.f32 %v5536_v28, %v5590_v15  ;;  %v2002_v21 = vsub.f32 %v5518_v12, %v5590_v15 }
 0x29e   :  { %v1997_v16 = vsub.f32 %v1995_v43, %v1996_v38  ;;  %v2004_v42 = vsub.f32 %v5530_v33, %v5590_v15  ;;  %v2006_v26 = vsub.f32 %v5542_v59, %v5590_v15  ;;  %v2007_v30 = vsub.f32 %v5548_v61, %v5590_v15 }
 0x29f   :  { %v2009_v5 = vsub.f32 %v5560_v9, %v5590_v15  ;;  %v2011_v31 = vsub.f32 %v5572_v48, %v5590_v15  ;;  %v2013_v28 = vsub.f32 %v5584_v54, %v5590_v15  ;;  %v2008_v12 = vsub.f32 %v5554_v1, %v5590_v15 }
 0x2a0   :  { %v1998_v47 = vmax.f32 %v1997_v16, 0.0  ;;  %v2010_v33 = vsub.f32 %v5566_v41, %v5590_v15  ;;  %v2012_v25 = vsub.f32 %v5578_v20, %v5590_v15  ;;  %v2000_v34 = vsub.f32 %v5503_v63, %v5590_v15 }
 0x2a2   :  { %v2015_v8 = vadd.f32 1e-05, %v1998_v47 }
 0x2a4   :  { %4844 = vrsqrt.f32 %v2015_v8  ;;  %v2269_v8 = vld [vmem:[#allocation4 + $0x1] ss:$2 sm:$0xf] }
 0x2ae   :  { %v5623_v19 = vpop.eup %4844 }
 0x2af   :  { %v2032_v18 = vmul.f32 %v5623_v19, %v2014_v2  ;;  %v2017_v14 = vmul.f32 %v5623_v19, %v1999_v7  ;;  %v2019_v27 = vmul.f32 %v5623_v19, %v2001_v6  ;;  %v2021_v39 = vmul.f32 %v5623_v19, %v2003_v10 }
 0x2b0   :  { %v2023_v44 = vmul.f32 %v5623_v19, %v2005_v50  ;;  %v2018_v56 = vmul.f32 %v5623_v19, %v2000_v34  ;;  %v2020_v53 = vmul.f32 %v5623_v19, %v2002_v21  ;;  %v2022_v63 = vmul.f32 %v5623_v19, %v2004_v42 }
 0x2b1   :  { %v2054_v17 = vmul.f32 %v5628_v32, %v2032_v18  ;;  %v2039_v24 = vmul.f32 %v5628_v32, %v2017_v14  ;;  %v2041_v45 = vmul.f32 %v5628_v32, %v2019_v27  ;;  %v2043_v62 = vmul.f32 %v5628_v32, %v2021_v39  ;;  %v2162_v14 = vld [vmem:[#allocation4] ss:$2 sm:$0xf] }
 0x2b2   :  { %v2045_v37 = vmul.f32 %v5628_v32, %v2023_v44  ;;  %v2040_v23 = vmul.f32 %v5628_v32, %v2018_v56  ;;  %v2042_v52 = vmul.f32 %v5628_v32, %v2020_v53  ;;  %v2044_v55 = vmul.f32 %v5628_v32, %v2022_v63 }
 0x2b3   :  { %v2076_v46 = vadd.f32 %v5639_v40, %v2054_v17  ;;  %v2061_v57 = vadd.f32 %v5639_v40, %v2039_v24  ;;  %v2063_v60 = vadd.f32 %v5639_v40, %v2041_v45  ;;  %v2065_v11 = vadd.f32 %v5639_v40, %v2043_v62 }
 0x2b4   :  { %v2067_v29 = vadd.f32 %v5639_v40, %v2045_v37  ;;  %v2062_v58 = vadd.f32 %v5639_v40, %v2040_v23  ;;  %v2064_v35 = vadd.f32 %v5639_v40, %v2042_v52  ;;  %v2066_v49 = vadd.f32 %v5639_v40, %v2044_v55 }
 0x2b5   :  { %vm2092_vm5 = vcmp.ge.f32.partialorder %v2076_v46, 0.0  ;;  %v2108_v22 = vmul.f32 0.2, %v2076_v46  ;;  %vm2077_vm6 = vcmp.ge.f32.partialorder %v2061_v57, 0.0  ;;  %vm2079_vm7 = vcmp.ge.f32.partialorder %v2063_v60, 0.0 }
 0x2b6   :  { %vm2081_vm8 = vcmp.ge.f32.partialorder %v2065_v11, 0.0  ;;  %vm2083_vm9 = vcmp.ge.f32.partialorder %v2067_v29, 0.0  ;;  %v2093_v51 = vmul.f32 0.2, %v2061_v57  ;;  %v2095_v0 = vmul.f32 0.2, %v2063_v60 }
 0x2b7   :  { %v2124_v4 = vsel %vm2092_vm5, %v2076_v46, %v2108_v22  ;;  %v2097_v36 = vmul.f32 0.2, %v2065_v11  ;;  %v2099_v13 = vmul.f32 0.2, %v2067_v29  ;;  %vm2078_vm10 = vcmp.ge.f32.partialorder %v2062_v58, 0.0 }
 0x2b8   :  { %2161 = vst [vmem:[#allocation4 + $0x121] sm:$0xff] %v2124_v4  ;;  %v2109_v3 = vsel %vm2077_vm6, %v2061_v57, %v2093_v51  ;;  %v2111_v43 = vsel %vm2079_vm7, %v2063_v60, %v2095_v0  ;;  %vm2080_vm11 = vcmp.ge.f32.partialorder %v2064_v35, 0.0  ;;  %vm2082_vm12 = vcmp.ge.f32.partialorder %v2066_v49, 0.0 }
 0x2b9   :  { %v2113_v38 = vsel %vm2081_vm8, %v2065_v11, %v2097_v36  ;;  %v2115_v2 = vsel %vm2083_vm9, %v2067_v29, %v2099_v13  ;;  %2146 = vst [vmem:[#allocation4 + $0x11] sm:$0xff] %v2109_v3  ;;  %2148 = vst [vmem:[#allocation4 + $0x31] sm:$0xff] %v2111_v43  ;;  %v2094_v7 = vmul.f32 0.2, %v2062_v58  ;;  %v2096_v6 = vmul.f32 0.2, %v2064_v35 }
 0x2ba   :  { %2150 = vst [vmem:[#allocation4 + $0x51] sm:$0xff] %v2113_v38  ;;  %2152 = vst [vmem:[#allocation4 + $0x71] sm:$0xff] %v2115_v2  ;;  %v2098_v10 = vmul.f32 0.2, %v2066_v49  ;;  %v2024_v50 = vmul.f32 %v5623_v19, %v2006_v26  ;;  %v2025_v16 = vmul.f32 %v5623_v19, %v2007_v30  ;;  %v2027_v21 = vmul.f32 %v5623_v19, %v2009_v5 }
 0x2bb   :  { %v2110_v42 = vsel %vm2078_vm10, %v2062_v58, %v2094_v7  ;;  %v2112_v47 = vsel %vm2080_vm11, %v2064_v35, %v2096_v6  ;;  %v2029_v59 = vmul.f32 %v5623_v19, %v2011_v31  ;;  %v2031_v61 = vmul.f32 %v5623_v19, %v2013_v28 }
 0x2bc   :  { %v2114_v26 = vsel %vm2082_vm12, %v2066_v49, %v2098_v10  ;;  %2147 = vst [vmem:[#allocation4 + $0x21] sm:$0xff] %v2110_v42  ;;  %2149 = vst [vmem:[#allocation4 + $0x41] sm:$0xff] %v2112_v47  ;;  %v2046_v9 = vmul.f32 %v5628_v32, %v2024_v50  ;;  %v2047_v30 = vmul.f32 %v5628_v32, %v2025_v16 }
 0x2bd   :  { %2151 = vst [vmem:[#allocation4 + $0x61] sm:$0xff] %v2114_v26  ;;  %v2026_v48 = vmul.f32 %v5623_v19, %v2008_v12  ;;  %v2028_v54 = vmul.f32 %v5623_v19, %v2010_v33  ;;  %v2030_v28 = vmul.f32 %v5623_v19, %v2012_v25  ;;  %v2049_v34 = vmul.f32 %v5628_v32, %v2027_v21 }
 0x2be   :  { %v2068_v5 = vadd.f32 %v5639_v40, %v2046_v9  ;;  %v2069_v31 = vadd.f32 %v5639_v40, %v2047_v30  ;;  %v2051_v1 = vmul.f32 %v5628_v32, %v2029_v59  ;;  %v2053_v41 = vmul.f32 %v5628_v32, %v2031_v61  ;;  %v4724_v61 = vld [vmem:[%s6034_s3 + $0x200] ss:$8 sps:$4 sm:$0xff]   ;;  %v4729_v9 = vld [vmem:[%s6034_s3 + $0x214] ss:$8 sps:$4 sm:$0xff]  }
 0x2bf   :  { %v2048_v44 = vmul.f32 %v5628_v32, %v2026_v48  ;;  %v2050_v56 = vmul.f32 %v5628_v32, %v2028_v54  ;;  %v2052_v20 = vmul.f32 %v5628_v32, %v2030_v28  ;;  %v2071_v63 = vadd.f32 %v5639_v40, %v2049_v34  ;;  %v2277_v30 = vld [vmem:[#allocation4 + $0xa1] ss:$2 sm:$0xf]  ;;  %v2170_v48 = vld [vmem:[#allocation4 + $0xa0] ss:$2 sm:$0xf] }
 0x2c0   :  { %v2197_v12 = vld [vmem:[#allocation4 + $0x10] ss:$2 sm:$0xf]  ;;  %vm2084_vm13 = vcmp.ge.f32.partialorder %v2068_v5, 0.0  ;;  %v2100_v25 = vmul.f32 0.2, %v2068_v5  ;;  %v2073_v17 = vadd.f32 %v5639_v40, %v2051_v1  ;;  %v2075_v52 = vadd.f32 %v5639_v40, %v2053_v41 }
 0x2c1   :  { %v2199_v18 = vld [vmem:[#allocation4 + $0x30] ss:$2 sm:$0xf]  ;;  %vm2085_vm14 = vcmp.ge.f32.partialorder %v2069_v31, 0.0  ;;  %v2070_v60 = vadd.f32 %v5639_v40, %v2048_v44  ;;  %v2072_v11 = vadd.f32 %v5639_v40, %v2050_v56  ;;  %v2074_v49 = vadd.f32 %v5639_v40, %v2052_v20  ;;  %v4727_v54 = vld [vmem:[%s6034_s3 + $0x210] ss:$8 sps:$4 sm:$0xff]  }
 0x2c2   :  { %v2201_v33 = vld [vmem:[#allocation4 + $0x50] ss:$2 sm:$0xf]  ;;  %v2220_v39 = vcombine.low %v2197_v12, %v2199_v18  ;;  %v2116_v23 = vsel %vm2084_vm13, %v2068_v5, %v2100_v25  ;;  %vm2087_vm15 = vcmp.ge.f32.partialorder %v2071_v63, 0.0  ;;  %vm2089_vm0 = vcmp.ge.f32.partialorder %v2073_v17, 0.0 }
 0x2c3   :  { %v2203_v27 = vld [vmem:[#allocation4 + $0x70] ss:$2 sm:$0xf]  ;;  %v2271_v19 = vld [vmem:[#allocation4 + $0x21] ss:$2 sm:$0xf] }
 0x2c4   :  { %v2221_v15 = vcombine.low %v2201_v33, %v2203_v27  ;;  %v2273_v53 = vld [vmem:[#allocation4 + $0x41] ss:$2 sm:$0xf]  ;;  %v2292_v62 = vcombine.low %v2269_v8, %v2271_v19  ;;  %v2164_v37 = vld [vmem:[#allocation4 + $0x20] ss:$2 sm:$0xf] }
 0x2c5   :  { %v2275_v45 = vld [vmem:[#allocation4 + $0x61] ss:$2 sm:$0xf]  ;;  %v2166_v46 = vld [vmem:[#allocation4 + $0x40] ss:$2 sm:$0xf]  ;;  %v2185_v57 = vcombine.low %v2162_v14, %v2164_v37 }
 0x2c6   :  { %v2228_v24 = vpack.c.bf16 %v2221_v15, %v2220_v39  ;;  %v2293_v55 = vcombine.low %v2273_v53, %v2275_v45  ;;  %v2168_v32 = vld [vmem:[#allocation4 + $0x60] ss:$2 sm:$0xf]  ;;  %2153 = vst [vmem:[#allocation4 + $0x81] sm:$0xff] %v2116_v23  ;;  %vm2091_vm1 = vcmp.ge.f32.partialorder %v2075_v52, 0.0  ;;  %vm2086_vm2 = vcmp.ge.f32.partialorder %v2070_v60, 0.0 }
 0x2c7   :  { %v2186_v29 = vcombine.low %v2166_v46, %v2168_v32  ;;  %v2233_v58 = vld [vmem:[#allocation4 + $0x20] ss:$2 sm:$0xf]  ;;  %v2101_v4 = vmul.f32 0.2, %v2069_v31  ;;  %vm2088_vm3 = vcmp.ge.f32.partialorder %v2072_v11, 0.0 }
 0x2c8   :  { %3398 = vmatprep.mubr.bf16.mxu0 %v2228_v24  ;;  %v2235_v35 = vld [vmem:[#allocation4 + $0x40] ss:$2 sm:$0xf]  ;;  %v2300_v22 = vpack.c.bf16 %v2293_v55, %v2292_v62  ;;  %v2103_v36 = vmul.f32 0.2, %v2071_v63  ;;  %vm2090_vm4 = vcmp.ge.f32.partialorder %v2074_v49, 0.0 }
 0x2c9   :  { %v2256_v51 = vcombine.low %v2233_v58, %v2235_v35  ;;  %v2193_v0 = vpack.c.bf16 %v2186_v29, %v2185_v57  ;;  %v2105_v13 = vmul.f32 0.2, %v2073_v17  ;;  %v2107_v3 = vmul.f32 0.2, %v2075_v52  ;;  %v4732_v5 = vld [vmem:[%s6034_s3 + $0x224] ss:$8 sps:$4 sm:$0xff]  }
 0x2ca   :  { %3451 = vmatprep.mubr.bf16.mxu1 %v2300_v22  ;;  %v2237_v43 = vld [vmem:[#allocation4 + $0x60] ss:$2 sm:$0xf]  ;;  %v2117_v38 = vsel %vm2085_vm14, %v2069_v31, %v2101_v4  ;;  %v2119_v2 = vsel %vm2087_vm15, %v2071_v63, %v2103_v36  ;;  %v2102_v40 = vmul.f32 0.2, %v2070_v60  ;;  %vm3808_vm13 = vcmask 130112  }
 0x2cb   :  { %3399 = vmatmul.mubr.bf16.vlgmr.msra.gmra.mrb[132].mxu0 %v2193_v0  ;;  %v2121_v7 = vsel %vm2089_vm0, %v2073_v17, %v2105_v13  ;;  %v2123_v6 = vsel %vm2091_vm1, %v2075_v52, %v2107_v3  ;;  %2154 = vst [vmem:[#allocation4 + $0xb1] sm:$0xff] %v2117_v38  ;;  %2156 = vst [vmem:[#allocation4 + $0xd1] sm:$0xff] %v2119_v2  ;;  %v2104_v10 = vmul.f32 0.2, %v2072_v11  ;;  %v2106_v50 = vmul.f32 0.2, %v2074_v49 }
 0x2cc   :  { %2158 = vst [vmem:[#allocation4 + $0xf1] sm:$0xff] %v2121_v7  ;;  %2160 = vst [vmem:[#allocation4 + $0x111] sm:$0xff] %v2123_v6  ;;  %v2118_v21 = vsel %vm2086_vm2, %v2070_v60, %v2102_v40  ;;  %v2341_v12 = vld [vmem:[#allocation4 + $0x21] ss:$2 sm:$0xf]  ;;  %vm3819_vm14 = vcmask 1041409  }
 0x2cd   :  { %v2239_v16 = vld [vmem:[#allocation4 + $0x80] ss:$2 sm:$0xf]  ;;  %v2120_v47 = vsel %vm2088_vm3, %v2072_v11, %v2104_v10  ;;  %v2122_v59 = vsel %vm2090_vm4, %v2074_v49, %v2106_v50  ;;  %2155 = vst [vmem:[#allocation4 + $0xc1] sm:$0xff] %v2118_v21  ;;  %v4730_v39 = vld [vmem:[%s6034_s3 + $0x220] ss:$8 sps:$4 sm:$0xff]  }
 0x2ce   :  { %v2257_v42 = vcombine.low %v2237_v43, %v2239_v16  ;;  %2157 = vst [vmem:[#allocation4 + $0xe1] sm:$0xff] %v2120_v47  ;;  %2159 = vst [vmem:[#allocation4 + $0x101] sm:$0xff] %v2122_v59  ;;  %v2343_v18 = vld [vmem:[#allocation4 + $0x41] ss:$2 sm:$0xf]  ;;  %vm3822_vm15 = vcmask 123904  }
 0x2cf   :  { %v2345_v14 = vld [vmem:[#allocation4 + $0x61] ss:$2 sm:$0xf]  ;;  %v2247_v56 = vld [vmem:[#allocation4 + $0x120] ss:$2 sm:$0xf]  ;;  %v2364_v32 = vcombine.low %v2341_v12, %v2343_v18 }
 0x2d0   :  { %v2264_v26 = vpack.c.bf16 %v2257_v42, %v2256_v51  ;;  %v2347_v41 = vld [vmem:[#allocation4 + $0x81] ss:$2 sm:$0xf]  ;;  %v4738_v35 = vld [vmem:[%s6034_s3 + $0x244] ss:$8 sps:$4 sm:$0xff]  }
 0x2d1   :  { %v4735_v53 = vld [vmem:[%s6034_s3 + $0x234] ss:$8 sps:$4 sm:$0xff]   ;;  %v2365_v57 = vcombine.low %v2345_v14, %v2347_v41  ;;  %v4733_v29 = vld [vmem:[%s6034_s3 + $0x230] ss:$8 sps:$4 sm:$0xff]   ;;  %v4736_v22 = vld [vmem:[%s6034_s3 + $0x240] ss:$8 sps:$4 sm:$0xff]  }
 0x2d2   :  { %3452 = vmatmul.mubr.bf16.vlgmr.msra.gmra.mrb[32].mxu1 %v2264_v26  ;;  %v2205_v31 = vld [vmem:[#allocation4 + $0xb0] ss:$2 sm:$0xf]  ;;  %v4741_v51 = vld [vmem:[%s6034_s3 + $0x254] ss:$8 sps:$4 sm:$0xff]  }
 0x2d3   :  { %3473 = vmatpush1.bf16.msra.mxu1 %v4724_v61  ;;  %v2207_v28 = vld [vmem:[#allocation4 + $0xd0] ss:$2 sm:$0xf]  ;;  %v2372_v49 = vpack.c.bf16 %v2365_v57, %v2364_v32  ;;  %v4739_v0 = vld [vmem:[%s6034_s3 + $0x250] ss:$8 sps:$4 sm:$0xff]  }
 0x2d4   :  { %v2209_v8 = vld [vmem:[#allocation4 + $0xf0] ss:$2 sm:$0xf]  ;;  %v2222_v1 = vcombine.low %v2205_v31, %v2207_v28  ;;  %3474 = vmatprep.subr.bf16.mxu1 %v4729_v9  ;;  %v2279_v27 = vld [vmem:[#allocation4 + $0xc1] ss:$2 sm:$0xf] }
 0x2d5   :  { %v2211_v34 = vld [vmem:[#allocation4 + $0x110] ss:$2 sm:$0xf]  ;;  %v2172_v44 = vld [vmem:[#allocation4 + $0xc0] ss:$2 sm:$0xf]  ;;  %v2294_v25 = vcombine.low %v2277_v30, %v2279_v27 }
 0x2d6   :  { %v2223_v33 = vcombine.low %v2209_v8, %v2211_v34  ;;  %v2281_v20 = vld [vmem:[#allocation4 + $0xe1] ss:$2 sm:$0xf]  ;;  %v2187_v19 = vcombine.low %v2170_v48, %v2172_v44  ;;  %v2174_v24 = vld [vmem:[#allocation4 + $0xe0] ss:$2 sm:$0xf] }
 0x2d7   :  { %v2283_v15 = vld [vmem:[#allocation4 + $0x101] ss:$2 sm:$0xf]  ;;  %3475 = vmatpush1.bf16.msra.mxu1 %v4727_v54  ;;  %v2176_v45 = vld [vmem:[#allocation4 + $0x100] ss:$2 sm:$0xf] }
 0x2d8   :  { %v2229_v63 = vpack.c.bf16 %v2223_v33, %v2222_v1  ;;  %v2295_v17 = vcombine.low %v2281_v20, %v2283_v15  ;;  %3476 = vmatprep.subr.bf16.mxu1 %v4732_v5  ;;  %v2188_v62 = vcombine.low %v2174_v24, %v2176_v45  ;;  %v2241_v37 = vld [vmem:[#allocation4 + $0xc0] ss:$2 sm:$0xf]  ;;  %v4744_v4 = vld [vmem:[%s6034_s3 + $0x264] ss:$8 sps:$4 sm:$0xff]  }
 0x2d9   :  { %v2243_v23 = vld [vmem:[#allocation4 + $0xe0] ss:$2 sm:$0xf]  ;;  %v4742_v36 = vld [vmem:[%s6034_s3 + $0x260] ss:$8 sps:$4 sm:$0xff]  }
 0x2da   :  { %3408 = vmatprep.mubr.bf16.mxu0 %v2229_v63  ;;  %v2301_v52 = vpack.c.bf16 %v2295_v17, %v2294_v25  ;;  %v2245_v55 = vld [vmem:[#allocation4 + $0x100] ss:$2 sm:$0xf]  ;;  %v2258_v46 = vcombine.low %v2241_v37, %v2243_v23  ;;  %v2194_v60 = vpack.c.bf16 %v2188_v62, %v2187_v19  ;;  %v4750_v43 = vld [vmem:[%s6034_s3 + $0x284] ss:$8 sps:$4 sm:$0xff]  }
 0x2db   :  { %v2259_v11 = vcombine.low %v2245_v55, %v2247_v56  ;;  %3477 = vmatpush1.bf16.msra.mxu1 %v4730_v39  ;;  %v4747_v13 = vld [vmem:[%s6034_s3 + $0x274] ss:$8 sps:$4 sm:$0xff]   ;;  %v4745_v3 = vld [vmem:[%s6034_s3 + $0x270] ss:$8 sps:$4 sm:$0xff]   ;;  %v4748_v38 = vld [vmem:[%s6034_s3 + $0x280] ss:$8 sps:$4 sm:$0xff]  }
 0x2dc   :  { %3461 = vmatprep.mubr.bf16.mxu1 %v2301_v52  ;;  %3409 = vmatmul.mubr.bf16.gmra.mrb[136].mxu0 %v2194_v60  ;;  %v4753_v2 = vld [vmem:[%s6034_s3 + $0x294] ss:$8 sps:$4 sm:$0xff]   ;;  %v4751_v40 = vld [vmem:[%s6034_s3 + $0x290] ss:$8 sps:$4 sm:$0xff]   ;;  %v4756_v7 = vld [vmem:[%s6034_s3 + $0x2a4] ss:$8 sps:$4 sm:$0xff]  }
 0x2dd   :  { %v2265_v58 = vpack.c.bf16 %v2259_v11, %v2258_v46  ;;  %3478 = vmatprep.subr.bf16.mxu1 %v4735_v53  ;;  %v4754_v6 = vld [vmem:[%s6034_s3 + $0x2a0] ss:$8 sps:$4 sm:$0xff]   ;;  %v4759_v10 = vld [vmem:[%s6034_s3 + $0x2b4] ss:$8 sps:$4 sm:$0xff]   ;;  %v4757_v50 = vld [vmem:[%s6034_s3 + $0x2b0] ss:$8 sps:$4 sm:$0xff]  }
 0x2de   :  { %v4762_v16 = vld [vmem:[%s6034_s3 + $0x2c4] ss:$8 sps:$4 sm:$0xff]   ;;  %v4760_v21 = vld [vmem:[%s6034_s3 + $0x2c0] ss:$8 sps:$4 sm:$0xff]   ;;  %v4765_v42 = vld [vmem:[%s6034_s3 + $0x2d4] ss:$8 sps:$4 sm:$0xff]  }
 0x2df   :  { %3462 = vmatmul.mubr.bf16.gmra.mrb[36].mxu1 %v2265_v58  ;;  %v4763_v47 = vld [vmem:[%s6034_s3 + $0x2d0] ss:$8 sps:$4 sm:$0xff]   ;;  %v4768_v59 = vld [vmem:[%s6034_s3 + $0x2e4] ss:$8 sps:$4 sm:$0xff]   ;;  %v4766_v61 = vld [vmem:[%s6034_s3 + $0x2e0] ss:$8 sps:$4 sm:$0xff]  }
 0x2e0   :  { %3504 = vmatprep.mubr.bf16.mxu1 %v2372_v49  ;;  %3479 = vmatpush1.bf16.msra.mxu1 %v4733_v29  ;;  %v4771_v26 = vld [vmem:[%s6034_s3 + $0x2f4] ss:$8 sps:$4 sm:$0xff]   ;;  %v2305_v9 = vld [vmem:[#allocation4 + $0x11] ss:$2 sm:$0xf] }
 0x2e1   :  { %3480 = vmatprep.subr.bf16.mxu1 %v4738_v35  ;;  %v2307_v30 = vld [vmem:[#allocation4 + $0x31] ss:$2 sm:$0xf]  ;;  %v2355_v54 = vld [vmem:[#allocation4 + $0x121] ss:$2 sm:$0xf] }
 0x2e2   :  { %v2309_v48 = vld [vmem:[#allocation4 + $0x51] ss:$2 sm:$0xf]  ;;  %v2349_v31 = vld [vmem:[#allocation4 + $0xc1] ss:$2 sm:$0xf]  ;;  %v2328_v1 = vcombine.low %v2305_v9, %v2307_v30 }
 0x2e3   :  { %v2311_v5 = vld [vmem:[#allocation4 + $0x71] ss:$2 sm:$0xf]  ;;  %v2351_v28 = vld [vmem:[#allocation4 + $0xe1] ss:$2 sm:$0xf] }
 0x2e4   :  { %3481 = vmatpush1.bf16.msra.mxu1 %v4736_v22  ;;  %v2353_v8 = vld [vmem:[#allocation4 + $0x101] ss:$2 sm:$0xf]  ;;  %v2329_v12 = vcombine.low %v2309_v48, %v2311_v5  ;;  %v4774_v18 = vld [vmem:[%s6034_s3 + $0x304] ss:$8 sps:$4 sm:$0xff]   ;;  %v2366_v14 = vcombine.low %v2349_v31, %v2351_v28 }
 0x2e5   :  { %3482 = vmatprep.subr.bf16.mxu1 %v4741_v51  ;;  %v4769_v34 = vld [vmem:[%s6034_s3 + $0x2f0] ss:$8 sps:$4 sm:$0xff]   ;;  %v2367_v41 = vcombine.low %v2353_v8, %v2355_v54  ;;  %v4772_v33 = vld [vmem:[%s6034_s3 + $0x300] ss:$8 sps:$4 sm:$0xff]   ;;  %v4777_v27 = vld [vmem:[%s6034_s3 + $0x314] ss:$8 sps:$4 sm:$0xff]  }
 0x2e6   :  { %v2336_v39 = vpack.c.bf16 %v2329_v12, %v2328_v1  ;;  %v2313_v44 = vld [vmem:[#allocation4 + $0xb1] ss:$2 sm:$0xf]  ;;  %v2413_v20 = vld [vmem:[#allocation4 + $0x12] ss:$2 sm:$0xf] }
 0x2e7   :  { %v2315_v56 = vld [vmem:[#allocation4 + $0xd1] ss:$2 sm:$0xf]  ;;  %v2415_v15 = vld [vmem:[#allocation4 + $0x32] ss:$2 sm:$0xf]  ;;  %v2373_v25 = vpack.c.bf16 %v2367_v41, %v2366_v14 }
 0x2e8   :  { %3483 = vmatpush1.bf16.msra.mxu1 %v4739_v0  ;;  %v2317_v19 = vld [vmem:[#allocation4 + $0xf1] ss:$2 sm:$0xf]  ;;  %v2417_v63 = vld [vmem:[#allocation4 + $0x52] ss:$2 sm:$0xf]  ;;  %v2330_v45 = vcombine.low %v2313_v44, %v2315_v56  ;;  %v2436_v23 = vcombine.low %v2413_v20, %v2415_v15 }
 0x2e9   :  { %3484 = vmatprep.subr.bf16.mxu1 %v4744_v4  ;;  %v2319_v53 = vld [vmem:[#allocation4 + $0x111] ss:$2 sm:$0xf]  ;;  %v2419_v17 = vld [vmem:[#allocation4 + $0x72] ss:$2 sm:$0xf] }
 0x2ea   :  { %v4775_v24 = vld [vmem:[%s6034_s3 + $0x310] ss:$8 sps:$4 sm:$0xff]   ;;  %v2331_v62 = vcombine.low %v2317_v19, %v2319_v53  ;;  %v4780_v37 = vld [vmem:[%s6034_s3 + $0x324] ss:$8 sps:$4 sm:$0xff]   ;;  %v2437_v52 = vcombine.low %v2417_v63, %v2419_v17  ;;  %v4778_v55 = vld [vmem:[%s6034_s3 + $0x320] ss:$8 sps:$4 sm:$0xff]  }
 0x2eb   :  { %v4783_v32 = vld [vmem:[%s6034_s3 + $0x334] ss:$8 sps:$4 sm:$0xff]   ;;  %v4781_v60 = vld [vmem:[%s6034_s3 + $0x330] ss:$8 sps:$4 sm:$0xff]   ;;  %v4786_v11 = vld [vmem:[%s6034_s3 + $0x344] ss:$8 sps:$4 sm:$0xff]  }
 0x2ec   :  { %3485 = vmatpush1.bf16.msra.mxu1 %v4742_v36  ;;  %v2337_v46 = vpack.c.bf16 %v2331_v62, %v2330_v45  ;;  %v2444_v57 = vpack.c.bf16 %v2437_v52, %v2436_v23  ;;  %v4784_v29 = vld [vmem:[%s6034_s3 + $0x340] ss:$8 sps:$4 sm:$0xff]   ;;  %v4789_v58 = vld [vmem:[%s6034_s3 + $0x354] ss:$8 sps:$4 sm:$0xff]   ;;  %v4787_v35 = vld [vmem:[%s6034_s3 + $0x350] ss:$8 sps:$4 sm:$0xff]  }
 0x2ed   :  { %3486 = vmatprep.subr.bf16.mxu1 %v4747_v13  ;;  %v4792_v49 = vld [vmem:[%s6034_s3 + $0x364] ss:$8 sps:$4 sm:$0xff]   ;;  %v4790_v22 = vld [vmem:[%s6034_s3 + $0x360] ss:$8 sps:$4 sm:$0xff]   ;;  %v4795_v51 = vld [vmem:[%s6034_s3 + $0x374] ss:$8 sps:$4 sm:$0xff]  }
 0x2ee   :  { %v4793_v0 = vld [vmem:[%s6034_s3 + $0x370] ss:$8 sps:$4 sm:$0xff]   ;;  %v4798_v4 = vld [vmem:[%s6034_s3 + $0x384] ss:$8 sps:$4 sm:$0xff]   ;;  %v4796_v36 = vld [vmem:[%s6034_s3 + $0x380] ss:$8 sps:$4 sm:$0xff]  }
 0x2ef   :  { %v4801_v13 = vld [vmem:[%s6034_s3 + $0x394] ss:$8 sps:$4 sm:$0xff]   ;;  %v2421_v9 = vld [vmem:[#allocation4 + $0xb2] ss:$2 sm:$0xf] }
 0x2f0   :  { %3487 = vmatpush1.bf16.msra.mxu1 %v4745_v3  ;;  %v4799_v3 = vld [vmem:[%s6034_s3 + $0x390] ss:$8 sps:$4 sm:$0xff]   ;;  %v2423_v30 = vld [vmem:[#allocation4 + $0xd2] ss:$2 sm:$0xf] }
 0x2f1   :  { %3488 = vmatprep.subr.bf16.mxu1 %v4750_v43  ;;  %v4804_v43 = vld [vmem:[%s6034_s3 + $0x3a4] ss:$8 sps:$4 sm:$0xff]   ;;  %v4817_v5 = vld [vmem:[%s6034_s3 + $0x3f0] ss:$8 sps:$4 sm:$0xff]   ;;  %v4820_v12 = vld [vmem:[%s6034_s3 + $0x400] ss:$8 sps:$4 sm:$0xff]  }
 0x2f2   :  { %v2425_v48 = vld [vmem:[#allocation4 + $0xf2] ss:$2 sm:$0xf]  ;;  %v4825_v41 = vld [vmem:[%s6034_s3 + $0x414] ss:$8 sps:$4 sm:$0xff]  }
 0x2f3   :  { %v2427_v54 = vld [vmem:[#allocation4 + $0x112] ss:$2 sm:$0xf]  ;;  %v2391_v44 = vld [vmem:[#allocation4 + $0x102] ss:$2 sm:$0xf] }
 0x2f4   :  { %3489 = vmatpush1.bf16.msra.mxu1 %v4748_v38  ;;  %v4802_v38 = vld [vmem:[%s6034_s3 + $0x3a0] ss:$8 sps:$4 sm:$0xff]   ;;  %v4822_v8 = vld [vmem:[%s6034_s3 + $0x404] ss:$8 sps:$4 sm:$0xff]   ;;  %v2439_v1 = vcombine.low %v2425_v48, %v2427_v54  ;;  %v4823_v56 = vld [vmem:[%s6034_s3 + $0x410] ss:$8 sps:$4 sm:$0xff]  }
 0x2f5   :  { %3490 = vmatprep.subr.bf16.mxu1 %v4753_v2  ;;  %v4807_v2 = vld [vmem:[%s6034_s3 + $0x3b4] ss:$8 sps:$4 sm:$0xff]   ;;  %v4826_v19 = vld [vmem:[%s6034_s3 + $0x420] ss:$8 sps:$4 sm:$0xff]   ;;  %v4829_v17 = vld [vmem:[%s6034_s3 + $0x430] ss:$8 sps:$4 sm:$0xff]  }
 0x2f6   :  { %v4831_v63 = vld [vmem:[%s6034_s3 + $0x434] ss:$8 sps:$4 sm:$0xff]   ;;  %v4834_v45 = vld [vmem:[%s6034_s3 + $0x444] ss:$8 sps:$4 sm:$0xff]   ;;  %v4832_v62 = vld [vmem:[%s6034_s3 + $0x440] ss:$8 sps:$4 sm:$0xff]  }
 0x2f7   :  { %v4835_v23 = vld [vmem:[%s6034_s3 + $0x450] ss:$8 sps:$4 sm:$0xff]   ;;  %v4840_v52 = vld [vmem:[%s6034_s3 + $0x464] ss:$8 sps:$4 sm:$0xff]  }
 0x2f8   :  { %3491 = vmatpush1.bf16.msra.mxu1 %v4751_v40  ;;  %v4805_v40 = vld [vmem:[%s6034_s3 + $0x3b0] ss:$8 sps:$4 sm:$0xff]  }
 0x2f9   :  { %3492 = vmatprep.subr.bf16.mxu1 %v4756_v7  ;;  %v4810_v7 = vld [vmem:[%s6034_s3 + $0x3c4] ss:$8 sps:$4 sm:$0xff]  }
 0x2fc   :  { %3493 = vmatpush1.bf16.msra.mxu1 %v4754_v6  ;;  %v4808_v6 = vld [vmem:[%s6034_s3 + $0x3c0] ss:$8 sps:$4 sm:$0xff]  }
 0x2fd   :  { %3494 = vmatprep.subr.bf16.mxu1 %v4759_v10  ;;  %v4813_v10 = vld [vmem:[%s6034_s3 + $0x3d4] ss:$8 sps:$4 sm:$0xff]  }
 0x300   :  { %3495 = vmatpush1.bf16.msra.mxu1 %v4757_v50  ;;  %v4811_v50 = vld [vmem:[%s6034_s3 + $0x3d0] ss:$8 sps:$4 sm:$0xff]  }
 0x301   :  { %3496 = vmatprep.subr.bf16.mxu1 %v4762_v16  ;;  %v4816_v16 = vld [vmem:[%s6034_s3 + $0x3e4] ss:$8 sps:$4 sm:$0xff]  }
 0x304   :  { %3497 = vmatpush1.bf16.msra.mxu1 %v4760_v21  ;;  %v4814_v21 = vld [vmem:[%s6034_s3 + $0x3e0] ss:$8 sps:$4 sm:$0xff]  }
 0x305   :  { %3498 = vmatprep.subr.bf16.mxu1 %v4765_v42  ;;  %v4819_v42 = vld [vmem:[%s6034_s3 + $0x3f4] ss:$8 sps:$4 sm:$0xff]  }
 0x308   :  { %3499 = vmatpush1.bf16.msra.mxu1 %v4763_v47  ;;  %v2377_v47 = vld [vmem:[#allocation4 + $0x2] ss:$2 sm:$0xf] }
 0x309   :  { %3500 = vmatprep.subr.bf16.mxu1 %v4768_v59  ;;  %v2379_v59 = vld [vmem:[#allocation4 + $0x22] ss:$2 sm:$0xf] }
 0x30a   :  { %v2400_v31 = vcombine.low %v2377_v47, %v2379_v59 }
 0x30c   :  { %3501 = vmatpush1.bf16.msra.mxu1 %v4766_v61  ;;  %v2381_v61 = vld [vmem:[#allocation4 + $0x42] ss:$2 sm:$0xf] }
 0x30d   :  { %3502 = vmatprep.subr.bf16.mxu1 %v4771_v26  ;;  %v2383_v26 = vld [vmem:[#allocation4 + $0x62] ss:$2 sm:$0xf] }
 0x30e   :  { %v2401_v28 = vcombine.low %v2381_v61, %v2383_v26 }
 0x310   :  { %3503 = vmatpush1.bf16.msra.mxu1 %v4769_v34  ;;  %v2438_v34 = vcombine.low %v2421_v9, %v2423_v30  ;;  %v2408_v14 = vpack.c.bf16 %v2401_v28, %v2400_v31 }
 0x311   :  { %3525 = vmatprep.subr.bf16.mxu1 %v4774_v18  ;;  %v2385_v18 = vld [vmem:[#allocation4 + $0xa2] ss:$2 sm:$0xf] }
 0x313   :  { %3505 = vmatmul.mubr.bf16.vlgmr.msra.gmra.mrb[32].mxu1 %v2336_v39  ;;  %v2389_v39 = vld [vmem:[#allocation4 + $0xe2] ss:$2 sm:$0xf] }
 0x314   :  { %3514 = vmatprep.mubr.bf16.mxu1 %v2373_v25  ;;  %3526 = vmatpush1.bf16.msra.mxu1 %v4772_v33  ;;  %v2387_v33 = vld [vmem:[#allocation4 + $0xc2] ss:$2 sm:$0xf]  ;;  %v2403_v15 = vcombine.low %v2389_v39, %v2391_v44  ;;  %v4828_v25 = vld [vmem:[%s6034_s3 + $0x424] ss:$8 sps:$4 sm:$0xff]  }
 0x315   :  { %3527 = vmatprep.subr.bf16.mxu1 %v4777_v27  ;;  %v2445_v27 = vpack.c.bf16 %v2439_v1, %v2438_v34  ;;  %v2402_v20 = vcombine.low %v2385_v18, %v2387_v33 }
 0x317   :  { %v2409_v53 = vpack.c.bf16 %v2403_v15, %v2402_v20 }
 0x318   :  { %3528 = vmatpush1.bf16.msra.mxu1 %v4775_v24  ;;  %v4855_v24 = vmov 0  }
 0x319   :  { %3529 = vmatprep.subr.bf16.mxu1 %v4780_v37  ;;  %v4837_v37 = vld [vmem:[%s6034_s3 + $0x454] ss:$8 sps:$4 sm:$0xff]  }
 0x31b   :  { %3515 = vmatmul.mubr.bf16.gmra.mrb[36].mxu1 %v2337_v46  ;;  %v2449_v46 = vld [vmem:[#allocation4 + $0x22] ss:$2 sm:$0xf] }
 0x31c   :  { %3530 = vmatpush1.bf16.msra.mxu1 %v4778_v55  ;;  %3557 = vmatprep.mubr.bf16.mxu1 %v2444_v57  ;;  %v4838_v55 = vld [vmem:[%s6034_s3 + $0x460] ss:$8 sps:$4 sm:$0xff]   ;;  %v2451_v57 = vld [vmem:[#allocation4 + $0x42] ss:$2 sm:$0xf] }
 0x31d   :  { %3531 = vmatprep.subr.bf16.mxu1 %v4783_v32  ;;  %v4843_v32 = vld [vmem:[%s6034_s3 + $0x474] ss:$8 sps:$4 sm:$0xff]  }
 0x320   :  { %3532 = vmatpush1.bf16.msra.mxu1 %v4781_v60  ;;  %v2453_v60 = vld [vmem:[#allocation4 + $0x62] ss:$2 sm:$0xf] }
 0x321   :  { %3533 = vmatprep.subr.bf16.mxu1 %v4786_v11  ;;  %v2455_v11 = vld [vmem:[#allocation4 + $0x82] ss:$2 sm:$0xf] }
 0x324   :  { %3534 = vmatpush1.bf16.msra.mxu1 %v4784_v29  ;;  %v4841_v29 = vld [vmem:[%s6034_s3 + $0x470] ss:$8 sps:$4 sm:$0xff]  }
 0x325   :  { %3535 = vmatprep.subr.bf16.mxu1 %v4789_v58  ;;  %v2472_v58 = vcombine.low %v2449_v46, %v2451_v57 }
 0x328   :  { %3536 = vmatpush1.bf16.msra.mxu1 %v4787_v35  ;;  %v2473_v35 = vcombine.low %v2453_v60, %v2455_v11 }
 0x329   :  { %3537 = vmatprep.subr.bf16.mxu1 %v4792_v49 }
 0x32a   :  { %v2480_v49 = vpack.c.bf16 %v2473_v35, %v2472_v58 }
 0x32c   :  { %3538 = vmatpush1.bf16.msra.mxu1 %v4790_v22  ;;  %v2457_v22 = vld [vmem:[#allocation4 + $0xc2] ss:$2 sm:$0xf] }
 0x32d   :  { %3539 = vmatprep.subr.bf16.mxu1 %v4795_v51  ;;  %v2459_v51 = vld [vmem:[#allocation4 + $0xe2] ss:$2 sm:$0xf] }
 0x330   :  { %3540 = vmatpush1.bf16.msra.mxu1 %v4793_v0  ;;  %v2461_v0 = vld [vmem:[#allocation4 + $0x102] ss:$2 sm:$0xf] }
 0x331   :  { %3541 = vmatprep.subr.bf16.mxu1 %v4798_v4  ;;  %v2463_v4 = vld [vmem:[#allocation4 + $0x122] ss:$2 sm:$0xf] }
 0x334   :  { %3542 = vmatpush1.bf16.msra.mxu1 %v4796_v36  ;;  %v2474_v36 = vcombine.low %v2457_v22, %v2459_v51 }
 0x335   :  { %3543 = vmatprep.subr.bf16.mxu1 %v4801_v13  ;;  %v2475_v13 = vcombine.low %v2461_v0, %v2463_v4 }
 0x338   :  { %3544 = vmatpush1.bf16.msra.mxu1 %v4799_v3  ;;  %v2481_v3 = vpack.c.bf16 %v2475_v13, %v2474_v36 }
 0x339   :  { %3545 = vmatprep.subr.bf16.mxu1 %v4804_v43 }
 0x33c   :  { %3546 = vmatpush1.bf16.msra.mxu1 %v4802_v38 }
 0x33d   :  { %3547 = vmatprep.subr.bf16.mxu1 %v4807_v2 }
 0x340   :  { %3548 = vmatpush1.bf16.msra.mxu1 %v4805_v40 }
 0x341   :  { %3549 = vmatprep.subr.bf16.mxu1 %v4810_v7 }
 0x344   :  { %3550 = vmatpush1.bf16.msra.mxu1 %v4808_v6 }
 0x345   :  { %3551 = vmatprep.subr.bf16.mxu1 %v4813_v10 }
 0x348   :  { %3552 = vmatpush1.bf16.msra.mxu1 %v4811_v50 }
 0x349   :  { %3553 = vmatprep.subr.bf16.mxu1 %v4816_v16 }
 0x34c   :  { %3554 = vmatpush1.bf16.msra.mxu1 %v4814_v21 }
 0x34d   :  { %3555 = vmatprep.subr.bf16.mxu1 %v4819_v42 }
 0x350   :  { %3556 = vmatpush1.bf16.msra.mxu1 %v4817_v5 }
 0x351   :  { %3578 = vmatprep.subr.bf16.mxu1 %v4822_v8 }
 0x353   :  { %3558 = vmatmul.mubr.bf16.vlgmr.msra.gmra.mrb[32].mxu1 %v2408_v14 }
 0x354   :  { %3567 = vmatprep.mubr.bf16.mxu1 %v2445_v27  ;;  %3579 = vmatpush1.bf16.msra.mxu1 %v4820_v12 }
 0x355   :  { %3580 = vmatprep.subr.bf16.mxu1 %v4825_v41 }
 0x358   :  { %3581 = vmatpush1.bf16.msra.mxu1 %v4823_v56 }
 0x359   :  { %3582 = vmatprep.subr.bf16.mxu1 %v4828_v25 }
 0x35b   :  { %3568 = vmatmul.mubr.bf16.gmra.mrb[36].mxu1 %v2409_v53 }
 0x35c   :  { %3583 = vmatpush1.bf16.msra.mxu1 %v4826_v19  ;;  %3610 = vmatprep.mubr.bf16.mxu1 %v4855_v24 }
 0x35d   :  { %3584 = vmatprep.subr.bf16.mxu1 %v4831_v63 }
 0x360   :  { %3585 = vmatpush1.bf16.msra.mxu1 %v4829_v17 }
 0x361   :  { %3586 = vmatprep.subr.bf16.mxu1 %v4834_v45 }
 0x364   :  { %3587 = vmatpush1.bf16.msra.mxu1 %v4832_v62 }
 0x365   :  { %3588 = vmatprep.subr.bf16.mxu1 %v4837_v37 }
 0x368   :  { %3589 = vmatpush1.bf16.msra.mxu1 %v4835_v23 }
 0x369   :  { %3590 = vmatprep.subr.bf16.mxu1 %v4840_v52 }
 0x36c   :  { %3591 = vmatpush1.bf16.msra.mxu1 %v4838_v55 }
 0x36d   :  { %3592 = vmatprep.subr.bf16.mxu1 %v4843_v32 }
 0x370   :  { %3593 = vmatpush1.bf16.msra.mxu1 %v4841_v29 }
 0x373   :  { %3611 = vmatmul.mubr.bf16.vlgmr.msra.gmra.mrb[32].mxu1 %v2480_v49 }
 0x374   :  { %3620 = vmatprep.mubr.bf16.mxu1 %v4855_v24 }
 0x37b   :  { %3621 = vmatmul.mubr.bf16.gmra.mrb[36].mxu1 %v2481_v3 }
 0x39e   :  { %v3400_v43 = vpop.f32.mrb[132].mxu0 }
 0x39f   :  { %v3402_v38 = vpop.f32.mrb[133].mxu0 }
 0x3a0   :  { %v3404_v2 = vpop.f32.mrb[134].mxu0 }
 0x3a1   :  { %v3406_v40 = vpop.f32.mrb[135].mxu0 }
 0x3af   :  { %v3410_v7 = vpop.f32.mrb[136].mxu0 }
 0x3b0   :  { %v3412_v6 = vpop.f32.mrb[137].mxu0 }
 0x3b1   :  { %v3414_v10 = vpop.f32.mrb[138].mxu0 }
 0x3b2   :  { %v3416_v50 = vpop.f32.mrb[139].mxu0 }
 0x446   :  { %v3612_v16 = vpop.f32.mrb[32].mxu1 }
 0x447   :  { %v5952_v21 = vadd.f32 %v3612_v16, %v3400_v43  ;;  %v3614_v42 = vpop.f32.mrb[33].mxu1 }
 0x448   :  { %v5954_v47 = vadd.f32 %v3614_v42, %v3402_v38  ;;  %v3616_v59 = vpop.f32.mrb[34].mxu1 }
 0x449   :  { %v5956_v61 = vadd.f32 %v3616_v59, %v3404_v2  ;;  %v3618_v26 = vpop.f32.mrb[35].mxu1  ;;  %v3653_v30 = vmul.f32 %v5952_v21, %v5952_v21 }
 0x44a   :  { %v5958_v9 = vadd.f32 %v3618_v26, %v3406_v40  ;;  %v3654_v5 = vmul.f32 %v5954_v47, %v5954_v47 }
 0x44b   :  { %v3633_v48 = vadd.f32 %v5956_v61, %v5952_v21  ;;  %v3655_v54 = vmul.f32 %v5956_v61, %v5956_v61 }
 0x44c   :  { %v3642_v31 = vadd.f32 %v5958_v9, %v5954_v47  ;;  %v3656_v28 = vmul.f32 %v5958_v9, %v5958_v9 }
 0x44d   :  { %v3661_v8 = vadd.f32 %v3655_v54, %v3653_v30 }
 0x44e   :  { %v3670_v34 = vadd.f32 %v3656_v28, %v3654_v5  ;;  %v3622_v1 = vpop.f32.mrb[36].mxu1 }
 0x44f   :  { %v5972_v12 = vadd.f32 %v3622_v1, %v3410_v7  ;;  %v3624_v18 = vpop.f32.mrb[37].mxu1 }
 0x450   :  { %v5974_v14 = vadd.f32 %v3624_v18, %v3412_v6  ;;  %v3626_v41 = vpop.f32.mrb[38].mxu1  ;;  %v3708_v18 = vlaneseq }
 0x451   :  { %v3634_v33 = vadd.f32 %v5972_v12, %v3633_v48  ;;  %v3657_v27 = vmul.f32 %v5972_v12, %v5972_v12  ;;  %v5979_v39 = vadd.f32 %v3626_v41, %v3414_v10  ;;  %v3628_v44 = vpop.f32.mrb[39].mxu1 }
 0x452   :  { %v3643_v56 = vadd.f32 %v5974_v14, %v3642_v31  ;;  %v3658_v20 = vmul.f32 %v5974_v14, %v5974_v14  ;;  %v5984_v15 = vadd.f32 %v3628_v44, %v3416_v50 }
 0x453   :  { %v3662_v25 = vadd.f32 %v3661_v8, %v3657_v27  ;;  %v3635_v19 = vadd.f32 %v5979_v39, %v3634_v33  ;;  %v3659_v53 = vmul.f32 %v5979_v39, %v5979_v39  ;;  %v6001_v27 = vshrl.u32 %v3708_v18, 7 }
 0x454   :  { %v3671_v63 = vadd.f32 %v3670_v34, %v3658_v20  ;;  %v3644_v17 = vadd.f32 %v5984_v15, %v3643_v56  ;;  %v3660_v24 = vmul.f32 %v5984_v15, %v5984_v15 }
 0x455   :  { %v3636_v45 = vrot.slane %v3635_v19, 4  ;;  %v3663_v62 = vadd.f32 %v3662_v25, %v3659_v53 }
 0x456   :  { %v3645_v37 = vrot.slane %v3644_v17, 4  ;;  %v3672_v23 = vadd.f32 %v3671_v63, %v3660_v24 }
 0x457   :  { %v3637_v52 = vadd.f32 %v3636_v45, %v3635_v19  ;;  %v3664_v55 = vrot.slane %v3663_v62, 4 }
 0x458   :  { %v3646_v46 = vadd.f32 %v3645_v37, %v3644_v17  ;;  %v3673_v32 = vrot.slane %v3672_v23, 4 }
 0x459   :  { %v3638_v57 = vrot.slane %v3637_v52, 2  ;;  %v3665_v60 = vadd.f32 %v3664_v55, %v3663_v62 }
 0x45a   :  { %v3647_v11 = vrot.slane %v3646_v46, 2  ;;  %v3674_v29 = vadd.f32 %v3673_v32, %v3672_v23 }
 0x45b   :  { %v3639_v58 = vadd.f32 %v3638_v57, %v3637_v52  ;;  %v3666_v35 = vrot.slane %v3665_v60, 2 }
 0x45c   :  { %v3648_v49 = vadd.f32 %v3647_v11, %v3646_v46  ;;  %v3675_v22 = vrot.slane %v3674_v29, 2 }
 0x45d   :  { %v3640_v51 = vrot.slane %v3639_v58, 1  ;;  %v3667_v0 = vadd.f32 %v3666_v35, %v3665_v60 }
 0x45e   :  { %v3649_v4 = vrot.slane %v3648_v49, 1  ;;  %v3676_v36 = vadd.f32 %v3675_v22, %v3674_v29  ;;  %v3769_v22 = vld [vmem:[%s6039_s4] sm:$0xff] }
 0x45f   :  { %v3641_v13 = vadd.f32 %v3640_v51, %v3639_v58  ;;  %v3668_v3 = vrot.slane %v3667_v0, 1  ;;  %v3770_v51 = vld [vmem:[%s6039_s4 + $0x8] sm:$0xff] }
 0x460   :  { %v3650_v43 = vadd.f32 %v3649_v4, %v3648_v49  ;;  %v3677_v38 = vrot.slane %v3676_v36, 1 }
 0x461   :  { %v3651_v2 = vmul.f32 0.03125, %v3641_v13  ;;  %v3669_v40 = vadd.f32 %v3668_v3, %v3667_v0 }
 0x462   :  { %v3652_v7 = vmul.f32 0.03125, %v3650_v43  ;;  %v3678_v6 = vadd.f32 %v3677_v38, %v3676_v36 }
 0x463   :  { %v3679_v10 = vmul.f32 0.03125, %v3669_v40  ;;  %v3681_v50 = vmul.f32 %v3651_v2, %v3651_v2  ;;  %v3693_v16 = vsub.f32 %v5979_v39, %v3651_v2  ;;  %v3691_v42 = vsub.f32 %v5972_v12, %v3651_v2 }
 0x464   :  { %v3680_v59 = vmul.f32 0.03125, %v3678_v6  ;;  %v3682_v26 = vmul.f32 %v3652_v7, %v3652_v7  ;;  %v3694_v30 = vsub.f32 %v5984_v15, %v3652_v7  ;;  %v3692_v48 = vsub.f32 %v5974_v14, %v3652_v7 }
 0x465   :  { %v3683_v54 = vsub.f32 %v3679_v10, %v3681_v50  ;;  %v3687_v5 = vsub.f32 %v5952_v21, %v3651_v2  ;;  %v3688_v31 = vsub.f32 %v5954_v47, %v3652_v7  ;;  %v3689_v28 = vsub.f32 %v5956_v61, %v3651_v2  ;;  %v3631_v21 = vld [vmem:[%s6037_s7] sm:$0x3] }
 0x466   :  { %v3684_v8 = vsub.f32 %v3680_v59, %v3682_v26  ;;  %v3690_v34 = vsub.f32 %v5958_v9, %v3652_v7  ;;  %v3710_v14 = vsub.s32 0, %v6001_v27  ;;  %v3714_v47 = vsub.s32 1, %v6001_v27  ;;  %v3632_v61 = vld [vmem:[%s6038_s8] sm:$0x3] }
 0x467   :  { %v3685_v1 = vmax.f32 %v3683_v54, 0.0 }
 0x468   :  { %v3686_v41 = vmax.f32 %v3684_v8, 0.0  ;;  %v3711_v9 = vrot.slane %v3631_v21, %v3710_v14  ;;  %v3715_v44 = vrot.slane %v3631_v21, %v3714_v47  ;;  %v3730_v56 = vrot.slane %v3632_v61, %v3710_v14 }
 0x469   :  { %v3695_v12 = vadd.f32 1e-05, %v3685_v1  ;;  %v3734_v20 = vrot.slane %v3632_v61, %v3714_v47 }
 0x46a   :  { %v3696_v33 = vadd.f32 1e-05, %v3686_v41 }
 0x46b   :  { %4846 = vrsqrt.f32 %v3695_v12 }
 0x46c   :  { %4848 = vrsqrt.f32 %v3696_v33 }
 0x475   :  { %v4847_v39 = vpop.eup %4846 }
 0x476   :  { %v4849_v15 = vpop.eup %4848  ;;  %v3705_v25 = vmul.f32 %v4847_v39, %v3693_v16  ;;  %v3703_v19 = vmul.f32 %v4847_v39, %v3691_v42  ;;  %v3699_v53 = vmul.f32 %v4847_v39, %v3687_v5  ;;  %v3701_v63 = vmul.f32 %v4847_v39, %v3689_v28 }
 0x477   :  { %v3706_v17 = vmul.f32 %v4849_v15, %v3694_v30  ;;  %v3704_v24 = vmul.f32 %v4849_v15, %v3692_v48  ;;  %v3700_v45 = vmul.f32 %v4849_v15, %v3688_v31  ;;  %v3702_v62 = vmul.f32 %v4849_v15, %v3690_v34  ;;  %v3771_v30 = vld [vmem:[%s6039_s4 + $0x10] sm:$0xff]  ;;  %v3772_v48 = vld [vmem:[%s6039_s4 + $0x18] sm:$0xff] }
 0x478   :  { %v3724_v37 = vmul.f32 %v3711_v9, %v3705_v25  ;;  %v3722_v23 = vmul.f32 %v3711_v9, %v3703_v19  ;;  %v3718_v52 = vmul.f32 %v3711_v9, %v3699_v53  ;;  %v3720_v55 = vmul.f32 %v3711_v9, %v3701_v63 }
 0x479   :  { %v3725_v46 = vmul.f32 %v3715_v44, %v3706_v17  ;;  %v3723_v32 = vmul.f32 %v3715_v44, %v3704_v24  ;;  %v3719_v57 = vmul.f32 %v3715_v44, %v3700_v45  ;;  %v3721_v60 = vmul.f32 %v3715_v44, %v3702_v62 }
 0x47a   :  { %v3741_v11 = vadd.f32 %v3730_v56, %v3722_v23  ;;  %v3737_v29 = vadd.f32 %v3730_v56, %v3718_v52  ;;  %v3743_v58 = vadd.f32 %v3730_v56, %v3724_v37  ;;  %v3739_v35 = vadd.f32 %v3730_v56, %v3720_v55 }
 0x47b   :  { %v3742_v49 = vadd.f32 %v3734_v20, %v3723_v32  ;;  %v3738_v0 = vadd.f32 %v3734_v20, %v3719_v57  ;;  %v3744_v4 = vadd.f32 %v3734_v20, %v3725_v46  ;;  %v3740_v36 = vadd.f32 %v3734_v20, %v3721_v60 }
 0x47c   :  { %vm3749_vm5 = vcmp.ge.f32.partialorder %v3741_v11, 0.0  ;;  %v3757_v13 = vmul.f32 0.2, %v3741_v11  ;;  %vm3745_vm6 = vcmp.ge.f32.partialorder %v3737_v29, 0.0  ;;  %v3753_v3 = vmul.f32 0.2, %v3737_v29 }
 0x47d   :  { %vm3750_vm7 = vcmp.ge.f32.partialorder %v3742_v49, 0.0  ;;  %v3758_v43 = vmul.f32 0.2, %v3742_v49  ;;  %vm3746_vm8 = vcmp.ge.f32.partialorder %v3738_v0, 0.0  ;;  %v3754_v38 = vmul.f32 0.2, %v3738_v0 }
 0x47e   :  { %v3765_v2 = vsel %vm3749_vm5, %v3741_v11, %v3757_v13  ;;  %v3761_v40 = vsel %vm3745_vm6, %v3737_v29, %v3753_v3  ;;  %vm3751_vm9 = vcmp.ge.f32.partialorder %v3743_v58, 0.0  ;;  %vm3752_vm10 = vcmp.ge.f32.partialorder %v3744_v4, 0.0 }
 0x47f   :  { %v3766_v7 = vsel %vm3750_vm7, %v3742_v49, %v3758_v43  ;;  %v3777_v6 = vmul.f32 %v3769_v22, %v3765_v2  ;;  %v3762_v10 = vsel %vm3746_vm8, %v3738_v0, %v3754_v38  ;;  %v3773_v50 = vmul.f32 %v3769_v22, %v3761_v40 }
 0x480   :  { %v3778_v16 = vmul.f32 %v3770_v51, %v3766_v7  ;;  %v3774_v42 = vmul.f32 %v3770_v51, %v3762_v10  ;;  %v3759_v59 = vmul.f32 0.2, %v3743_v58  ;;  %v3760_v26 = vmul.f32 0.2, %v3744_v4 }
 0x481   :  { %vm3747_vm11 = vcmp.ge.f32.partialorder %v3739_v35, 0.0  ;;  %vm3748_vm12 = vcmp.ge.f32.partialorder %v3740_v36, 0.0  ;;  %v3755_v54 = vmul.f32 0.2, %v3739_v35  ;;  %v3756_v5 = vmul.f32 0.2, %v3740_v36 }
 0x482   :  { %v3787_v31 = vadd.f32 %v3778_v16, %v3777_v6  ;;  %v3781_v28 = vadd.f32 %v3774_v42, %v3773_v50  ;;  %v3767_v8 = vsel %vm3751_vm9, %v3743_v58, %v3759_v59  ;;  %v3768_v34 = vsel %vm3752_vm10, %v3744_v4, %v3760_v26 }
 0x483   :  { %v3779_v1 = vmul.f32 %v3771_v30, %v3767_v8  ;;  %v3780_v41 = vmul.f32 %v3772_v48, %v3768_v34  ;;  %v3763_v12 = vsel %vm3747_vm11, %v3739_v35, %v3755_v54  ;;  %v3764_v33 = vsel %vm3748_vm12, %v3740_v36, %v3756_v5 }
 0x484   :  { %3788 = vadd.xlane.f32.xlu1 %v3787_v31  ;;  %3782 = vadd.xlane.f32.xlu0 %v3781_v28  ;;  %v3775_v14 = vmul.f32 %v3771_v30, %v3763_v12  ;;  %v3776_v21 = vmul.f32 %v3772_v48, %v3764_v33  ;;  %v3798_v9 = vand.u32 127, %v3708_v18 }
 0x485   :  { %v3790_v47 = vadd.f32 %v3780_v41, %v3779_v1 }
 0x486   :  { %v3784_v61 = vadd.f32 %v3776_v21, %v3775_v14  ;;  %v3803_v39 = vadd.s32 4294967288, %v3798_v9  ;;  %v3801_v20 = vsub.s32 %v3798_v9, %v6001_v27 }
 0x488   :  { %3791 = vadd.xlane.f32.xlu1 %v3790_v47  ;;  %3785 = vadd.xlane.f32.xlu0 %v3784_v61  ;;  %v3806_v15 = vsub.s32 %v3803_v39, %v6001_v27 }
 0x511   :  { %v3789_v44 = vpop.xlane.xlu1 %3788  ;;  %v3783_v56 = vpop.xlane.xlu0 %3782 }
 0x512   :  { %v3813_v53 = vrot.slane %v3789_v44, %v3801_v20  ;;  %v3802_v63 = vrot.slane %v3783_v56, %v3801_v20 }
 0x515   :  { %v3792_v25 = vpop.xlane.xlu1 %3791  ;;  %v3786_v19 = vpop.xlane.xlu0 %3785 }
 0x516   :  { %v3817_v17 = vrot.slane %v3792_v25, %v3806_v15  ;;  %v3807_v24 = vrot.slane %v3786_v19, %v3806_v15 }
 0x518   :  { %v3809_v45 = vsel %vm3808_vm13, %v3807_v24, %v3802_v63  ;;  %v3818_v62 = vsel %vm3808_vm13, %v3817_v17, %v3813_v53 }
 0x519   :  { %v3820_v37 = vsel %vm3819_vm14, %v3818_v62, %v3809_v45 }
 0x51a   :  { %v3823_v18 = vsel %vm3822_vm15, %v3820_v37, 0.0 }
 0x51b   :  { %3824 = vadd.xlane.f32.xlu0 %v3823_v18 }
 0x5a8   :  { %v3825_v23 = vpop.xlane.xlu0 %3824 }
 0x5a9   :  { %v3826_v52 = vsub.f32 0.0, %v3825_v23 }
 0x5ab   :  { %v3827_v55 = vmul.f32 1.442695, %v3826_v52 }
 0x5ad   :  { %4850 = vpow2.f32 %v3827_v55 }
 0x5b7   :  { %v4851_v46 = vpop.eup %4850 }
 0x5b8   :  { %v3829_v27 = vadd.f32 1.0, %v4851_v46 }
 0x5ba   :  { %4852 = vrcp.f32 %v3829_v27 }
 0x5c4   :  { %v4853_v32 = vpop.eup %4852 }
 0x5c5   :  { %3832 = vst [vmem:[%s6040_s9] sm:$0x3] %v4853_v32 }

</bundles_post_ra>
